<compile_context>
chip_gen: v7x
topology: tpu7x:2x2x1
jax: 0.10.0
libtpu: 0.0.40
codegen_flags: <defaults>
</compile_context>

<pallas_src>
import jax
import jax.numpy as jnp
from jax.experimental import pallas as pl
from jax.experimental.pallas import tpu as pltpu


# ----------------------------------------------------------------------------
# Chip-adaptive classifier tiling (per perf review).
# ----------------------------------------------------------------------------
def _classifier_tiling():
    try:
        kind = jax.devices()[0].device_kind.lower()
    except Exception:  # pragma: no cover - defensive; default tiling is always valid
        kind = ""
    if "v7" in kind or "7x" in kind:
        return 2048, 512     # 2 hidden tiles -> one (2048,512)=2 MiB step per TC
    if "v6" in kind or "trillium" in kind:
        return 2048, 1024    # single TC: one 4 MiB fc1-weight step, <32 MiB scoped VMEM
    return 1024, 1024        # v5e & unknown: two 2 MiB steps, <16 MiB scoped VMEM


# ----------------------------------------------------------------------------
# Kernel 1: Conv2d(3x3, pad=1) + bias + ReLU + MaxPool2d(2), fully fused.
# ----------------------------------------------------------------------------
def _conv_relu_pool_kernel(p_ref, w_ref, b_ref, o_ref):
    """p: (4*M, Kp) bf16 im2col patches, rows ordered pooling-plane-major so the
    4 elements of every 2x2 pooling window live in 4 contiguous M-row blocks.
    w: (Kp, C) bf16 (zero-padded K rows).  b: (1, C) f32.
    o: (M, C) bf16 = pooled rows in (n, ho, wo) order, channels on lanes."""
    acc = jnp.dot(p_ref[...], w_ref[...],
                  preferred_element_type=jnp.float32)            # (4*M, C)
    acc = jnp.maximum(acc + b_ref[...], 0.0)                     # bias + ReLU
    m = o_ref.shape[0]
    # 2x2/stride-2 max-pool == elementwise max of the four plane blocks
    # (static, sublane-aligned slices only).
    pooled = jnp.maximum(jnp.maximum(acc[0 * m:1 * m], acc[1 * m:2 * m]),
                         jnp.maximum(acc[2 * m:3 * m], acc[3 * m:4 * m]))
    o_ref[...] = pooled.astype(o_ref.dtype)


def conv3x3_relu_maxpool(x_nhwc, w_im2col, b):
    """x: (N, H, W, Cin) f32; w_im2col: (Kp, Cout) bf16, row order (kh, kw, cin)
    with zero-padded rows up to Kp; b: (Cout,) f32.
    Returns (N, (H//2)*(W//2)*Cout) bf16, flattened in NHWC (h, w, c) order."""
    N, H, W, Cin = x_nhwc.shape
    Kp, Cout = w_im2col.shape
    Kdim = 9 * Cin
    Ho, Wo = H // 2, W // 2
    M = N * Ho * Wo

    # Layout glue on tiny tensors (a few KB): im2col, pad K 27->32, then reorder
    # rows to pooling-plane-major ((dh2, dw2), n, ho, wo) so the kernel's pool is
    # a max over 4 aligned row blocks. Column order (kh, kw, cin) matches w_im2col.
    xp = jnp.pad(x_nhwc, ((0, 0), (1, 1), (1, 1), (0, 0)))
    cols = [xp[:, dh:dh + H, dw:dw + W, :] for dh in range(3) for dw in range(3)]
    patches = jnp.concatenate(cols, axis=-1)                     # (N, H, W, 9*Cin)
    patches = jnp.pad(patches, ((0, 0), (0, 0), (0, 0), (0, Kp - Kdim)))
    patches = patches.reshape(N, Ho, 2, Wo, 2, Kp)
    patches = jnp.transpose(patches, (2, 4, 0, 1, 3, 5))         # (2,2,N,Ho,Wo,Kp)
    patches = patches.reshape(4 * M, Kp).astype(jnp.bfloat16)

    pooled = pl.pallas_call(
        _conv_relu_pool_kernel,
        out_shape=jax.ShapeDtypeStruct((M, Cout), jnp.bfloat16),
        grid=(1,),
        in_specs=[
            pl.BlockSpec((4 * M, Kp), lambda i: (0, 0)),
            pl.BlockSpec((Kp, Cout), lambda i: (0, 0)),
            pl.BlockSpec((1, Cout), lambda i: (0, 0)),
        ],
        out_specs=pl.BlockSpec((M, Cout), lambda i: (0, 0)),
    )(patches, w_im2col, b.reshape(1, Cout))
    # Rows are (n, ho, wo) with channels on lanes, so a plain reshape IS the
    # NHWC flatten; the matching row permutation is baked into fc1_w at init,
    # so no transpose is needed here (removed vs v2).
    return pooled.reshape(N, Ho * Wo * Cout)


# ----------------------------------------------------------------------------
# Kernel 2: classifier  Linear(2048->1000) + ReLU + [Dropout] + Linear(1000->10)
# fused; fc1 tiled over K (reduction) and optionally over the hidden dim
# ("parallel" axis, used only on 2-TensorCore chips).
# ----------------------------------------------------------------------------
def _mlp_kernel(x_ref, w1_ref, b1_ref, w2_ref, o_ref, acc_ref):
    # grid = (hidden tiles [parallel], K tiles [arbitrary/reduction])
    k = pl.program_id(1)

    @pl.when(k == 0)
    def _init():
        acc_ref[...] = jnp.zeros_like(acc_ref)

    acc_ref[...] += jnp.dot(x_ref[...], w1_ref[...],
                            preferred_element_type=jnp.float32)

    @pl.when(k == pl.num_programs(1) - 1)
    def _finalize():
        h = jnp.maximum(acc_ref[...] + b1_ref[...], 0.0)         # fc1 bias + ReLU
        # TODO(synk): nn.Dropout is identity in eval mode; training-mode random
        # masking is intentionally not emulated here.
        part = jnp.dot(h.astype(jnp.bfloat16), w2_ref[...],      # (partial) fc2
                       preferred_element_type=jnp.float32)
        o_ref[...] = part.astype(o_ref.dtype)


def fused_classifier(x, w1, b1, w2, *, tk=None, tn=None):
    """x: (M, K) bf16; w1: (K, N1) bf16; b1: (1, N1) f32; w2: (N1, N2) bf16.
    Returns per-hidden-tile fc2 partial sums of shape (N1//tn, M, N2) f32."""
    M, K = x.shape
    _, N1 = w1.shape
    _, N2 = w2.shape
    if tk is None or tn is None:
        tk_d, tn_d = _classifier_tiling()
        tk = tk if tk is not None else tk_d
        tn = tn if tn is not None else tn_d
    n_tiles, k_tiles = N1 // tn, K // tk

    cost = pl.CostEstimate(
        flops=2 * M * K * N1 + 2 * M * N1 * N2,
        transcendentals=0,
        bytes_accessed=int(w1.size * 2 + n_tiles * (w2.size * 2 + x.size * 2)
                           + b1.size * 4 + n_tiles * M * N2 * 4))

    return pl.pallas_call(
        _mlp_kernel,
        out_shape=jax.ShapeDtypeStruct((n_tiles, M, N2), jnp.float32),
        grid_spec=pltpu.PrefetchScalarGridSpec(
            num_scalar_prefetch=0,
            grid=(n_tiles, k_tiles),
            in_specs=[
                pl.BlockSpec((M, tk), lambda n, k: (0, k)),      # activations (bf16)
                pl.BlockSpec((tk, tn), lambda n, k: (k, n)),     # fc1 weight tile
                pl.BlockSpec((1, tn), lambda n, k: (0, n)),      # fc1 bias tile
                pl.BlockSpec((tn, N2), lambda n, k: (n, 0)),     # fc2 weight rows
            ],
            out_specs=pl.BlockSpec((None, M, N2), lambda n, k: (n, 0, 0)),
            scratch_shapes=[pltpu.VMEM((M, tn), jnp.float32)],
        ),
        compiler_params=pltpu.CompilerParams(
            dimension_semantics=("parallel", "arbitrary")),
        cost_estimate=cost,
    )(x, w1, b1, w2)


# ----------------------------------------------------------------------------
# Parameter init (mirrors _initialize_weights); bf16 cast, lane padding, and the
# NCHW->NHWC flatten permutation of fc1_w are all done once here, so the forward
# pass never re-lays-out the 4 MB fc1 weight or transposes activations.
# ----------------------------------------------------------------------------
def init_params(key, in_ch, img_size, max_pool, num_classes,
                hidden=1000, hidden_pad=1024, cls_pad=128):
    conv_out_ch = 64 * (2 ** max_pool)            # 128
    conv_out_sz = img_size
    for _ in range(max_pool):
        conv_out_sz = int((conv_out_sz - 2) / 2 + 1)
    flat = conv_out_sz * conv_out_sz * conv_out_ch   # 2048

    k1, k2, k3 = jax.random.split(key, 3)

    # Conv2d: xavier_normal_ weight, zero bias. Stored pre-reshaped to im2col
    # layout (9*Cin, Cout) with row order (kh, kw, cin), zero-padded along K to
    # a sublane multiple (27 -> 32), cast to bf16.
    kdim = 9 * in_ch
    kpad = ((kdim + 7) // 8) * 8
    fan_in, fan_out = in_ch * 9, conv_out_ch * 9
    xavier_std = (2.0 / (fan_in + fan_out)) ** 0.5
    conv_w = xavier_std * jax.random.normal(k1, (3, 3, in_ch, conv_out_ch),
                                            jnp.float32)
    conv_w = conv_w.reshape(kdim, conv_out_ch)
    conv_w = jnp.pad(conv_w, ((0, kpad - kdim), (0, 0))).astype(jnp.bfloat16)
    conv_b = jnp.zeros((conv_out_ch,), jnp.float32)

    # Linear 1: normal(0, 0.01) weight, zero bias. Stored as (in, out) with
    #  * rows permuted from PyTorch's NCHW-flatten order (c, h, w) to the
    #    kernel's NHWC-flatten order (h, w, c) — folds x.view()'s implicit
    #    transpose into the weight once, at init (numerically identical),
    #  * hidden padded 1000 -> 1024 with zero columns (lane-dense stores).
    fc1_w = 0.01 * jax.random.normal(k2, (flat, hidden), jnp.float32)
    fc1_w = fc1_w.reshape(conv_out_ch, conv_out_sz, conv_out_sz, hidden)
    fc1_w = jnp.transpose(fc1_w, (1, 2, 0, 3)).reshape(flat, hidden)
    fc1_w = jnp.pad(fc1_w, ((0, 0), (0, hidden_pad - hidden))).astype(jnp.bfloat16)
    fc1_b = jnp.zeros((1, hidden_pad), jnp.float32)

    # Linear 2: normal(0, 0.01) weight, zero bias; padded to (1024, 128), bf16.
    # Padded hidden units have zero fc1 weight+bias (ReLU(0)=0) and zero fc2
    # rows, padded class lanes are sliced off -> padding is numerically exact.
    fc2_w = 0.01 * jax.random.normal(k3, (hidden, num_classes), jnp.float32)
    fc2_w = jnp.pad(fc2_w, ((0, hidden_pad - hidden), (0, cls_pad - num_classes)))
    fc2_w = fc2_w.astype(jnp.bfloat16)
    fc2_b = jnp.zeros((num_classes,), jnp.float32)

    return dict(conv_w=conv_w, conv_b=conv_b,
                fc1_w=fc1_w, fc1_b=fc1_b, fc2_w=fc2_w, fc2_b=fc2_b)


# ----------------------------------------------------------------------------
# Forward pass (Net.forward)
# ----------------------------------------------------------------------------
def net_forward(params, x_nchw):
    n_cls = params["fc2_b"].shape[0]
    # NCHW (PyTorch) -> NHWC so the 128 conv channels sit on the lane axis.
    x = jnp.transpose(x_nchw, (0, 2, 3, 1))
    # conv_layers: Conv2d(3x3, pad=1) -> ReLU -> MaxPool2d(2)   (one kernel)
    # Returned already flattened (N, 2048) bf16 in NHWC order; the matching
    # row permutation lives in fc1_w, so x.view(N, -1) semantics are preserved.
    flat = conv3x3_relu_maxpool(x, params["conv_w"], params["conv_b"])
    # classifier: Linear -> ReLU -> Dropout -> Linear             (one kernel)
    part = fused_classifier(flat, params["fc1_w"], params["fc1_b"],
                            params["fc2_w"])
    # Sum the per-hidden-tile fc2 partials (tiny; 1 tile on single-TC chips),
    # drop lane padding, add fc2 bias.
    logits = jnp.sum(part, axis=0)[:, :n_cls] + params["fc2_b"]
    return logits


if __name__ == "__main__":
    BATCH, IN_CH, IMG, MAXPOOL, NUM_CLASSES = 2, 3, 8, 1, 10

    key = jax.random.PRNGKey(0)
    k_params, k_x = jax.random.split(key)
    params = init_params(k_params, IN_CH, IMG, MAXPOOL, NUM_CLASSES)
    x = jax.random.normal(k_x, (BATCH, IN_CH, IMG, IMG), jnp.float32)

    out = jax.jit(net_forward)(params, x)
    out = jax.block_until_ready(out)
    assert out.shape == (BATCH, NUM_CLASSES), out.shape
    assert out.dtype == jnp.float32
    print("KERNEL_OK")
</pallas_src>

<mosaic_0001>
module attributes {stable_mosaic.version = 11 : i64} {
  func.func @_conv_relu_pool_kernel(%arg0: i32, %arg1: memref<128x32xbf16, #tpu.memory_space<vmem>>, %arg2: memref<32x128xbf16, #tpu.memory_space<vmem>>, %arg3: memref<1x128xf32, #tpu.memory_space<vmem>>, %arg4: memref<32x128xbf16, #tpu.memory_space<vmem>>) attributes {dimension_semantics = [#tpu.dimension_semantics<arbitrary>], iteration_bounds = array<i64: 1>, scalar_prefetch = 0 : i64, scratch_operands = 0 : i64, tpu.core_type = #tpu.core_type<tc>, window_params = [{pipeline_mode = #tpu.pipeline_mode<synchronous>, transform_indices = @transform_0, window_bounds = array<i64: 128, 32>}, {pipeline_mode = #tpu.pipeline_mode<synchronous>, transform_indices = @transform_1, window_bounds = array<i64: 32, 128>}, {pipeline_mode = #tpu.pipeline_mode<synchronous>, transform_indices = @transform_2, window_bounds = array<i64: 1, 128>}, {pipeline_mode = #tpu.pipeline_mode<synchronous>, transform_indices = @transform_3, window_bounds = array<i64: 32, 128>}]} {
    %c0 = arith.constant 0 : index
    %c0_0 = arith.constant 0 : index
    %0 = vector.load %arg1[%c0, %c0_0] : memref<128x32xbf16, #tpu.memory_space<vmem>>, vector<128x32xbf16>
    %c0_1 = arith.constant 0 : index
    %c0_2 = arith.constant 0 : index
    %1 = vector.load %arg2[%c0_1, %c0_2] : memref<32x128xbf16, #tpu.memory_space<vmem>>, vector<32x128xbf16>
    %cst = arith.constant dense<0.000000e+00> : vector<128x128xf32>
    %2 = tpu.matmul %0, %1, %cst {dimension_numbers = #tpu.dot_dimension_numbers<[1], [0], [0], [1], [0, 0, 1, 1], [], []>} : vector<128x32xbf16>, vector<32x128xbf16>, vector<128x128xf32> -> vector<128x128xf32>
    %c0_3 = arith.constant 0 : index
    %c0_4 = arith.constant 0 : index
    %3 = vector.load %arg3[%c0_3, %c0_4] : memref<1x128xf32, #tpu.memory_space<vmem>>, vector<1x128xf32>
    %4 = vector.broadcast %3 : vector<1x128xf32> to vector<128x128xf32>
    %5 = arith.addf %2, %4 : vector<128x128xf32>
    %cst_5 = arith.constant 0.000000e+00 : f32
    %6 = vector.broadcast %cst_5 : f32 to vector<128x128xf32>
    %7 = arith.maximumf %5, %6 : vector<128x128xf32>
    %8 = vector.extract_strided_slice %7 {offsets = [0, 0], sizes = [32, 128], strides = [1, 1]} : vector<128x128xf32> to vector<32x128xf32>
    %9 = vector.extract_strided_slice %7 {offsets = [32, 0], sizes = [32, 128], strides = [1, 1]} : vector<128x128xf32> to vector<32x128xf32>
    %10 = arith.maximumf %8, %9 : vector<32x128xf32>
    %11 = vector.extract_strided_slice %7 {offsets = [64, 0], sizes = [32, 128], strides = [1, 1]} : vector<128x128xf32> to vector<32x128xf32>
    %12 = vector.extract_strided_slice %7 {offsets = [96, 0], sizes = [32, 128], strides = [1, 1]} : vector<128x128xf32> to vector<32x128xf32>
    %13 = arith.maximumf %11, %12 : vector<32x128xf32>
    %14 = arith.maximumf %10, %13 : vector<32x128xf32>
    %15 = arith.truncf %14 : vector<32x128xf32> to vector<32x128xbf16>
    %c0_6 = arith.constant 0 : index
    %c0_7 = arith.constant 0 : index
    %16 = vector.load %arg4[%c0_6, %c0_7] : memref<32x128xbf16, #tpu.memory_space<vmem>>, vector<32x128xbf16>
    tpu.vector_store %arg4[%c0_6, %c0_7], %15 {strides = array<i32>} : memref<32x128xbf16, #tpu.memory_space<vmem>>, vector<32x128xbf16>,
    return
  }
  func.func @transform_0(%arg0: i32) -> (i32, i32) {
    %c0_i32 = arith.constant 0 : i32
    %c0_i32_0 = arith.constant 0 : i32
    %c0_i32_1 = arith.constant 0 : i32
    return %c0_i32, %c0_i32_0 : i32, i32
  }
  func.func @transform_1(%arg0: i32) -> (i32, i32) {
    %c0_i32 = arith.constant 0 : i32
    %c0_i32_0 = arith.constant 0 : i32
    %c0_i32_1 = arith.constant 0 : i32
    return %c0_i32, %c0_i32_0 : i32, i32
  }
  func.func @transform_2(%arg0: i32) -> (i32, i32) {
    %c0_i32 = arith.constant 0 : i32
    %c0_i32_0 = arith.constant 0 : i32
    %c0_i32_1 = arith.constant 0 : i32
    return %c0_i32, %c0_i32_0 : i32, i32
  }
  func.func @transform_3(%arg0: i32) -> (i32, i32) {
    %c0_i32 = arith.constant 0 : i32
    %c0_i32_0 = arith.constant 0 : i32
    %c0_i32_1 = arith.constant 0 : i32
    return %c0_i32, %c0_i32_0 : i32, i32
  }
}

module attributes {stable_mosaic.version = 11 : i64} {
  func.func @_mlp_kernel(%arg0: i32, %arg1: i32, %arg2: memref<2x1024xbf16, #tpu.memory_space<vmem>>, %arg3: memref<1024x1024xbf16, #tpu.memory_space<vmem>>, %arg4: memref<1x1024xf32, #tpu.memory_space<vmem>>, %arg5: memref<1024x128xbf16, #tpu.memory_space<vmem>>, %arg6: memref<1x2x128xf32, #tpu.memory_space<vmem>>, %arg7: memref<2x1024xf32, #tpu.memory_space<vmem>>) attributes {dimension_semantics = [#tpu.dimension_semantics<parallel>, #tpu.dimension_semantics<arbitrary>], iteration_bounds = array<i64: 1, 2>, scalar_prefetch = 0 : i64, scratch_operands = 1 : i64, tpu.core_type = #tpu.core_type<tc>, window_params = [{transform_indices = @transform_0, window_bounds = array<i64: 2, 1024>}, {transform_indices = @transform_1, window_bounds = array<i64: 1024, 1024>}, {transform_indices = @transform_2, window_bounds = array<i64: 1, 1024>}, {transform_indices = @transform_3, window_bounds = array<i64: 1024, 128>}, {transform_indices = @transform_4, window_bounds = array<i64: 1, 2, 128>}]} {
    %c0_i32 = arith.constant 0 : i32
    %0 = arith.cmpi eq, %arg1, %c0_i32 : i32
    %1 = arith.extui %0 : i1 to i32
    %c0_i32_0 = arith.constant 0 : i32
    %2 = arith.cmpi ne, %1, %c0_i32_0 : i32
    scf.if %2 {
      %cst_9 = arith.constant 0.000000e+00 : f32
      %12 = vector.broadcast %cst_9 : f32 to vector<2x1024xf32>
      %c0_10 = arith.constant 0 : index
      %c0_11 = arith.constant 0 : index
      %13 = vector.load %arg7[%c0_10, %c0_11] : memref<2x1024xf32, #tpu.memory_space<vmem>>, vector<2x1024xf32>
      tpu.vector_store %arg7[%c0_10, %c0_11], %12 {strides = array<i32>} : memref<2x1024xf32, #tpu.memory_space<vmem>>, vector<2x1024xf32>,
    } else {
    }
    %c0 = arith.constant 0 : index
    %c0_1 = arith.constant 0 : index
    %3 = vector.load %arg7[%c0, %c0_1] : memref<2x1024xf32, #tpu.memory_space<vmem>>, vector<2x1024xf32>
    %c0_2 = arith.constant 0 : index
    %c0_3 = arith.constant 0 : index
    %4 = vector.load %arg2[%c0_2, %c0_3] : memref<2x1024xbf16, #tpu.memory_space<vmem>>, vector<2x1024xbf16>
    %c0_4 = arith.constant 0 : index
    %c0_5 = arith.constant 0 : index
    %5 = vector.load %arg3[%c0_4, %c0_5] : memref<1024x1024xbf16, #tpu.memory_space<vmem>>, vector<1024x1024xbf16>
    %cst = arith.constant dense<0.000000e+00> : vector<2x1024xf32>
    %6 = tpu.matmul %4, %5, %cst {dimension_numbers = #tpu.dot_dimension_numbers<[1], [0], [0], [1], [0, 0, 1, 1], [], []>} : vector<2x1024xbf16>, vector<1024x1024xbf16>, vector<2x1024xf32> -> vector<2x1024xf32>
    %7 = arith.addf %3, %6 : vector<2x1024xf32>
    %c0_6 = arith.constant 0 : index
    %c0_7 = arith.constant 0 : index
    %8 = vector.load %arg7[%c0_6, %c0_7] : memref<2x1024xf32, #tpu.memory_space<vmem>>, vector<2x1024xf32>
    tpu.vector_store %arg7[%c0_6, %c0_7], %7 {strides = array<i32>} : memref<2x1024xf32, #tpu.memory_space<vmem>>, vector<2x1024xf32>,
    %c1_i32 = arith.constant 1 : i32
    %9 = arith.cmpi eq, %arg1, %c1_i32 : i32
    %10 = arith.extui %9 : i1 to i32
    %c0_i32_8 = arith.constant 0 : i32
    %11 = arith.cmpi ne, %10, %c0_i32_8 : i32
    scf.if %11 {
      %c0_9 = arith.constant 0 : index
      %c0_10 = arith.constant 0 : index
      %12 = vector.load %arg7[%c0_9, %c0_10] : memref<2x1024xf32, #tpu.memory_space<vmem>>, vector<2x1024xf32>
      %c0_11 = arith.constant 0 : index
      %c0_12 = arith.constant 0 : index
      %13 = vector.load %arg4[%c0_11, %c0_12] : memref<1x1024xf32, #tpu.memory_space<vmem>>, vector<1x1024xf32>
      %14 = vector.broadcast %13 : vector<1x1024xf32> to vector<2x1024xf32>
      %15 = arith.addf %12, %14 : vector<2x1024xf32>
      %cst_13 = arith.constant 0.000000e+00 : f32
      %16 = vector.broadcast %cst_13 : f32 to vector<2x1024xf32>
      %17 = arith.maximumf %15, %16 : vector<2x1024xf32>
      %18 = arith.truncf %17 : vector<2x1024xf32> to vector<2x1024xbf16>
      %c0_14 = arith.constant 0 : index
      %c0_15 = arith.constant 0 : index
      %19 = vector.load %arg5[%c0_14, %c0_15] : memref<1024x128xbf16, #tpu.memory_space<vmem>>, vector<1024x128xbf16>
      %cst_16 = arith.constant dense<0.000000e+00> : vector<2x128xf32>
      %20 = tpu.matmul %18, %19, %cst_16 {dimension_numbers = #tpu.dot_dimension_numbers<[1], [0], [0], [1], [0, 0, 1, 1], [], []>} : vector<2x1024xbf16>, vector<1024x128xbf16>, vector<2x128xf32> -> vector<2x128xf32>
      %c0_17 = arith.constant 0 : index
      %c0_18 = arith.constant 0 : index
      %c0_19 = arith.constant 0 : index
      %21 = vector.load %arg6[%c0_17, %c0_18, %c0_19] : memref<1x2x128xf32, #tpu.memory_space<vmem>>, vector<1x2x128xf32>
      %22 = vector.shape_cast %21 : vector<1x2x128xf32> to vector<2x128xf32>
      %23 = vector.shape_cast %20 : vector<2x128xf32> to vector<1x2x128xf32>
      tpu.vector_store %arg6[%c0_17, %c0_18, %c0_19], %23 {strides = array<i32>} : memref<1x2x128xf32, #tpu.memory_space<vmem>>, vector<1x2x128xf32>,
    } else {
    }
    return
  }
  func.func @transform_0(%arg0: i32, %arg1: i32) -> (i32, i32) {
    %c0_i32 = arith.constant 0 : i32
    %c0_i32_0 = arith.constant 0 : i32
    return %c0_i32, %arg1 : i32, i32
  }
  func.func @transform_1(%arg0: i32, %arg1: i32) -> (i32, i32) {
    %c0_i32 = arith.constant 0 : i32
    return %arg1, %arg0 : i32, i32
  }
  func.func @transform_2(%arg0: i32, %arg1: i32) -> (i32, i32) {
    %c0_i32 = arith.constant 0 : i32
    %c0_i32_0 = arith.constant 0 : i32
    return %c0_i32, %arg0 : i32, i32
  }
  func.func @transform_3(%arg0: i32, %arg1: i32) -> (i32, i32) {
    %c0_i32 = arith.constant 0 : i32
    %c0_i32_0 = arith.constant 0 : i32
    return %arg0, %c0_i32 : i32, i32
  }
  func.func @transform_4(%arg0: i32, %arg1: i32) -> (i32, i32, i32) {
    %c0_i32 = arith.constant 0 : i32
    %c0_i32_0 = arith.constant 0 : i32
    %c0_i32_1 = arith.constant 0 : i32
    return %arg0, %c0_i32, %c0_i32_0 : i32, i32, i32
  }
}

</mosaic_0001>

<bundles_post_ra>
// kernel: net_forward.2
= control target key start
LH: loop header
LB: loop body
LE: loop exit
PB: predicated region body
PF: predicated region fallthrough
CT: control target
= control target key end

     0   :  { %8 = vsyncpa [#allocation3], 0  ;;  %s516_s0 = inlined_call_operand.vmem [shape: bf16[128,32], index: 0, kind: input, shape index: {}]   ;;  %s517_s1 = inlined_call_operand.hbm [shape: bf16[32,128], index: 1, kind: input, shape index: {}]   ;;  %s518_s2 = inlined_call_operand.hbm [shape: f32[1,128], index: 2, kind: input, shape index: {}]   ;;  %s519_s3 = inlined_call_operand.vmem [shape: bf16[32,128], index: 3, kind: output, shape index: {}]  }
   0x1   :  { %9 = vsyncpa [#allocation5], 0  ;;  %s430_s12 = smov [#allocation2]   ;;  %s382_s16 = scalar_lea.hbm %s517_s1, 256 }
   0x2   :  { %s17_s13 = sshll.u32 %s430_s12, 4  ;;  %p383_p0 = scmp.ne.s32.totalorder %s517_s1, %s382_s16  ;;  %s18_s13 = int_to_ptr.vmem [resolvable:$true] %s17_s13 }
   0x3   :  { %p386_p1 = scmp.lt.u32.totalorder %s382_s16, %s517_s1 }
   0x5   :  { %p388_p2 = pnand %p386_p1, %p383_p0 }
   0x7   :  { %391 = shalt.err (!%p388_p2)
}
   0x8   :  { %s392_s21 = scalar_lea.vmem %s18_s13, 256  ;;  %p397_p4 = scmp.lt.s32.totalorder %s18_s13, %s18_s13 }
   0x9   :  { %p393_p3 = scmp.ne.s32.totalorder %s18_s13, %s392_s21  ;;  %p398_p5 = scmp.lt.s32.totalorder %s392_s21, %s392_s21 }
   0xb   :  { %p399_p6 = por %p398_p5, %p397_p4 }
   0xd   :  { %p400_p7 = pnand %p399_p6, %p393_p3 }
   0xf   :  { %403 = shalt.err (!%p400_p7)
}
  0x10   :  { %s431_s22 = smov 64   ;;  %s432_s23 = smov 4  }
  0x11   :  { %23 = dma.hbm_to_vmem [thread:$0]  %s517_s1, 256, %s18_s13, [#allocation3], %s431_s22, %s431_s22, %s432_s23  }
  0x12   :  { %s433_s26 = smov [#allocation4]   ;;  %s404_s30 = scalar_lea.hbm %s518_s2, 16 }
  0x13   :  { %s30_s27 = sshll.u32 %s433_s26, 4  ;;  %p405_p8 = scmp.ne.s32.totalorder %s518_s2, %s404_s30  ;;  %s31_s27 = int_to_ptr.vmem [resolvable:$true] %s30_s27 }
  0x14   :  { %p408_p9 = scmp.lt.u32.totalorder %s404_s30, %s518_s2 }
  0x16   :  { %p410_p10 = pnand %p408_p9, %p405_p8 }
  0x18   :  { %413 = shalt.err (!%p410_p10)
}
  0x19   :  { %s414_s8 = scalar_lea.vmem %s31_s27, 16  ;;  %s418_s1 = scalar_lea.vmem %s31_s27, 32 }
  0x1a   :  { %p415_p11 = scmp.ne.s32.totalorder %s31_s27, %s414_s8  ;;  %p419_p12 = scmp.lt.s32.totalorder %s31_s27, %s31_s27 }
  0x1b   :  { %p420_p13 = scmp.lt.s32.totalorder %s418_s1, %s414_s8 }
  0x1d   :  { %p421_p0 = por %p420_p13, %p419_p12 }
  0x1f   :  { %p422_p1 = pnand %p421_p0, %p415_p11 }
  0x21   :  { %425 = shalt.err (!%p422_p1)
}
  0x22   :  { %33 = dma.hbm_to_vmem [thread:$0]  %s518_s2, 16, %s31_s27, [#allocation5]  }
  0x23   :  { %426 = dma.done.wait [#allocation3], 256  }
  0x24   :  { %427 = vsyncadd [#allocation3], 4294967040 }
  0x25   :  { %428 = dma.done.wait [#allocation5], 16  }
  0x26   :  { %429 = vsyncadd [#allocation5], 4294967280  ;;  %v372_v0 = vld [vmem:[#allocation2] sm:$0xff]   ;;  %v373_v1 = vld [vmem:[#allocation2 + $0x8] sm:$0xff]   ;;  %vm120_vm0 = vcmask 261120  }
  0x27   :  { %344 = vmatprep.subr.bf16.mxu0 %v372_v0  ;;  %364 = vmatprep.subr.bf16.mxu1 %v372_v0  ;;  %v374_v2 = vld [vmem:[%s516_s0] sm:$0xff]   ;;  %v376_v4 = vld [vmem:[%s516_s0 + $0x8] sm:$0xff]   ;;  %v378_v6 = vld [vmem:[%s516_s0 + $0x10] sm:$0xff]  }
  0x28   :  { %345 = vmatpush3.bf16.msra.mxu0 %v372_v0  ;;  %366 = vmatpush3.bf16.msra.mxu1 %v372_v0  ;;  %v375_v3 = vld [vmem:[%s516_s0 + $0x20] sm:$0xff]   ;;  %v377_v5 = vld [vmem:[%s516_s0 + $0x28] sm:$0xff]   ;;  %v379_v7 = vld [vmem:[%s516_s0 + $0x30] sm:$0xff]  }
  0x29   :  { %346 = vmatprep.subr.bf16.mxu0 %v373_v1  ;;  %365 = vmatprep.subr.bf16.mxu1 %v373_v1  ;;  %v380_v8 = vld [vmem:[%s516_s0 + $0x18] sm:$0xff]   ;;  %v296_v12 = vld [vmem:[#allocation4] ss:$0 sm:$0xff] }
  0x2a   :  { %348 = vmatprep.mubr.msk.bf16.mxu0 %vm120_vm0, %v374_v2  ;;  %356 = vmatprep.mubr.msk.bf16.mxu1 %vm120_vm0, %v375_v3  ;;  %v381_v9 = vld [vmem:[%s516_s0 + $0x38] sm:$0xff]  }
  0x2c   :  { %347 = vmatpush3.bf16.msra.mxu0 %v373_v1  ;;  %367 = vmatpush3.bf16.msra.mxu1 %v373_v1 }
  0x2f   :  { %349 = vmatmul.mubr.msk.bf16.vlgmr.msra.gmra.mrb[0].mxu0 %vm120_vm0, %v376_v4  ;;  %357 = vmatmul.mubr.msk.bf16.vlgmr.msra.gmra.mrb[0].mxu1 %vm120_vm0, %v377_v5 }
  0x30   :  { %352 = vmatprep.mubr.msk.bf16.mxu0 %vm120_vm0, %v378_v6  ;;  %360 = vmatprep.mubr.msk.bf16.mxu1 %vm120_vm0, %v379_v7 }
  0x37   :  { %353 = vmatmul.mubr.msk.bf16.gmra.mrb[4].mxu0 %vm120_vm0, %v380_v8  ;;  %361 = vmatmul.mubr.msk.bf16.gmra.mrb[4].mxu1 %vm120_vm0, %v381_v9 }
 0x102   :  { %v350_v10 = vpop.f32.mrb[0].mxu0  ;;  %v358_v11 = vpop.f32.mrb[0].mxu1 }
 0x103   :  { %v179_v13 = vpop.f32.mrb[1].mxu0  ;;  %v211_v14 = vpop.f32.mrb[1].mxu1  ;;  %v188_v19 = vadd.f32 %v350_v10, %v296_v12  ;;  %v220_v20 = vadd.f32 %v358_v11, %v296_v12 }
 0x104   :  { %v351_v15 = vpop.f32.mrb[2].mxu0  ;;  %v359_v16 = vpop.f32.mrb[2].mxu1  ;;  %v180_v21 = vadd.f32 %v296_v12, %v179_v13  ;;  %v212_v22 = vadd.f32 %v296_v12, %v211_v14 }
 0x105   :  { %v182_v17 = vpop.f32.mrb[3].mxu0  ;;  %v214_v18 = vpop.f32.mrb[3].mxu1  ;;  %v191_v23 = vadd.f32 %v351_v15, %v296_v12  ;;  %v223_v24 = vadd.f32 %v359_v16, %v296_v12  ;;  %v244_v27 = vmax.f32 %v188_v19, 0.0  ;;  %v252_v28 = vmax.f32 %v220_v20, 0.0 }
 0x106   :  { %v183_v25 = vadd.f32 %v296_v12, %v182_v17  ;;  %v215_v26 = vadd.f32 %v296_v12, %v214_v18  ;;  %v242_v29 = vmax.f32 %v180_v21, 0.0  ;;  %v250_v30 = vmax.f32 %v212_v22, 0.0 }
 0x107   :  { %v245_v33 = vmax.f32 %v191_v23, 0.0  ;;  %v253_v34 = vmax.f32 %v223_v24, 0.0 }
 0x108   :  { %v243_v39 = vmax.f32 %v183_v25, 0.0  ;;  %v251_v40 = vmax.f32 %v215_v26, 0.0 }
 0x10a   :  { %v354_v31 = vpop.f32.mrb[4].mxu0  ;;  %v362_v32 = vpop.f32.mrb[4].mxu1 }
 0x10b   :  { %v204_v35 = vadd.f32 %v354_v31, %v296_v12  ;;  %v236_v36 = vadd.f32 %v362_v32, %v296_v12  ;;  %v195_v37 = vpop.f32.mrb[5].mxu0  ;;  %v227_v38 = vpop.f32.mrb[5].mxu1 }
 0x10c   :  { %v196_v41 = vadd.f32 %v296_v12, %v195_v37  ;;  %v228_v42 = vadd.f32 %v296_v12, %v227_v38  ;;  %v355_v43 = vpop.f32.mrb[6].mxu0  ;;  %v363_v44 = vpop.f32.mrb[6].mxu1 }
 0x10d   :  { %v248_v45 = vmax.f32 %v204_v35, 0.0  ;;  %v256_v46 = vmax.f32 %v236_v36, 0.0  ;;  %v207_v47 = vadd.f32 %v355_v43, %v296_v12  ;;  %v239_v48 = vadd.f32 %v363_v44, %v296_v12  ;;  %v198_v49 = vpop.f32.mrb[7].mxu0  ;;  %v230_v50 = vpop.f32.mrb[7].mxu1 }
 0x10e   :  { %v246_v51 = vmax.f32 %v196_v41, 0.0  ;;  %v254_v52 = vmax.f32 %v228_v42, 0.0  ;;  %v199_v53 = vadd.f32 %v296_v12, %v198_v49  ;;  %v231_v54 = vadd.f32 %v296_v12, %v230_v50 }
 0x10f   :  { %v260_v55 = vmax.f32 %v244_v27, %v248_v45  ;;  %v264_v56 = vmax.f32 %v252_v28, %v256_v46  ;;  %v249_v57 = vmax.f32 %v207_v47, 0.0  ;;  %v257_v58 = vmax.f32 %v239_v48, 0.0 }
 0x110   :  { %v258_v59 = vmax.f32 %v242_v29, %v246_v51  ;;  %v262_v60 = vmax.f32 %v250_v30, %v254_v52  ;;  %v247_v61 = vmax.f32 %v199_v53, 0.0  ;;  %v255_v62 = vmax.f32 %v231_v54, 0.0 }
 0x111   :  { %v268_v63 = vmax.f32 %v260_v55, %v264_v56  ;;  %v261_v0 = vmax.f32 %v245_v33, %v249_v57  ;;  %v265_v1 = vmax.f32 %v253_v34, %v257_v58 }
 0x112   :  { %v266_v2 = vmax.f32 %v258_v59, %v262_v60  ;;  %v259_v3 = vmax.f32 %v243_v39, %v247_v61  ;;  %v263_v4 = vmax.f32 %v251_v40, %v255_v62 }
 0x113   :  { %v269_v5 = vmax.f32 %v261_v0, %v265_v1 }
 0x114   :  { %v267_v6 = vmax.f32 %v259_v3, %v263_v4 }
 0x115   :  { %v331_v7 = vpack.c.bf16 %v269_v5, %v268_v63 }
 0x116   :  { %v326_v8 = vpack.c.bf16 %v267_v6, %v266_v2 }
 0x117   :  { %333 = vst [vmem:[%s519_s3 + $0x8] sm:$0xff] %v331_v7  }
 0x118   :  { %327 = vst [vmem:[%s519_s3] sm:$0xff] %v326_v8  }
 0x119   :  { %294 = vsyncpa [#allocation3], 1 }
 0x11a   :  { %295 = vsyncpa [#allocation5], 1 }

// kernel: net_forward.3
= control target key start
LH: loop header
LB: loop body
LE: loop exit
PB: predicated region body
PF: predicated region fallthrough
CT: control target
= control target key end

     0   :  { %9 = vsyncpa [#allocation4], 0  ;;  %s6923_s0 = inlined_call_operand.vmem [shape: bf16[2,2048], index: 0, kind: input, shape index: {}]   ;;  %s6924_s1 = inlined_call_operand.hbm [shape: bf16[2048,1024], index: 1, kind: input, shape index: {}]   ;;  %s6925_s2 = inlined_call_operand.hbm [shape: f32[1,1024], index: 2, kind: input, shape index: {}]   ;;  %s6926_s3 = inlined_call_operand.hbm [shape: bf16[1024,128], index: 3, kind: input, shape index: {}]   ;;  %s6927_s4 = inlined_call_operand.vmem [shape: f32[1,2,128], index: 4, kind: output, shape index: {}]  }
   0x1   :  { %11 = vsyncpa [#allocation4 + $0x1], 0 }
   0x2   :  { %12 = vsyncpa [#allocation6], 0  ;;  %s6111_s15 = smov 0   ;;  %s6113_s16 = smov 0  }
   0x3   :  { %s6115_s17 = smov 0   ;;  %s6117_s18 = smov 0  }
   0x4   :  { %s6119_s19 = smov 0   ;;  %s6121_s20 = smov 0  }
   0x5 LB: > { %s5053_s21 = sadd.s32 4294967295, %s6074_s20   ;;  %s65_s22 = sadd.s32 1, %s6062_s17  ;;  %s6074_s20 = sphi %s6121_s20, %s18_s20   ;;  %s6070_s19 = sphi %s6119_s19, %s6947_s19   ;;  %s6066_s18 = sphi %s6117_s18, %s6946_s18   ;;  %s6062_s17 = sphi %s6115_s17, %s6945_s17   ;;  %s6058_s16 = sphi %s6113_s16, %s6944_s16   ;;  %s6054_s15 = sphi %s6111_s15, %s6943_s15  }
   0x6   : > { %p72_p0 = scmp.ne.s32.totalorder %s6062_s17, %s6058_s16  ;;  %p73_p1 = scmp.eq.s32.totalorder %s6074_s20, 0 }
   0x7   : > { %p78_p2 = scmp.ne.s32.totalorder %s6058_s16, %s6054_s15  ;;  %p6145_p3 = scmp.eq.s32.totalorder %s5053_s21, 0 }
   0x8   : > { %p74_p4 = por %p73_p1, %p72_p0  ;;  %p5054_p5 = scmp.ge.s32.totalorder %s6074_s20, 1 }
   0x9   : > { %s6933_s23 = scalar_select %p6145_p3, 1, 0 }
   0xa   : > { %p6152_p6 = por %p6145_p3, %p78_p2  ;;  %p167_p7 = scmp.lt.s32.totalorder %s6074_s20, 3 }
   0xb   : > { %s6076_s26 = smov [#allocation5]   ;;  %p5809_p10 = scmp.lt.s32.totalorder %s6074_s20, 2 }
   0xc   : > { %s6934_s24 = scalar_select %p6152_p6, 1, 0 }
   0xd   : > { %p6157_p8 = pnand %p5054_p5, %p167_p7  ;;  %s183_s27 = sshll.u32 %s6076_s26, 4  ;;  %s184_s27 = int_to_ptr.vmem [resolvable:$true] %s183_s27 }
   0xe   : > { %p6170_p12 = pnand %p5809_p10, %p74_p4  ;;  %s6077_s30 = smov [#allocation7]  }
   0xf   : > { %s6935_s25 = scalar_select %p6157_p8, 1, 0 }
  0x10   : > { %p5796_p9 = pneg %p6157_p8  ;;  %s196_s5 = sshll.u32 %s6077_s30, 4  ;;  %s197_s5 = int_to_ptr.vmem [resolvable:$true] %s196_s5 }
  0x11   : > { %s6937_s29 = scalar_select %p6170_p12, 1, 0 }
  0x12   : > { %p6166_p11 = pnand %p5796_p9, %p6145_p3  ;;  %s5934_s8 = scalar_lea.hbm %s6925_s2, 128 }
  0x13   : > { %p5935_p13 = scmp.ne.s32.totalorder %s6925_s2, %s5934_s8  ;;  %p5941_p4 = scmp.lt.u32.totalorder %s5934_s8, %s6925_s2 }
  0x14   : > { %p5936_p0 = pneg %p6166_p11 }
  0x16   : > { %p5937_p1 = pnand %p5936_p0, %p5935_p13 }
  0x18   : > { %p5938_p2 = pneg %p5937_p1 }
  0x1a   : > { %p5943_p5 = pnand %p5941_p4, %p5938_p2 }
  0x1c   : > { %5946 = shalt.err (!%p5943_p5)
}
  0x1d   : > { %s5947_s13 = scalar_lea.vmem %s184_s27, 128  ;;  %p5955_p3 = scmp.lt.s32.totalorder %s184_s27, %s184_s27 }
  0x1e   : > { %p5948_p7 = scmp.ne.s32.totalorder %s184_s27, %s5947_s13  ;;  %p5956_p6 = scmp.lt.s32.totalorder %s5947_s13, %s5947_s13 }
  0x20   : > { %p5950_p9 = pnand %p5948_p7, %p5936_p0  ;;  %p5957_p8 = por %p5956_p6, %p5955_p3 }
  0x22   : > { %p5951_p10 = pneg %p5950_p9 }
  0x24   : > { %p5958_p12 = pnand %p5957_p8, %p5951_p10 }
  0x26   : > { %5961 = shalt.err (!%p5958_p12)
}
  0x27   : > { %5799 = dma.hbm_to_vmem [thread:$0]  (!%p6166_p11), %s6925_s2, 128, %s184_s27, [#allocation6]  }
  0x28   : > { %s5962_s30 = scalar_lea.hbm %s6926_s3, 8192 }
  0x29   : > { %p5963_p13 = scmp.ne.s32.totalorder %s6926_s3, %s5962_s30  ;;  %p5969_p8 = scmp.lt.u32.totalorder %s5962_s30, %s6926_s3 }
  0x2b   : > { %p5965_p3 = pnand %p5963_p13, %p5936_p0 }
  0x2d   : > { %p5966_p6 = pneg %p5965_p3 }
  0x2f   : > { %p5971_p12 = pnand %p5969_p8, %p5966_p6 }
  0x31   : > { %5974 = shalt.err (!%p5971_p12)
}
  0x32   : > { %s5975_s27 = scalar_lea.vmem %s197_s5, 8192  ;;  %p5983_p5 = scmp.lt.s32.totalorder %s197_s5, %s197_s5 }
  0x33   : > { %p5976_p1 = scmp.ne.s32.totalorder %s197_s5, %s5975_s27  ;;  %p5984_p7 = scmp.lt.s32.totalorder %s5975_s27, %s5975_s27 }
  0x35   : > { %p5978_p2 = pnand %p5976_p1, %p5936_p0  ;;  %p5985_p9 = por %p5984_p7, %p5983_p5 }
  0x37   : > { %p5979_p4 = pneg %p5978_p2 }
  0x39   : > { %p5986_p10 = pnand %p5985_p9, %p5979_p4 }
  0x3b   : > { %5989 = shalt.err (!%p5986_p10)
}
  0x3c   : > { %s6078_s10 = smov 64   ;;  %s6079_s11 = smov 4  }
  0x3d   : > { %5802 = dma.hbm_to_vmem [thread:$0]  (!%p6166_p11), %s6926_s3, 8192, %s197_s5, [#allocation6], %s6078_s10, %s6078_s10, %s6079_s11  }
  0x3e   : > { %s218_s14 = sand.u32 1, %s6062_s17   ;;  %s27_s15 = sadd.s32 1, %s6070_s19 }
  0x3f   : > { %p28_p0 = scmp.ge.s32.totalorder %s27_s15, 2  ;;  %s5058_s21 = sshll.u32 %s218_s14, 12 }
  0x40   : > { %s5649_s26 = sshll.u32 %s6070_s19, 16  ;;  %s222_s28 = scalar_lea.vmem [#allocation3], %s5058_s21 }
  0x41   : > { %s6949_s15 = smov (%p28_p0, %s27_s15), 0  ;;  %s6224_s7 = scalar_lea.hbm %s6924_s1, %s5649_s26 }
  0x42   : > { %s232_s5 = sshll.u32 %s222_s28, 4  ;;  %s60_s8 = ssub.s32 %s6070_s19, %s6949_s15  ;;  %s6228_s5 = int_to_ptr.vmem [resolvable:$true] %s232_s5 }
  0x43   : > { %p63_p11 = scmp.eq.s32.totalorder %s60_s8, 0  ;;  %s6235_s27 = scalar_lea.sflag [#allocation4], %s218_s14 }
  0x44   : > { %s5990_s10 = scalar_lea.hbm %s6224_s7, 65536  ;;  %p6938_p3 = scmp.ne.s32.totalorder %s6937_s29, 0 }
  0x45   : > { %s6233_s9 = scalar_select %p63_p11, %s6062_s17, %s65_s22  }
  0x46   : > { %p5991_p13 = scmp.ne.s32.totalorder %s6224_s7, %s5990_s10  ;;  %p5992_p6 = pneg %p6938_p3 }
  0x47   : > { %s5995_s13 = scalar_lea.hbm %s6924_s1, 131072  ;;  %p5996_p1 = scmp.lt.u32.totalorder %s6224_s7, %s6924_s1 }
  0x48   : > { %p5993_p8 = pnand %p5992_p6, %p5991_p13  ;;  %p5997_p2 = scmp.lt.u32.totalorder %s5995_s13, %s5990_s10 }
  0x49   : > { %p5999_p5 = scmp.lt.u32.totalorder %s5990_s10, %s6224_s7 }
  0x4a   : > { %p5994_p12 = pneg %p5993_p8  ;;  %p5998_p4 = por %p5997_p2, %p5996_p1 }
  0x4c   : > { %p6000_p7 = por %p5999_p5, %p5998_p4 }
  0x4e   : > { %p6001_p9 = pnand %p6000_p7, %p5994_p12 }
  0x50   : > { %6004 = shalt.err (!%p6001_p9)
}
  0x51   : > { %s6005_s22 = scalar_lea.vmem %s6228_s5, 65536  ;;  %s6080_s14 = smov [#allocation3]  }
  0x52   : > { %p6006_p10 = scmp.ne.s32.totalorder %s6228_s5, %s6005_s22  ;;  %s6010_s30 = sshll.u32 %s6080_s14, 4  ;;  %s6011_s30 = int_to_ptr.vmem [resolvable:$false] %s6010_s30 }
  0x53   : > { %s6012_s6 = scalar_lea.vmem %s6011_s30, 131072  ;;  %p6013_p13 = scmp.lt.s32.totalorder %s6228_s5, %s6011_s30 }
  0x54   : > { %p6008_p0 = pnand %p6006_p10, %p5992_p6  ;;  %p6014_p8 = scmp.lt.s32.totalorder %s6012_s6, %s6005_s22 }
  0x56   : > { %p6009_p11 = pneg %p6008_p0  ;;  %p6015_p1 = por %p6014_p8, %p6013_p13 }
  0x58   : > { %p6016_p2 = pnand %p6015_p1, %p6009_p11 }
  0x5a   : > { %6019 = shalt.err (!%p6016_p2)
}
  0x5b   : > { %s6081_s28 = smov 512   ;;  %s6082_s8 = smov 32  }
  0x5c   : > { %5806 = dma.hbm_to_vmem [thread:$0]  (!%p6938_p3), %s6224_s7, 65536, %s6228_s5, %s6235_s27, %s6081_s28, %s6081_s28, %s6082_s8  }
  0x5d   : > { %p6939_p6 = scmp.ne.s32.totalorder %s6935_s25, 0 }
  0x5e   : > { %s246_s10 = sand.u32 (!%p6939_p6), 1, %s6058_s16   ;;  %p6940_p12 = scmp.ne.s32.totalorder (!%p6939_p6), %s6934_s24, 0 }
  0x5f   : > { %244 = sbr.rel (%p6939_p6) target bundleno = 1109 (0x455), region = 36  ;;  %s5063_s11 = sshll.u32 (!%p6939_p6), %s246_s10, 12 }
  0x60   : > { %s247_s12 = scalar_lea.sflag (!%p6939_p6), [#allocation4], %s246_s10  ;;  %s6266_s13 = scalar_lea.vmem (!%p6939_p6), [#allocation3], %s5063_s11 }
  0x66   : > { %6045 = dma.done.wait (%p6940_p12), %s247_s12, 65536  }
  0x67   : > { %6047 = vsyncadd (%p6940_p12), %s247_s12, 4294901760  ;;  %p6941_p4 = scmp.ne.s32.totalorder %s6933_s23, 0 }
  0x69   : > { %6049 = dma.done.wait (%p6941_p4), [#allocation6], 8320  }
  0x6a   : > { %6051 = vsyncadd (%p6941_p4), [#allocation6], 4294958976  ;;  %s5066_s25 = sshll.u32 %s6066_s18, 3  ;;  %p5067_p5 = scmp.ne.s32.totalorder %s6066_s18, 0 }
  0x6b   : > { %p287_p3 = scmp.lt.s32.totalorder %s5066_s25, 15  ;;  %v6083_v0 = vmov (!%p5067_p5), 0.0  }
  0x6c   : > { %303 = sbr.rel (%p5067_p5) target bundleno = 115 (0x73), region = 52  ;;  %304 = vst [vmem:[#allocation2] sm:$0xff] (!%p5067_p5), %v6083_v0  ;;  %305 = vst [vmem:[#allocation2 + $0x8] sm:$0xff] (!%p5067_p5), %v6083_v0 }
  0x6d   : > { %s6951_s25 = smov (!%p287_p3, %s5066_s25), 15 }
  0x6e   : > { %s289_s5 = scalar_lea.vmem %s6923_s0, %s6951_s25 }
  0x73 PF: > { %v309_v1 = vld [vmem:[%s6266_s13] sm:$0xff]  ;;  %v310_v3 = vld [vmem:[%s6266_s13 + $0x8] sm:$0xff]  ;;  %v6084_v33 = vmov 1966171168   ;;  %v826_v35 = vlaneseq  ;;  %v6322_v60 = vld [vmem:[%s289_s5] sm:$0xff]  ;;  %p5580_p7 = scmp.ne.s32.totalorder %s6066_s18, 1 }
  0x74   : > { %v313_v2 = vld [vmem:[%s6266_s13 + $0x20] sm:$0xff]  ;;  %v314_v5 = vld [vmem:[%s6266_s13 + $0x28] sm:$0xff]  ;;  %v824_v34 = vunpack.c.l.s4 %v6084_v33 }
  0x75   : > { %v5069_v4 = vcombine.high %v309_v1, %v313_v2  ;;  %v5068_v6 = vcombine.low %v309_v1, %v313_v2  ;;  %v317_v7 = vld [vmem:[%s6266_s13 + $0x40] sm:$0xff]  ;;  %v5071_v9 = vcombine.high %v310_v3, %v314_v5  ;;  %v5070_v10 = vcombine.low %v310_v3, %v314_v5  ;;  %v318_v12 = vld [vmem:[%s6266_s13 + $0x48] sm:$0xff] }
  0x76   : > { %v321_v8 = vld [vmem:[%s6266_s13 + $0x60] sm:$0xff]  ;;  %v322_v13 = vld [vmem:[%s6266_s13 + $0x68] sm:$0xff]  ;;  %v825_v44 = vunpack.c.0.s8 %v824_v34  ;;  %v6306_v45 = vshrl.u32 %v826_v35, 7 }
  0x77   : > { %v5077_v11 = vcombine.high %v317_v7, %v321_v8  ;;  %v325_v14 = vld [vmem:[%s6266_s13 + $0x80] sm:$0xff]  ;;  %3439 = vmatprep.subr.bf16.mxu0 %v5069_v4  ;;  %v5079_v15 = vcombine.high %v318_v12, %v322_v13  ;;  %v326_v17 = vld [vmem:[%s6266_s13 + $0x88] sm:$0xff]  ;;  %3603 = vmatprep.subr.bf16.mxu1 %v5071_v9  ;;  %v5076_v19 = vcombine.low %v317_v7, %v321_v8 }
  0x78   : > { %v329_v16 = vld [vmem:[%s6266_s13 + $0xa0] sm:$0xff]  ;;  %v330_v18 = vld [vmem:[%s6266_s13 + $0xa8] sm:$0xff]  ;;  %3440 = vmatpush1.bf16.msra.mxu0 %v5068_v6  ;;  %3604 = vmatpush1.bf16.msra.mxu1 %v5070_v10  ;;  %v5078_v20 = vcombine.low %v318_v12, %v322_v13  ;;  %v6313_v54 = vsub.s32 %v825_v44, %v6306_v45 }
  0x79   : > { %3441 = vmatprep.subr.bf16.mxu0 %v5077_v11  ;;  %v5085_v21 = vcombine.high %v325_v14, %v329_v16  ;;  %3605 = vmatprep.subr.bf16.mxu1 %v5079_v15  ;;  %v5087_v22 = vcombine.high %v326_v17, %v330_v18  ;;  %v333_v23 = vld [vmem:[%s6266_s13 + $0xc0] sm:$0xff]  ;;  %v334_v25 = vld [vmem:[%s6266_s13 + $0xc8] sm:$0xff]  ;;  %v5084_v27 = vcombine.low %v325_v14, %v329_v16 }
  0x7a   : > { %v337_v24 = vld [vmem:[%s6266_s13 + $0xe0] sm:$0xff]  ;;  %v338_v26 = vld [vmem:[%s6266_s13 + $0xe8] sm:$0xff]  ;;  %v5086_v28 = vcombine.low %v326_v17, %v330_v18  ;;  %v6328_v0 = vrot.slane %v6322_v60, %v6313_v54 }
  0x7b   : > { %v5093_v29 = vcombine.high %v333_v23, %v337_v24  ;;  %v5095_v30 = vcombine.high %v334_v25, %v338_v26  ;;  %v341_v31 = vld [vmem:[%s6266_s13 + $0x100] sm:$0xff]  ;;  %v342_v36 = vld [vmem:[%s6266_s13 + $0x108] sm:$0xff]  ;;  %v5092_v38 = vcombine.low %v333_v23, %v337_v24  ;;  %v5094_v39 = vcombine.low %v334_v25, %v338_v26 }
  0x7c   : > { %3442 = vmatpush1.bf16.msra.mxu0 %v5076_v19  ;;  %3606 = vmatpush1.bf16.msra.mxu1 %v5078_v20  ;;  %v345_v32 = vld [vmem:[%s6266_s13 + $0x120] sm:$0xff]  ;;  %v346_v37 = vld [vmem:[%s6266_s13 + $0x128] sm:$0xff]  ;;  %v837_v4 = vcombine.high %v6328_v0, %v6328_v0 }
  0x7d   : > { %3443 = vmatprep.subr.bf16.mxu0 %v5085_v21  ;;  %3607 = vmatprep.subr.bf16.mxu1 %v5087_v22  ;;  %v5101_v40 = vcombine.high %v341_v31, %v345_v32  ;;  %v5103_v41 = vcombine.high %v342_v36, %v346_v37  ;;  %v349_v42 = vld [vmem:[%s6266_s13 + $0x140] sm:$0xff]  ;;  %v350_v46 = vld [vmem:[%s6266_s13 + $0x148] sm:$0xff]  ;;  %v5100_v48 = vcombine.low %v341_v31, %v345_v32 }
  0x7e   : > { %v353_v43 = vld [vmem:[%s6266_s13 + $0x160] sm:$0xff]  ;;  %v354_v47 = vld [vmem:[%s6266_s13 + $0x168] sm:$0xff]  ;;  %v5102_v49 = vcombine.low %v342_v36, %v346_v37  ;;  %v6337_v10 = vrot.slane %v837_v4, %v6313_v54 }
  0x7f   : > { %v5109_v50 = vcombine.high %v349_v42, %v353_v43  ;;  %v5111_v51 = vcombine.high %v350_v46, %v354_v47  ;;  %v357_v52 = vld [vmem:[%s6266_s13 + $0x180] sm:$0xff]  ;;  %v358_v55 = vld [vmem:[%s6266_s13 + $0x188] sm:$0xff]  ;;  %v5108_v57 = vcombine.low %v349_v42, %v353_v43  ;;  %v5110_v58 = vcombine.low %v350_v46, %v354_v47 }
  0x80   : > { %3444 = vmatpush1.bf16.msra.mxu0 %v5084_v27  ;;  %3608 = vmatpush1.bf16.msra.mxu1 %v5086_v28  ;;  %v361_v53 = vld [vmem:[%s6266_s13 + $0x1a0] sm:$0xff]  ;;  %v362_v56 = vld [vmem:[%s6266_s13 + $0x1a8] sm:$0xff] }
  0x81   : > { %3445 = vmatprep.subr.bf16.mxu0 %v5093_v29  ;;  %3609 = vmatprep.subr.bf16.mxu1 %v5095_v30  ;;  %v5117_v59 = vcombine.high %v357_v52, %v361_v53  ;;  %v5119_v61 = vcombine.high %v358_v55, %v362_v56  ;;  %v365_v62 = vld [vmem:[%s6266_s13 + $0x1c0] sm:$0xff]  ;;  %v366_v1 = vld [vmem:[%s6266_s13 + $0x1c8] sm:$0xff]  ;;  %v5116_v3 = vcombine.low %v357_v52, %v361_v53 }
  0x82   : > { %v369_v63 = vld [vmem:[%s6266_s13 + $0x1e0] sm:$0xff]  ;;  %v370_v2 = vld [vmem:[%s6266_s13 + $0x1e8] sm:$0xff]  ;;  %v5118_v5 = vcombine.low %v358_v55, %v362_v56  ;;  %3471 = vmatprep.mubr.bf16.mxu0 %v6337_v10  ;;  %3635 = vmatprep.mubr.bf16.mxu1 %v6337_v10 }
  0x83   : > { %v5125_v6 = vcombine.high %v365_v62, %v369_v63  ;;  %v5127_v7 = vcombine.high %v366_v1, %v370_v2  ;;  %v373_v8 = vld [vmem:[%s6266_s13 + $0x200] sm:$0xff]  ;;  %v374_v11 = vld [vmem:[%s6266_s13 + $0x208] sm:$0xff]  ;;  %v5124_v13 = vcombine.low %v365_v62, %v369_v63  ;;  %v5126_v14 = vcombine.low %v366_v1, %v370_v2 }
  0x84   : > { %3446 = vmatpush1.bf16.msra.mxu0 %v5092_v38  ;;  %3610 = vmatpush1.bf16.msra.mxu1 %v5094_v39  ;;  %v377_v9 = vld [vmem:[%s6266_s13 + $0x220] sm:$0xff]  ;;  %v378_v12 = vld [vmem:[%s6266_s13 + $0x228] sm:$0xff] }
  0x85   : > { %3447 = vmatprep.subr.bf16.mxu0 %v5101_v40  ;;  %3611 = vmatprep.subr.bf16.mxu1 %v5103_v41  ;;  %v5133_v15 = vcombine.high %v373_v8, %v377_v9  ;;  %v5135_v16 = vcombine.high %v374_v11, %v378_v12  ;;  %v381_v17 = vld [vmem:[%s6266_s13 + $0x240] sm:$0xff]  ;;  %v382_v19 = vld [vmem:[%s6266_s13 + $0x248] sm:$0xff]  ;;  %v5132_v21 = vcombine.low %v373_v8, %v377_v9 }
  0x86   : > { %v385_v18 = vld [vmem:[%s6266_s13 + $0x260] sm:$0xff]  ;;  %v386_v20 = vld [vmem:[%s6266_s13 + $0x268] sm:$0xff]  ;;  %v5134_v22 = vcombine.low %v374_v11, %v378_v12 }
  0x87   : > { %v5141_v23 = vcombine.high %v381_v17, %v385_v18  ;;  %v5143_v24 = vcombine.high %v382_v19, %v386_v20  ;;  %v389_v25 = vld [vmem:[%s6266_s13 + $0x280] sm:$0xff]  ;;  %v390_v27 = vld [vmem:[%s6266_s13 + $0x288] sm:$0xff]  ;;  %v5140_v29 = vcombine.low %v381_v17, %v385_v18  ;;  %v5142_v30 = vcombine.low %v382_v19, %v386_v20 }
  0x88   : > { %3448 = vmatpush1.bf16.msra.mxu0 %v5100_v48  ;;  %3612 = vmatpush1.bf16.msra.mxu1 %v5102_v49  ;;  %v393_v26 = vld [vmem:[%s6266_s13 + $0x2a0] sm:$0xff]  ;;  %v394_v28 = vld [vmem:[%s6266_s13 + $0x2a8] sm:$0xff]  ;;  %v822_v19 = vcombine.high %v6322_v60, %v6322_v60 }
  0x89   : > { %3449 = vmatprep.subr.bf16.mxu0 %v5109_v50  ;;  %3613 = vmatprep.subr.bf16.mxu1 %v5111_v51  ;;  %v5149_v31 = vcombine.high %v389_v25, %v393_v26  ;;  %v5151_v32 = vcombine.high %v390_v27, %v394_v28  ;;  %v397_v33 = vld [vmem:[%s6266_s13 + $0x2c0] sm:$0xff]  ;;  %v398_v35 = vld [vmem:[%s6266_s13 + $0x2c8] sm:$0xff]  ;;  %v5148_v37 = vcombine.low %v389_v25, %v393_v26 }
  0x8a   : > { %v401_v34 = vld [vmem:[%s6266_s13 + $0x2e0] sm:$0xff]  ;;  %v402_v36 = vld [vmem:[%s6266_s13 + $0x2e8] sm:$0xff]  ;;  %v5150_v38 = vcombine.low %v390_v27, %v394_v28  ;;  %v836_v25 = vrot.slane %v822_v19, %v6313_v54  ;;  %v6382_v26 = vrot.slane %v6328_v0, %v6313_v54  ;;  %v6390_v0 = vcombine.high %v6337_v10, %v6337_v10 }
  0x8b   : > { %v5157_v39 = vcombine.high %v397_v33, %v401_v34  ;;  %v5159_v40 = vcombine.high %v398_v35, %v402_v36  ;;  %v405_v41 = vld [vmem:[%s6266_s13 + $0x300] sm:$0xff]  ;;  %v406_v43 = vld [vmem:[%s6266_s13 + $0x308] sm:$0xff]  ;;  %v5156_v46 = vcombine.low %v397_v33, %v401_v34  ;;  %v5158_v47 = vcombine.low %v398_v35, %v402_v36 }
  0x8c   : > { %3450 = vmatpush1.bf16.msra.mxu0 %v5108_v57  ;;  %3614 = vmatpush1.bf16.msra.mxu1 %v5110_v58  ;;  %v409_v42 = vld [vmem:[%s6266_s13 + $0x320] sm:$0xff]  ;;  %v410_v44 = vld [vmem:[%s6266_s13 + $0x328] sm:$0xff]  ;;  %v6396_v36 = vrot.slane %v836_v25, %v6313_v54 }
  0x8d   : > { %3451 = vmatprep.subr.bf16.mxu0 %v5117_v59  ;;  %3615 = vmatprep.subr.bf16.mxu1 %v5119_v61  ;;  %v5165_v48 = vcombine.high %v405_v41, %v409_v42  ;;  %v5167_v49 = vcombine.high %v406_v43, %v410_v44  ;;  %v413_v50 = vld [vmem:[%s6266_s13 + $0x340] sm:$0xff]  ;;  %v414_v52 = vld [vmem:[%s6266_s13 + $0x348] sm:$0xff]  ;;  %v5164_v55 = vcombine.low %v405_v41, %v409_v42 }
  0x8e   : > { %v417_v51 = vld [vmem:[%s6266_s13 + $0x360] sm:$0xff]  ;;  %v418_v53 = vld [vmem:[%s6266_s13 + $0x368] sm:$0xff]  ;;  %v5166_v56 = vcombine.low %v406_v43, %v410_v44 }
  0x8f   : > { %v5173_v57 = vcombine.high %v413_v50, %v417_v51  ;;  %v5175_v58 = vcombine.high %v414_v52, %v418_v53  ;;  %v421_v59 = vld [vmem:[%s6266_s13 + $0x380] sm:$0xff]  ;;  %v422_v62 = vld [vmem:[%s6266_s13 + $0x388] sm:$0xff]  ;;  %v5172_v1 = vcombine.low %v413_v50, %v417_v51  ;;  %v5174_v2 = vcombine.low %v414_v52, %v418_v53 }
  0x90   : > { %3452 = vmatpush1.bf16.msra.mxu0 %v5116_v3  ;;  %3616 = vmatpush1.bf16.msra.mxu1 %v5118_v5  ;;  %v425_v61 = vld [vmem:[%s6266_s13 + $0x3a0] sm:$0xff]  ;;  %v426_v63 = vld [vmem:[%s6266_s13 + $0x3a8] sm:$0xff] }
  0x91   : > { %3453 = vmatprep.subr.bf16.mxu0 %v5125_v6  ;;  %3617 = vmatprep.subr.bf16.mxu1 %v5127_v7  ;;  %v5181_v3 = vcombine.high %v421_v59, %v425_v61  ;;  %v5183_v4 = vcombine.high %v422_v62, %v426_v63  ;;  %v429_v5 = vld [vmem:[%s6266_s13 + $0x3c0] sm:$0xff]  ;;  %v430_v7 = vld [vmem:[%s6266_s13 + $0x3c8] sm:$0xff]  ;;  %v5180_v9 = vcombine.low %v421_v59, %v425_v61 }
  0x92   : > { %v433_v6 = vld [vmem:[%s6266_s13 + $0x3e0] sm:$0xff]  ;;  %v434_v8 = vld [vmem:[%s6266_s13 + $0x3e8] sm:$0xff]  ;;  %v5182_v11 = vcombine.low %v422_v62, %v426_v63 }
  0x93   : > { %v5189_v12 = vcombine.high %v429_v5, %v433_v6  ;;  %v442_v17 = vld [vmem:[%s6266_s13 + $0x428] sm:$0xff]  ;;  %v5188_v18 = vcombine.low %v429_v5, %v433_v6  ;;  %v5190_v20 = vcombine.low %v430_v7, %v434_v8  ;;  %v453_v33 = vld [vmem:[%s6266_s13 + $0x480] sm:$0xff] }
  0x94   : > { %3454 = vmatpush1.bf16.msra.mxu0 %v5124_v13  ;;  %3618 = vmatpush1.bf16.msra.mxu1 %v5126_v14  ;;  %v5191_v13 = vcombine.high %v430_v7, %v434_v8  ;;  %v437_v14 = vld [vmem:[%s6266_s13 + $0x400] sm:$0xff]  ;;  %v446_v27 = vld [vmem:[%s6266_s13 + $0x448] sm:$0xff] }
  0x95   : > { %3455 = vmatprep.subr.bf16.mxu0 %v5133_v15  ;;  %3619 = vmatprep.subr.bf16.mxu1 %v5135_v16  ;;  %v441_v15 = vld [vmem:[%s6266_s13 + $0x420] sm:$0xff]  ;;  %v438_v16 = vld [vmem:[%s6266_s13 + $0x408] sm:$0xff] }
  0x96   : > { %v450_v28 = vld [vmem:[%s6266_s13 + $0x468] sm:$0xff]  ;;  %v5196_v60 = vcombine.low %v437_v14, %v441_v15  ;;  %v457_v34 = vld [vmem:[%s6266_s13 + $0x4a0] sm:$0xff] }
  0x97   : > { %v5213_v41 = vcombine.high %v453_v33, %v457_v34  ;;  %v465_v43 = vld [vmem:[%s6266_s13 + $0x4e0] sm:$0xff]  ;;  %v462_v44 = vld [vmem:[%s6266_s13 + $0x4c8] sm:$0xff] }
  0x98   : > { %3456 = vmatpush1.bf16.msra.mxu0 %v5132_v21  ;;  %3620 = vmatpush1.bf16.msra.mxu1 %v5134_v22  ;;  %v5197_v21 = vcombine.high %v437_v14, %v441_v15  ;;  %v5199_v22 = vcombine.high %v438_v16, %v442_v17  ;;  %v469_v51 = vld [vmem:[%s6266_s13 + $0x500] sm:$0xff]  ;;  %v470_v53 = vld [vmem:[%s6266_s13 + $0x508] sm:$0xff] }
  0x99   : > { %3457 = vmatprep.subr.bf16.mxu0 %v5141_v23  ;;  %3621 = vmatprep.subr.bf16.mxu1 %v5143_v24  ;;  %v445_v23 = vld [vmem:[%s6266_s13 + $0x440] sm:$0xff]  ;;  %v478_v63 = vld [vmem:[%s6266_s13 + $0x548] sm:$0xff] }
  0x9a   : > { %v449_v24 = vld [vmem:[%s6266_s13 + $0x460] sm:$0xff]  ;;  %v486_v8 = vld [vmem:[%s6266_s13 + $0x588] sm:$0xff] }
  0x9b   : > { %v473_v52 = vld [vmem:[%s6266_s13 + $0x520] sm:$0xff] }
  0x9c   : > { %3458 = vmatpush1.bf16.msra.mxu0 %v5140_v29  ;;  %3622 = vmatpush1.bf16.msra.mxu1 %v5142_v30  ;;  %v838_v29 = vcombine.high %v836_v25, %v836_v25  ;;  %v5198_v30 = vcombine.low %v438_v16, %v442_v17  ;;  %v477_v61 = vld [vmem:[%s6266_s13 + $0x540] sm:$0xff]  ;;  %v494_v17 = vld [vmem:[%s6266_s13 + $0x5c8] sm:$0xff] }
  0x9d   : > { %3459 = vmatprep.subr.bf16.mxu0 %v5149_v31  ;;  %3623 = vmatprep.subr.bf16.mxu1 %v5151_v32  ;;  %v5205_v31 = vcombine.high %v445_v23, %v449_v24  ;;  %v5207_v32 = vcombine.high %v446_v27, %v450_v28  ;;  %v481_v62 = vld [vmem:[%s6266_s13 + $0x560] sm:$0xff]  ;;  %v502_v25 = vld [vmem:[%s6266_s13 + $0x608] sm:$0xff] }
  0x9e   : > { %v6393_v35 = vrot.slane %v838_v29, %v6313_v54  ;;  %v461_v54 = vld [vmem:[%s6266_s13 + $0x4c0] sm:$0xff] }
  0x9f   : > { %v485_v6 = vld [vmem:[%s6266_s13 + $0x580] sm:$0xff] }
  0xa0   : > { %3460 = vmatpush1.bf16.msra.mxu0 %v5148_v37  ;;  %3624 = vmatpush1.bf16.msra.mxu1 %v5150_v38  ;;  %v454_v37 = vld [vmem:[%s6266_s13 + $0x488] sm:$0xff]  ;;  %v489_v7 = vld [vmem:[%s6266_s13 + $0x5a0] sm:$0xff] }
  0xa1   : > { %3461 = vmatprep.subr.bf16.mxu0 %v5157_v39  ;;  %3625 = vmatprep.subr.bf16.mxu1 %v5159_v40  ;;  %v458_v38 = vld [vmem:[%s6266_s13 + $0x4a8] sm:$0xff]  ;;  %v5204_v39 = vcombine.low %v445_v23, %v449_v24  ;;  %v5206_v40 = vcombine.low %v446_v27, %v450_v28  ;;  %v493_v15 = vld [vmem:[%s6266_s13 + $0x5c0] sm:$0xff]  ;;  %v5244_v19 = vcombine.low %v485_v6, %v489_v7 }
  0xa2   : > { %v5215_v42 = vcombine.high %v454_v37, %v458_v38  ;;  %v497_v16 = vld [vmem:[%s6266_s13 + $0x5e0] sm:$0xff]  ;;  %v506_v27 = vld [vmem:[%s6266_s13 + $0x628] sm:$0xff] }
  0xa3   : > { %v501_v23 = vld [vmem:[%s6266_s13 + $0x600] sm:$0xff]  ;;  %v5252_v28 = vcombine.low %v493_v15, %v497_v16 }
  0xa4   : > { %3462 = vmatpush1.bf16.msra.mxu0 %v5156_v46  ;;  %3626 = vmatpush1.bf16.msra.mxu1 %v5158_v47  ;;  %v466_v46 = vld [vmem:[%s6266_s13 + $0x4e8] sm:$0xff]  ;;  %v5212_v47 = vcombine.low %v453_v33, %v457_v34  ;;  %v505_v24 = vld [vmem:[%s6266_s13 + $0x620] sm:$0xff] }
  0xa5   : > { %3463 = vmatprep.subr.bf16.mxu0 %v5165_v48  ;;  %3627 = vmatprep.subr.bf16.mxu1 %v5167_v49  ;;  %v5214_v48 = vcombine.low %v454_v37, %v458_v38  ;;  %v5221_v49 = vcombine.high %v461_v54, %v465_v43  ;;  %v5223_v50 = vcombine.high %v462_v44, %v466_v46  ;;  %v510_v33 = vld [vmem:[%s6266_s13 + $0x648] sm:$0xff] }
  0xa6   : > { %v5261_v29 = vcombine.high %v501_v23, %v505_v24  ;;  %v514_v34 = vld [vmem:[%s6266_s13 + $0x668] sm:$0xff]  ;;  %v5260_v37 = vcombine.low %v501_v23, %v505_v24  ;;  %v5262_v38 = vcombine.low %v502_v25, %v506_v27 }
  0xa7   : > { %v558_v23 = vld [vmem:[%s6266_s13 + $0x7c8] sm:$0xff] }
  0xa8   : > { %3464 = vmatpush1.bf16.msra.mxu0 %v5164_v55  ;;  %3628 = vmatpush1.bf16.msra.mxu1 %v5166_v56  ;;  %v474_v55 = vld [vmem:[%s6266_s13 + $0x528] sm:$0xff]  ;;  %v5220_v56 = vcombine.low %v461_v54, %v465_v43 }
  0xa9   : > { %3465 = vmatprep.subr.bf16.mxu0 %v5173_v57  ;;  %3629 = vmatprep.subr.bf16.mxu1 %v5175_v58  ;;  %v5222_v57 = vcombine.low %v462_v44, %v466_v46  ;;  %v5229_v58 = vcombine.high %v469_v51, %v473_v52  ;;  %v5231_v59 = vcombine.high %v470_v53, %v474_v55  ;;  %v518_v54 = vld [vmem:[%s6266_s13 + $0x688] sm:$0xff] }
  0xaa   : > { %v522_v43 = vld [vmem:[%s6266_s13 + $0x6a8] sm:$0xff]  ;;  %v5270_v46 = vcombine.low %v510_v33, %v514_v34 }
  0xab   : > { %v562_v24 = vld [vmem:[%s6266_s13 + $0x7e8] sm:$0xff] }
  0xac   : > { %3466 = vmatpush1.bf16.msra.mxu0 %v5172_v1  ;;  %3630 = vmatpush1.bf16.msra.mxu1 %v5174_v2  ;;  %v482_v1 = vld [vmem:[%s6266_s13 + $0x568] sm:$0xff]  ;;  %v5228_v2 = vcombine.low %v469_v51, %v473_v52 }
  0xad   : > { %3467 = vmatprep.subr.bf16.mxu0 %v5181_v3  ;;  %3631 = vmatprep.subr.bf16.mxu1 %v5183_v4  ;;  %v5230_v3 = vcombine.low %v470_v53, %v474_v55  ;;  %v5237_v4 = vcombine.high %v477_v61, %v481_v62  ;;  %v5239_v5 = vcombine.high %v478_v63, %v482_v1  ;;  %v526_v51 = vld [vmem:[%s6266_s13 + $0x6c8] sm:$0xff] }
  0xae   : > { %v530_v52 = vld [vmem:[%s6266_s13 + $0x6e8] sm:$0xff]  ;;  %v5278_v55 = vcombine.low %v518_v54, %v522_v43 }
  0xb0   : > { %3468 = vmatpush1.bf16.msra.mxu0 %v5180_v9  ;;  %3632 = vmatpush1.bf16.msra.mxu1 %v5182_v11  ;;  %v490_v9 = vld [vmem:[%s6266_s13 + $0x5a8] sm:$0xff]  ;;  %v5236_v11 = vcombine.low %v477_v61, %v481_v62 }
  0xb1   : > { %3469 = vmatprep.subr.bf16.mxu0 %v5189_v12  ;;  %3633 = vmatprep.subr.bf16.mxu1 %v5191_v13  ;;  %v5238_v12 = vcombine.low %v478_v63, %v482_v1  ;;  %v5245_v13 = vcombine.high %v485_v6, %v489_v7  ;;  %v5247_v14 = vcombine.high %v486_v8, %v490_v9  ;;  %v534_v61 = vld [vmem:[%s6266_s13 + $0x708] sm:$0xff] }
  0xb2   : > { %v538_v62 = vld [vmem:[%s6266_s13 + $0x728] sm:$0xff]  ;;  %v5286_v1 = vcombine.low %v526_v51, %v530_v52 }
  0xb3   : > { %v542_v6 = vld [vmem:[%s6266_s13 + $0x748] sm:$0xff] }
  0xb4   : > { %3470 = vmatpush1.bf16.msra.mxu0 %v5188_v18  ;;  %3634 = vmatpush1.bf16.msra.mxu1 %v5190_v20  ;;  %v498_v18 = vld [vmem:[%s6266_s13 + $0x5e8] sm:$0xff]  ;;  %v5246_v20 = vcombine.low %v486_v8, %v490_v9  ;;  %v5294_v9 = vcombine.low %v534_v61, %v538_v62 }
  0xb5   : > { %3480 = vmatprep.subr.bf16.mxu0 %v5197_v21  ;;  %3644 = vmatprep.subr.bf16.mxu1 %v5199_v22  ;;  %v5253_v21 = vcombine.high %v493_v15, %v497_v16  ;;  %v5255_v22 = vcombine.high %v494_v17, %v498_v18  ;;  %v546_v7 = vld [vmem:[%s6266_s13 + $0x768] sm:$0xff] }
  0xb6   : > { %v550_v15 = vld [vmem:[%s6266_s13 + $0x788] sm:$0xff] }
  0xb7   : > { %3472 = vmatmul.mubr.bf16.vlgmr.msra.gmra.mrb[0].mxu0 %v6382_v26  ;;  %3636 = vmatmul.mubr.bf16.vlgmr.msra.gmra.mrb[0].mxu1 %v6382_v26  ;;  %v554_v16 = vld [vmem:[%s6266_s13 + $0x7a8] sm:$0xff] }
  0xb8   : > { %3481 = vmatpush1.bf16.msra.mxu0 %v5196_v60  ;;  %3645 = vmatpush1.bf16.msra.mxu1 %v5198_v30  ;;  %v5254_v60 = vcombine.low %v494_v17, %v498_v18  ;;  %v5263_v30 = vcombine.high %v502_v25, %v506_v27  ;;  %v5302_v18 = vcombine.low %v542_v6, %v546_v7 }
  0xb9   : > { %3482 = vmatprep.subr.bf16.mxu0 %v5205_v31  ;;  %3646 = vmatprep.subr.bf16.mxu1 %v5207_v32  ;;  %v509_v31 = vld [vmem:[%s6266_s13 + $0x640] sm:$0xff]  ;;  %v5310_v27 = vcombine.low %v550_v15, %v554_v16 }
  0xba   : > { %3512 = vmatprep.mubr.bf16.mxu0 %v6390_v0  ;;  %3676 = vmatprep.mubr.bf16.mxu1 %v6390_v0  ;;  %v513_v32 = vld [vmem:[%s6266_s13 + $0x660] sm:$0xff] }
  0xbb   : > { %v5268_v44 = vcombine.low %v509_v31, %v513_v32 }
  0xbc   : > { %3483 = vmatpush1.bf16.msra.mxu0 %v5204_v39  ;;  %3647 = vmatpush1.bf16.msra.mxu1 %v5206_v40  ;;  %v5269_v39 = vcombine.high %v509_v31, %v513_v32  ;;  %v5271_v40 = vcombine.high %v510_v33, %v514_v34  ;;  %v566_v31 = vld [vmem:[%s6266_s13 + $0x808] sm:$0xff]  ;;  %v5318_v34 = vcombine.low %v558_v23, %v562_v24 }
  0xbd   : > { %3484 = vmatprep.subr.bf16.mxu0 %v5213_v41  ;;  %3648 = vmatprep.subr.bf16.mxu1 %v5215_v42  ;;  %v517_v41 = vld [vmem:[%s6266_s13 + $0x680] sm:$0xff]  ;;  %v570_v32 = vld [vmem:[%s6266_s13 + $0x828] sm:$0xff] }
  0xbe   : > { %v521_v42 = vld [vmem:[%s6266_s13 + $0x6a0] sm:$0xff] }
  0xbf   : > { %v5276_v53 = vcombine.low %v517_v41, %v521_v42 }
  0xc0   : > { %3485 = vmatpush1.bf16.msra.mxu0 %v5212_v47  ;;  %3649 = vmatpush1.bf16.msra.mxu1 %v5214_v48  ;;  %v5277_v47 = vcombine.high %v517_v41, %v521_v42  ;;  %v5279_v48 = vcombine.high %v518_v54, %v522_v43  ;;  %v6464_v41 = vcombine.high %v6382_v26, %v6382_v26  ;;  %v574_v42 = vld [vmem:[%s6266_s13 + $0x848] sm:$0xff] }
  0xc1   : > { %3486 = vmatprep.subr.bf16.mxu0 %v5221_v49  ;;  %3650 = vmatprep.subr.bf16.mxu1 %v5223_v50  ;;  %v525_v49 = vld [vmem:[%s6266_s13 + $0x6c0] sm:$0xff]  ;;  %v578_v54 = vld [vmem:[%s6266_s13 + $0x868] sm:$0xff] }
  0xc2   : > { %v529_v50 = vld [vmem:[%s6266_s13 + $0x6e0] sm:$0xff] }
  0xc3   : > { %v5284_v63 = vcombine.low %v525_v49, %v529_v50 }
  0xc4   : > { %3487 = vmatpush1.bf16.msra.mxu0 %v5220_v56  ;;  %3651 = vmatpush1.bf16.msra.mxu1 %v5222_v57  ;;  %v5285_v56 = vcombine.high %v525_v49, %v529_v50  ;;  %v5287_v57 = vcombine.high %v526_v51, %v530_v52  ;;  %v585_v49 = vld [vmem:[%s6266_s13 + $0x8a0] sm:$0xff]  ;;  %v582_v50 = vld [vmem:[%s6266_s13 + $0x888] sm:$0xff] }
  0xc5   : > { %3488 = vmatprep.subr.bf16.mxu0 %v5229_v58  ;;  %3652 = vmatprep.subr.bf16.mxu1 %v5231_v59  ;;  %v533_v58 = vld [vmem:[%s6266_s13 + $0x700] sm:$0xff]  ;;  %v586_v51 = vld [vmem:[%s6266_s13 + $0x8a8] sm:$0xff] }
  0xc6   : > { %v537_v59 = vld [vmem:[%s6266_s13 + $0x720] sm:$0xff] }
  0xc7   : > { %v5292_v8 = vcombine.low %v533_v58, %v537_v59 }
  0xc8   : > { %3489 = vmatpush1.bf16.msra.mxu0 %v5228_v2  ;;  %3653 = vmatpush1.bf16.msra.mxu1 %v5230_v3  ;;  %v5293_v2 = vcombine.high %v533_v58, %v537_v59  ;;  %v5295_v3 = vcombine.high %v534_v61, %v538_v62  ;;  %v593_v58 = vld [vmem:[%s6266_s13 + $0x8e0] sm:$0xff]  ;;  %v590_v59 = vld [vmem:[%s6266_s13 + $0x8c8] sm:$0xff] }
  0xc9   : > { %3490 = vmatprep.subr.bf16.mxu0 %v5237_v4  ;;  %3654 = vmatprep.subr.bf16.mxu1 %v5239_v5  ;;  %v541_v4 = vld [vmem:[%s6266_s13 + $0x740] sm:$0xff]  ;;  %v594_v61 = vld [vmem:[%s6266_s13 + $0x8e8] sm:$0xff] }
  0xca   : > { %v545_v5 = vld [vmem:[%s6266_s13 + $0x760] sm:$0xff] }
  0xcb   : > { %v5300_v17 = vcombine.low %v541_v4, %v545_v5 }
  0xcc   : > { %3491 = vmatpush1.bf16.msra.mxu0 %v5236_v11  ;;  %3655 = vmatpush1.bf16.msra.mxu1 %v5238_v12  ;;  %v5301_v11 = vcombine.high %v541_v4, %v545_v5  ;;  %v5303_v12 = vcombine.high %v542_v6, %v546_v7  ;;  %v601_v4 = vld [vmem:[%s6266_s13 + $0x920] sm:$0xff]  ;;  %v598_v5 = vld [vmem:[%s6266_s13 + $0x908] sm:$0xff] }
  0xcd   : > { %3492 = vmatprep.subr.bf16.mxu0 %v5245_v13  ;;  %3656 = vmatprep.subr.bf16.mxu1 %v5247_v14  ;;  %v549_v13 = vld [vmem:[%s6266_s13 + $0x780] sm:$0xff]  ;;  %v602_v6 = vld [vmem:[%s6266_s13 + $0x928] sm:$0xff] }
  0xce   : > { %v553_v14 = vld [vmem:[%s6266_s13 + $0x7a0] sm:$0xff] }
  0xcf   : > { %v5308_v25 = vcombine.low %v549_v13, %v553_v14 }
  0xd0   : > { %3493 = vmatpush1.bf16.msra.mxu0 %v5244_v19  ;;  %3657 = vmatpush1.bf16.msra.mxu1 %v5246_v20  ;;  %v5309_v19 = vcombine.high %v549_v13, %v553_v14  ;;  %v5311_v20 = vcombine.high %v550_v15, %v554_v16  ;;  %v609_v13 = vld [vmem:[%s6266_s13 + $0x960] sm:$0xff]  ;;  %v606_v14 = vld [vmem:[%s6266_s13 + $0x948] sm:$0xff] }
  0xd1   : > { %3494 = vmatprep.subr.bf16.mxu0 %v5253_v21  ;;  %3658 = vmatprep.subr.bf16.mxu1 %v5255_v22  ;;  %v557_v21 = vld [vmem:[%s6266_s13 + $0x7c0] sm:$0xff]  ;;  %v610_v15 = vld [vmem:[%s6266_s13 + $0x968] sm:$0xff] }
  0xd2   : > { %v561_v22 = vld [vmem:[%s6266_s13 + $0x7e0] sm:$0xff] }
  0xd3   : > { %v5316_v33 = vcombine.low %v557_v21, %v561_v22 }
  0xd4   : > { %3495 = vmatpush1.bf16.msra.mxu0 %v5252_v28  ;;  %3659 = vmatpush1.bf16.msra.mxu1 %v5254_v60  ;;  %v5317_v28 = vcombine.high %v557_v21, %v561_v22  ;;  %v5319_v60 = vcombine.high %v558_v23, %v562_v24  ;;  %v617_v21 = vld [vmem:[%s6266_s13 + $0x9a0] sm:$0xff]  ;;  %v614_v22 = vld [vmem:[%s6266_s13 + $0x988] sm:$0xff] }
  0xd5   : > { %3496 = vmatprep.subr.bf16.mxu0 %v5261_v29  ;;  %3660 = vmatprep.subr.bf16.mxu1 %v5263_v30  ;;  %v565_v29 = vld [vmem:[%s6266_s13 + $0x800] sm:$0xff]  ;;  %v618_v23 = vld [vmem:[%s6266_s13 + $0x9a8] sm:$0xff] }
  0xd6   : > { %v569_v30 = vld [vmem:[%s6266_s13 + $0x820] sm:$0xff] }
  0xd7   : > { %v5324_v43 = vcombine.low %v565_v29, %v569_v30 }
  0xd8   : > { %3497 = vmatpush1.bf16.msra.mxu0 %v5260_v37  ;;  %3661 = vmatpush1.bf16.msra.mxu1 %v5262_v38  ;;  %v5325_v37 = vcombine.high %v565_v29, %v569_v30  ;;  %v5327_v38 = vcombine.high %v566_v31, %v570_v32  ;;  %v625_v29 = vld [vmem:[%s6266_s13 + $0x9e0] sm:$0xff]  ;;  %v622_v30 = vld [vmem:[%s6266_s13 + $0x9c8] sm:$0xff] }
  0xd9   : > { %3498 = vmatprep.subr.bf16.mxu0 %v5269_v39  ;;  %3662 = vmatprep.subr.bf16.mxu1 %v5271_v40  ;;  %v573_v39 = vld [vmem:[%s6266_s13 + $0x840] sm:$0xff] }
  0xda   : > { %v577_v40 = vld [vmem:[%s6266_s13 + $0x860] sm:$0xff] }
  0xdb   : > { %v5332_v52 = vcombine.low %v573_v39, %v577_v40 }
  0xdc   : > { %3499 = vmatpush1.bf16.msra.mxu0 %v5268_v44  ;;  %3663 = vmatpush1.bf16.msra.mxu1 %v5270_v46  ;;  %v5326_v44 = vcombine.low %v566_v31, %v570_v32  ;;  %v5333_v46 = vcombine.high %v573_v39, %v577_v40  ;;  %v626_v31 = vld [vmem:[%s6266_s13 + $0x9e8] sm:$0xff]  ;;  %v633_v39 = vld [vmem:[%s6266_s13 + $0xa20] sm:$0xff] }
  0xdd   : > { %3500 = vmatprep.subr.bf16.mxu0 %v5277_v47  ;;  %3664 = vmatprep.subr.bf16.mxu1 %v5279_v48  ;;  %v5335_v47 = vcombine.high %v574_v42, %v578_v54  ;;  %v581_v48 = vld [vmem:[%s6266_s13 + $0x880] sm:$0xff]  ;;  %v630_v40 = vld [vmem:[%s6266_s13 + $0xa08] sm:$0xff] }
  0xde   : > { %v5340_v62 = vcombine.low %v581_v48, %v585_v49 }
  0xe0   : > { %3501 = vmatpush1.bf16.msra.mxu0 %v5276_v53  ;;  %3665 = vmatpush1.bf16.msra.mxu1 %v5278_v55  ;;  %v5334_v53 = vcombine.low %v574_v42, %v578_v54  ;;  %v5341_v55 = vcombine.high %v581_v48, %v585_v49  ;;  %v634_v42 = vld [vmem:[%s6266_s13 + $0xa28] sm:$0xff]  ;;  %v641_v48 = vld [vmem:[%s6266_s13 + $0xa60] sm:$0xff] }
  0xe1   : > { %3502 = vmatprep.subr.bf16.mxu0 %v5285_v56  ;;  %3666 = vmatprep.subr.bf16.mxu1 %v5287_v57  ;;  %v5343_v56 = vcombine.high %v582_v50, %v586_v51  ;;  %v589_v57 = vld [vmem:[%s6266_s13 + $0x8c0] sm:$0xff]  ;;  %v638_v49 = vld [vmem:[%s6266_s13 + $0xa48] sm:$0xff] }
  0xe2   : > { %v5348_v7 = vcombine.low %v589_v57, %v593_v58 }
  0xe4   : > { %3503 = vmatpush1.bf16.msra.mxu0 %v5284_v63  ;;  %3667 = vmatpush1.bf16.msra.mxu1 %v5286_v1  ;;  %v5342_v63 = vcombine.low %v582_v50, %v586_v51  ;;  %v5349_v1 = vcombine.high %v589_v57, %v593_v58  ;;  %v642_v50 = vld [vmem:[%s6266_s13 + $0xa68] sm:$0xff]  ;;  %v649_v57 = vld [vmem:[%s6266_s13 + $0xaa0] sm:$0xff] }
  0xe5   : > { %3504 = vmatprep.subr.bf16.mxu0 %v5293_v2  ;;  %3668 = vmatprep.subr.bf16.mxu1 %v5295_v3  ;;  %v5351_v2 = vcombine.high %v590_v59, %v594_v61  ;;  %v597_v3 = vld [vmem:[%s6266_s13 + $0x900] sm:$0xff]  ;;  %v646_v58 = vld [vmem:[%s6266_s13 + $0xa88] sm:$0xff] }
  0xe6   : > { %v5356_v16 = vcombine.low %v597_v3, %v601_v4 }
  0xe8   : > { %3505 = vmatpush1.bf16.msra.mxu0 %v5292_v8  ;;  %3669 = vmatpush1.bf16.msra.mxu1 %v5294_v9  ;;  %v5350_v8 = vcombine.low %v590_v59, %v594_v61  ;;  %v5357_v9 = vcombine.high %v597_v3, %v601_v4  ;;  %v650_v59 = vld [vmem:[%s6266_s13 + $0xaa8] sm:$0xff]  ;;  %v657_v3 = vld [vmem:[%s6266_s13 + $0xae0] sm:$0xff] }
  0xe9   : > { %3506 = vmatprep.subr.bf16.mxu0 %v5301_v11  ;;  %3670 = vmatprep.subr.bf16.mxu1 %v5303_v12  ;;  %v5359_v11 = vcombine.high %v598_v5, %v602_v6  ;;  %v605_v12 = vld [vmem:[%s6266_s13 + $0x940] sm:$0xff]  ;;  %v654_v4 = vld [vmem:[%s6266_s13 + $0xac8] sm:$0xff] }
  0xea   : > { %v5364_v24 = vcombine.low %v605_v12, %v609_v13 }
  0xec   : > { %3507 = vmatpush1.bf16.msra.mxu0 %v5300_v17  ;;  %3671 = vmatpush1.bf16.msra.mxu1 %v5302_v18  ;;  %v5358_v17 = vcombine.low %v598_v5, %v602_v6  ;;  %v5365_v18 = vcombine.high %v605_v12, %v609_v13  ;;  %v658_v5 = vld [vmem:[%s6266_s13 + $0xae8] sm:$0xff]  ;;  %v665_v12 = vld [vmem:[%s6266_s13 + $0xb20] sm:$0xff] }
  0xed   : > { %3508 = vmatprep.subr.bf16.mxu0 %v5309_v19  ;;  %3672 = vmatprep.subr.bf16.mxu1 %v5311_v20  ;;  %v5367_v19 = vcombine.high %v606_v14, %v610_v15  ;;  %v613_v20 = vld [vmem:[%s6266_s13 + $0x980] sm:$0xff]  ;;  %v662_v13 = vld [vmem:[%s6266_s13 + $0xb08] sm:$0xff] }
  0xee   : > { %v5372_v32 = vcombine.low %v613_v20, %v617_v21 }
  0xf0   : > { %3509 = vmatpush1.bf16.msra.mxu0 %v5308_v25  ;;  %3673 = vmatpush1.bf16.msra.mxu1 %v5310_v27  ;;  %v5366_v25 = vcombine.low %v606_v14, %v610_v15  ;;  %v5373_v27 = vcombine.high %v613_v20, %v617_v21  ;;  %v666_v14 = vld [vmem:[%s6266_s13 + $0xb28] sm:$0xff]  ;;  %v673_v20 = vld [vmem:[%s6266_s13 + $0xb60] sm:$0xff] }
  0xf1   : > { %3510 = vmatprep.subr.bf16.mxu0 %v5317_v28  ;;  %3674 = vmatprep.subr.bf16.mxu1 %v5319_v60  ;;  %v5375_v28 = vcombine.high %v614_v22, %v618_v23  ;;  %v621_v60 = vld [vmem:[%s6266_s13 + $0x9c0] sm:$0xff]  ;;  %v670_v21 = vld [vmem:[%s6266_s13 + $0xb48] sm:$0xff] }
  0xf2   : > { %v5380_v54 = vcombine.low %v621_v60, %v625_v29 }
  0xf4   : > { %3511 = vmatpush1.bf16.msra.mxu0 %v5316_v33  ;;  %3675 = vmatpush1.bf16.msra.mxu1 %v5318_v34  ;;  %v5374_v33 = vcombine.low %v614_v22, %v618_v23  ;;  %v5381_v34 = vcombine.high %v621_v60, %v625_v29  ;;  %v674_v22 = vld [vmem:[%s6266_s13 + $0xb68] sm:$0xff]  ;;  %v681_v60 = vld [vmem:[%s6266_s13 + $0xba0] sm:$0xff] }
  0xf5   : > { %3521 = vmatprep.subr.bf16.mxu0 %v5325_v37  ;;  %3685 = vmatprep.subr.bf16.mxu1 %v5327_v38  ;;  %v5383_v37 = vcombine.high %v622_v30, %v626_v31  ;;  %v629_v38 = vld [vmem:[%s6266_s13 + $0xa00] sm:$0xff]  ;;  %v678_v29 = vld [vmem:[%s6266_s13 + $0xb88] sm:$0xff] }
  0xf6   : > { %v5388_v51 = vcombine.low %v629_v38, %v633_v39 }
  0xf7   : > { %3513 = vmatmul.mubr.bf16.vlgmr.msra.gmra.mrb[0].mxu0 %v6464_v41  ;;  %3677 = vmatmul.mubr.bf16.vlgmr.msra.gmra.mrb[0].mxu1 %v6464_v41 }
  0xf8   : > { %3522 = vmatpush1.bf16.msra.mxu0 %v5324_v43  ;;  %3686 = vmatpush1.bf16.msra.mxu1 %v5326_v44  ;;  %v5382_v43 = vcombine.low %v622_v30, %v626_v31  ;;  %v5389_v44 = vcombine.high %v629_v38, %v633_v39  ;;  %v682_v30 = vld [vmem:[%s6266_s13 + $0xba8] sm:$0xff]  ;;  %v689_v38 = vld [vmem:[%s6266_s13 + $0xbe0] sm:$0xff] }
  0xf9   : > { %3523 = vmatprep.subr.bf16.mxu0 %v5333_v46  ;;  %3687 = vmatprep.subr.bf16.mxu1 %v5335_v47  ;;  %v5391_v46 = vcombine.high %v630_v40, %v634_v42  ;;  %v637_v47 = vld [vmem:[%s6266_s13 + $0xa40] sm:$0xff]  ;;  %v686_v39 = vld [vmem:[%s6266_s13 + $0xbc8] sm:$0xff] }
  0xfa   : > { %3553 = vmatprep.mubr.bf16.mxu0 %v6393_v35  ;;  %3717 = vmatprep.mubr.bf16.mxu1 %v6393_v35  ;;  %v5396_v61 = vcombine.low %v637_v47, %v641_v48 }
  0xfc   : > { %3524 = vmatpush1.bf16.msra.mxu0 %v5332_v52  ;;  %3688 = vmatpush1.bf16.msra.mxu1 %v5334_v53  ;;  %v5390_v52 = vcombine.low %v630_v40, %v634_v42  ;;  %v5397_v53 = vcombine.high %v637_v47, %v641_v48  ;;  %v690_v40 = vld [vmem:[%s6266_s13 + $0xbe8] sm:$0xff]  ;;  %v697_v47 = vld [vmem:[%s6266_s13 + $0xc20] sm:$0xff] }
  0xfd   : > { %3525 = vmatprep.subr.bf16.mxu0 %v5341_v55  ;;  %3689 = vmatprep.subr.bf16.mxu1 %v5343_v56  ;;  %v5399_v55 = vcombine.high %v638_v49, %v642_v50  ;;  %v645_v56 = vld [vmem:[%s6266_s13 + $0xa80] sm:$0xff]  ;;  %v694_v48 = vld [vmem:[%s6266_s13 + $0xc08] sm:$0xff] }
  0xfe   : > { %v5404_v6 = vcombine.low %v645_v56, %v649_v57 }
 0x100   : > { %3526 = vmatpush1.bf16.msra.mxu0 %v5340_v62  ;;  %3690 = vmatpush1.bf16.msra.mxu1 %v5342_v63  ;;  %v5398_v62 = vcombine.low %v638_v49, %v642_v50  ;;  %v5405_v63 = vcombine.high %v645_v56, %v649_v57  ;;  %v698_v49 = vld [vmem:[%s6266_s13 + $0xc28] sm:$0xff]  ;;  %v705_v56 = vld [vmem:[%s6266_s13 + $0xc60] sm:$0xff] }
 0x101   : > { %3527 = vmatprep.subr.bf16.mxu0 %v5349_v1  ;;  %3691 = vmatprep.subr.bf16.mxu1 %v5351_v2  ;;  %v5407_v1 = vcombine.high %v646_v58, %v650_v59  ;;  %v653_v2 = vld [vmem:[%s6266_s13 + $0xac0] sm:$0xff]  ;;  %v702_v57 = vld [vmem:[%s6266_s13 + $0xc48] sm:$0xff] }
 0x102   : > { %v5412_v15 = vcombine.low %v653_v2, %v657_v3 }
 0x104   : > { %3528 = vmatpush1.bf16.msra.mxu0 %v5348_v7  ;;  %3692 = vmatpush1.bf16.msra.mxu1 %v5350_v8  ;;  %v5406_v7 = vcombine.low %v646_v58, %v650_v59  ;;  %v5413_v8 = vcombine.high %v653_v2, %v657_v3  ;;  %v706_v58 = vld [vmem:[%s6266_s13 + $0xc68] sm:$0xff]  ;;  %v713_v2 = vld [vmem:[%s6266_s13 + $0xca0] sm:$0xff]  ;;  %v6540_v3 = vcombine.high %v6393_v35, %v6393_v35 }
 0x105   : > { %3529 = vmatprep.subr.bf16.mxu0 %v5357_v9  ;;  %3693 = vmatprep.subr.bf16.mxu1 %v5359_v11  ;;  %v5415_v9 = vcombine.high %v654_v4, %v658_v5  ;;  %v661_v11 = vld [vmem:[%s6266_s13 + $0xb00] sm:$0xff] }
 0x106   : > { %v5420_v23 = vcombine.low %v661_v11, %v665_v12 }
 0x108   : > { %3530 = vmatpush1.bf16.msra.mxu0 %v5356_v16  ;;  %3694 = vmatpush1.bf16.msra.mxu1 %v5358_v17  ;;  %v5414_v16 = vcombine.low %v654_v4, %v658_v5  ;;  %v5421_v17 = vcombine.high %v661_v11, %v665_v12  ;;  %v710_v4 = vld [vmem:[%s6266_s13 + $0xc88] sm:$0xff]  ;;  %v717_v11 = vld [vmem:[%s6266_s13 + $0xcc0] sm:$0xff] }
 0x109   : > { %3531 = vmatprep.subr.bf16.mxu0 %v5365_v18  ;;  %3695 = vmatprep.subr.bf16.mxu1 %v5367_v19  ;;  %v5423_v18 = vcombine.high %v662_v13, %v666_v14  ;;  %v669_v19 = vld [vmem:[%s6266_s13 + $0xb40] sm:$0xff]  ;;  %v714_v5 = vld [vmem:[%s6266_s13 + $0xca8] sm:$0xff] }
 0x10a   : > { %v5428_v31 = vcombine.low %v669_v19, %v673_v20  ;;  %v721_v12 = vld [vmem:[%s6266_s13 + $0xce0] sm:$0xff] }
 0x10c   : > { %3532 = vmatpush1.bf16.msra.mxu0 %v5364_v24  ;;  %3696 = vmatpush1.bf16.msra.mxu1 %v5366_v25  ;;  %v5422_v24 = vcombine.low %v662_v13, %v666_v14  ;;  %v5429_v25 = vcombine.high %v669_v19, %v673_v20  ;;  %v718_v13 = vld [vmem:[%s6266_s13 + $0xcc8] sm:$0xff]  ;;  %v725_v19 = vld [vmem:[%s6266_s13 + $0xd00] sm:$0xff] }
 0x10d   : > { %3533 = vmatprep.subr.bf16.mxu0 %v5373_v27  ;;  %3697 = vmatprep.subr.bf16.mxu1 %v5375_v28  ;;  %v5431_v27 = vcombine.high %v670_v21, %v674_v22  ;;  %v677_v28 = vld [vmem:[%s6266_s13 + $0xb80] sm:$0xff]  ;;  %v722_v14 = vld [vmem:[%s6266_s13 + $0xce8] sm:$0xff] }
 0x10e   : > { %v5436_v42 = vcombine.low %v677_v28, %v681_v60  ;;  %v729_v20 = vld [vmem:[%s6266_s13 + $0xd20] sm:$0xff] }
 0x110   : > { %3534 = vmatpush1.bf16.msra.mxu0 %v5372_v32  ;;  %3698 = vmatpush1.bf16.msra.mxu1 %v5374_v33  ;;  %v5430_v32 = vcombine.low %v670_v21, %v674_v22  ;;  %v5437_v33 = vcombine.high %v677_v28, %v681_v60  ;;  %v726_v21 = vld [vmem:[%s6266_s13 + $0xd08] sm:$0xff]  ;;  %v733_v28 = vld [vmem:[%s6266_s13 + $0xd40] sm:$0xff] }
 0x111   : > { %3535 = vmatprep.subr.bf16.mxu0 %v5381_v34  ;;  %3699 = vmatprep.subr.bf16.mxu1 %v5383_v37  ;;  %v5439_v34 = vcombine.high %v678_v29, %v682_v30  ;;  %v685_v37 = vld [vmem:[%s6266_s13 + $0xbc0] sm:$0xff]  ;;  %v730_v22 = vld [vmem:[%s6266_s13 + $0xd28] sm:$0xff] }
 0x112   : > { %v5444_v50 = vcombine.low %v685_v37, %v689_v38  ;;  %v737_v60 = vld [vmem:[%s6266_s13 + $0xd60] sm:$0xff] }
 0x114   : > { %3536 = vmatpush1.bf16.msra.mxu0 %v5380_v54  ;;  %3700 = vmatpush1.bf16.msra.mxu1 %v5382_v43  ;;  %v5438_v54 = vcombine.low %v678_v29, %v682_v30  ;;  %v5445_v43 = vcombine.high %v685_v37, %v689_v38  ;;  %v734_v29 = vld [vmem:[%s6266_s13 + $0xd48] sm:$0xff]  ;;  %v741_v37 = vld [vmem:[%s6266_s13 + $0xd80] sm:$0xff] }
 0x115   : > { %3537 = vmatprep.subr.bf16.mxu0 %v5389_v44  ;;  %3701 = vmatprep.subr.bf16.mxu1 %v5391_v46  ;;  %v5447_v44 = vcombine.high %v686_v39, %v690_v40  ;;  %v693_v46 = vld [vmem:[%s6266_s13 + $0xc00] sm:$0xff]  ;;  %v738_v30 = vld [vmem:[%s6266_s13 + $0xd68] sm:$0xff] }
 0x116   : > { %v5452_v59 = vcombine.low %v693_v46, %v697_v47  ;;  %v745_v38 = vld [vmem:[%s6266_s13 + $0xda0] sm:$0xff] }
 0x118   : > { %3538 = vmatpush1.bf16.msra.mxu0 %v5388_v51  ;;  %3702 = vmatpush1.bf16.msra.mxu1 %v5390_v52  ;;  %v5446_v51 = vcombine.low %v686_v39, %v690_v40  ;;  %v5453_v52 = vcombine.high %v693_v46, %v697_v47  ;;  %v742_v39 = vld [vmem:[%s6266_s13 + $0xd88] sm:$0xff]  ;;  %v749_v46 = vld [vmem:[%s6266_s13 + $0xdc0] sm:$0xff] }
 0x119   : > { %3539 = vmatprep.subr.bf16.mxu0 %v5397_v53  ;;  %3703 = vmatprep.subr.bf16.mxu1 %v5399_v55  ;;  %v5455_v53 = vcombine.high %v694_v48, %v698_v49  ;;  %v701_v55 = vld [vmem:[%s6266_s13 + $0xc40] sm:$0xff]  ;;  %v746_v40 = vld [vmem:[%s6266_s13 + $0xda8] sm:$0xff] }
 0x11a   : > { %v753_v47 = vld [vmem:[%s6266_s13 + $0xde0] sm:$0xff] }
 0x11c   : > { %3540 = vmatpush1.bf16.msra.mxu0 %v5396_v61  ;;  %3704 = vmatpush1.bf16.msra.mxu1 %v5398_v62  ;;  %v5454_v61 = vcombine.low %v694_v48, %v698_v49  ;;  %v5461_v62 = vcombine.high %v701_v55, %v705_v56  ;;  %v750_v48 = vld [vmem:[%s6266_s13 + $0xdc8] sm:$0xff] }
 0x11d   : > { %3541 = vmatprep.subr.bf16.mxu0 %v5405_v63  ;;  %3705 = vmatprep.subr.bf16.mxu1 %v5407_v1  ;;  %v5463_v63 = vcombine.high %v702_v57, %v706_v58  ;;  %v709_v1 = vld [vmem:[%s6266_s13 + $0xc80] sm:$0xff]  ;;  %v754_v49 = vld [vmem:[%s6266_s13 + $0xde8] sm:$0xff] }
 0x120   : > { %3542 = vmatpush1.bf16.msra.mxu0 %v5404_v6  ;;  %3706 = vmatpush1.bf16.msra.mxu1 %v5406_v7  ;;  %v5460_v6 = vcombine.low %v701_v55, %v705_v56  ;;  %v5462_v7 = vcombine.low %v702_v57, %v706_v58  ;;  %v757_v55 = vld [vmem:[%s6266_s13 + $0xe00] sm:$0xff]  ;;  %v758_v57 = vld [vmem:[%s6266_s13 + $0xe08] sm:$0xff] }
 0x121   : > { %3543 = vmatprep.subr.bf16.mxu0 %v5413_v8  ;;  %3707 = vmatprep.subr.bf16.mxu1 %v5415_v9  ;;  %v5469_v8 = vcombine.high %v709_v1, %v713_v2  ;;  %v5471_v9 = vcombine.high %v710_v4, %v714_v5  ;;  %v761_v56 = vld [vmem:[%s6266_s13 + $0xe20] sm:$0xff]  ;;  %v762_v58 = vld [vmem:[%s6266_s13 + $0xe28] sm:$0xff] }
 0x124   : > { %3544 = vmatpush1.bf16.msra.mxu0 %v5412_v15  ;;  %3708 = vmatpush1.bf16.msra.mxu1 %v5414_v16  ;;  %v5468_v15 = vcombine.low %v709_v1, %v713_v2  ;;  %v5470_v16 = vcombine.low %v710_v4, %v714_v5  ;;  %v765_v1 = vld [vmem:[%s6266_s13 + $0xe40] sm:$0xff]  ;;  %v766_v4 = vld [vmem:[%s6266_s13 + $0xe48] sm:$0xff] }
 0x125   : > { %3545 = vmatprep.subr.bf16.mxu0 %v5421_v17  ;;  %3709 = vmatprep.subr.bf16.mxu1 %v5423_v18  ;;  %v5477_v17 = vcombine.high %v717_v11, %v721_v12  ;;  %v5479_v18 = vcombine.high %v718_v13, %v722_v14  ;;  %v769_v2 = vld [vmem:[%s6266_s13 + $0xe60] sm:$0xff]  ;;  %v770_v5 = vld [vmem:[%s6266_s13 + $0xe68] sm:$0xff] }
 0x128   : > { %3546 = vmatpush1.bf16.msra.mxu0 %v5420_v23  ;;  %3710 = vmatpush1.bf16.msra.mxu1 %v5422_v24  ;;  %v5476_v23 = vcombine.low %v717_v11, %v721_v12  ;;  %v5478_v24 = vcombine.low %v718_v13, %v722_v14  ;;  %v773_v11 = vld [vmem:[%s6266_s13 + $0xe80] sm:$0xff]  ;;  %v774_v13 = vld [vmem:[%s6266_s13 + $0xe88] sm:$0xff] }
 0x129   : > { %3547 = vmatprep.subr.bf16.mxu0 %v5429_v25  ;;  %3711 = vmatprep.subr.bf16.mxu1 %v5431_v27  ;;  %v5485_v25 = vcombine.high %v725_v19, %v729_v20  ;;  %v5487_v27 = vcombine.high %v726_v21, %v730_v22  ;;  %v777_v12 = vld [vmem:[%s6266_s13 + $0xea0] sm:$0xff]  ;;  %v778_v14 = vld [vmem:[%s6266_s13 + $0xea8] sm:$0xff] }
 0x12c   : > { %3548 = vmatpush1.bf16.msra.mxu0 %v5428_v31  ;;  %3712 = vmatpush1.bf16.msra.mxu1 %v5430_v32  ;;  %v5484_v31 = vcombine.low %v725_v19, %v729_v20  ;;  %v5486_v32 = vcombine.low %v726_v21, %v730_v22  ;;  %v781_v19 = vld [vmem:[%s6266_s13 + $0xec0] sm:$0xff]  ;;  %v782_v21 = vld [vmem:[%s6266_s13 + $0xec8] sm:$0xff] }
 0x12d   : > { %3549 = vmatprep.subr.bf16.mxu0 %v5437_v33  ;;  %3713 = vmatprep.subr.bf16.mxu1 %v5439_v34  ;;  %v5493_v33 = vcombine.high %v733_v28, %v737_v60  ;;  %v5495_v34 = vcombine.high %v734_v29, %v738_v30  ;;  %v785_v20 = vld [vmem:[%s6266_s13 + $0xee0] sm:$0xff]  ;;  %v786_v22 = vld [vmem:[%s6266_s13 + $0xee8] sm:$0xff] }
 0x130   : > { %3550 = vmatpush1.bf16.msra.mxu0 %v5436_v42  ;;  %3714 = vmatpush1.bf16.msra.mxu1 %v5438_v54  ;;  %v5492_v42 = vcombine.low %v733_v28, %v737_v60  ;;  %v5494_v54 = vcombine.low %v734_v29, %v738_v30  ;;  %v789_v28 = vld [vmem:[%s6266_s13 + $0xf00] sm:$0xff]  ;;  %v790_v29 = vld [vmem:[%s6266_s13 + $0xf08] sm:$0xff] }
 0x131   : > { %3551 = vmatprep.subr.bf16.mxu0 %v5445_v43  ;;  %3715 = vmatprep.subr.bf16.mxu1 %v5447_v44  ;;  %v5501_v43 = vcombine.high %v741_v37, %v745_v38  ;;  %v5503_v44 = vcombine.high %v742_v39, %v746_v40  ;;  %v793_v60 = vld [vmem:[%s6266_s13 + $0xf20] sm:$0xff]  ;;  %v794_v30 = vld [vmem:[%s6266_s13 + $0xf28] sm:$0xff] }
 0x134   : > { %3552 = vmatpush1.bf16.msra.mxu0 %v5444_v50  ;;  %3716 = vmatpush1.bf16.msra.mxu1 %v5446_v51  ;;  %v5500_v50 = vcombine.low %v741_v37, %v745_v38  ;;  %v5502_v51 = vcombine.low %v742_v39, %v746_v40  ;;  %v797_v37 = vld [vmem:[%s6266_s13 + $0xf40] sm:$0xff]  ;;  %v798_v39 = vld [vmem:[%s6266_s13 + $0xf48] sm:$0xff] }
 0x135   : > { %3562 = vmatprep.subr.bf16.mxu0 %v5453_v52  ;;  %3726 = vmatprep.subr.bf16.mxu1 %v5455_v53  ;;  %v5509_v52 = vcombine.high %v749_v46, %v753_v47  ;;  %v5511_v53 = vcombine.high %v750_v48, %v754_v49  ;;  %v801_v38 = vld [vmem:[%s6266_s13 + $0xf60] sm:$0xff]  ;;  %v802_v40 = vld [vmem:[%s6266_s13 + $0xf68] sm:$0xff] }
 0x137   : > { %3554 = vmatmul.mubr.bf16.vlgmr.msra.gmra.mrb[0].mxu0 %v6396_v36  ;;  %3718 = vmatmul.mubr.bf16.vlgmr.msra.gmra.mrb[0].mxu1 %v6396_v36 }
 0x138   : > { %3563 = vmatpush1.bf16.msra.mxu0 %v5452_v59  ;;  %3727 = vmatpush1.bf16.msra.mxu1 %v5454_v61  ;;  %v5508_v59 = vcombine.low %v749_v46, %v753_v47  ;;  %v5510_v61 = vcombine.low %v750_v48, %v754_v49  ;;  %v805_v46 = vld [vmem:[%s6266_s13 + $0xf80] sm:$0xff]  ;;  %v806_v48 = vld [vmem:[%s6266_s13 + $0xf88] sm:$0xff] }
 0x139   : > { %3564 = vmatprep.subr.bf16.mxu0 %v5461_v62  ;;  %3728 = vmatprep.subr.bf16.mxu1 %v5463_v63  ;;  %v5517_v62 = vcombine.high %v757_v55, %v761_v56  ;;  %v5519_v63 = vcombine.high %v758_v57, %v762_v58  ;;  %v809_v47 = vld [vmem:[%s6266_s13 + $0xfa0] sm:$0xff]  ;;  %v810_v49 = vld [vmem:[%s6266_s13 + $0xfa8] sm:$0xff] }
 0x13a   : > { %3594 = vmatprep.mubr.bf16.mxu0 %v6540_v3  ;;  %3758 = vmatprep.mubr.bf16.mxu1 %v6540_v3 }
 0x13c   : > { %3565 = vmatpush1.bf16.msra.mxu0 %v5460_v6  ;;  %3729 = vmatpush1.bf16.msra.mxu1 %v5462_v7  ;;  %v5516_v6 = vcombine.low %v757_v55, %v761_v56  ;;  %v5518_v7 = vcombine.low %v758_v57, %v762_v58  ;;  %v813_v55 = vld [vmem:[%s6266_s13 + $0xfc0] sm:$0xff]  ;;  %v814_v57 = vld [vmem:[%s6266_s13 + $0xfc8] sm:$0xff] }
 0x13d   : > { %3566 = vmatprep.subr.bf16.mxu0 %v5469_v8  ;;  %3730 = vmatprep.subr.bf16.mxu1 %v5471_v9  ;;  %v5525_v8 = vcombine.high %v765_v1, %v769_v2  ;;  %v5527_v9 = vcombine.high %v766_v4, %v770_v5  ;;  %v817_v56 = vld [vmem:[%s6266_s13 + $0xfe0] sm:$0xff]  ;;  %v818_v58 = vld [vmem:[%s6266_s13 + $0xfe8] sm:$0xff] }
 0x140   : > { %3567 = vmatpush1.bf16.msra.mxu0 %v5468_v15  ;;  %3731 = vmatpush1.bf16.msra.mxu1 %v5470_v16  ;;  %v5524_v15 = vcombine.low %v765_v1, %v769_v2  ;;  %v5526_v16 = vcombine.low %v766_v4, %v770_v5  ;;  %v311_v1 = vld [vmem:[%s6266_s13 + $0x10] sm:$0xff]  ;;  %v312_v4 = vld [vmem:[%s6266_s13 + $0x18] sm:$0xff] }
 0x141   : > { %3568 = vmatprep.subr.bf16.mxu0 %v5477_v17  ;;  %3732 = vmatprep.subr.bf16.mxu1 %v5479_v18  ;;  %v5533_v17 = vcombine.high %v773_v11, %v777_v12  ;;  %v5535_v18 = vcombine.high %v774_v13, %v778_v14  ;;  %v315_v2 = vld [vmem:[%s6266_s13 + $0x30] sm:$0xff]  ;;  %v316_v5 = vld [vmem:[%s6266_s13 + $0x38] sm:$0xff] }
 0x144   : > { %3569 = vmatpush1.bf16.msra.mxu0 %v5476_v23  ;;  %3733 = vmatpush1.bf16.msra.mxu1 %v5478_v24  ;;  %v5532_v23 = vcombine.low %v773_v11, %v777_v12  ;;  %v5534_v24 = vcombine.low %v774_v13, %v778_v14  ;;  %v319_v11 = vld [vmem:[%s6266_s13 + $0x50] sm:$0xff]  ;;  %v6608_v13 = vcombine.high %v6396_v36, %v6396_v36  ;;  %v320_v14 = vld [vmem:[%s6266_s13 + $0x58] sm:$0xff] }
 0x145   : > { %3570 = vmatprep.subr.bf16.mxu0 %v5485_v25  ;;  %3734 = vmatprep.subr.bf16.mxu1 %v5487_v27  ;;  %v5541_v25 = vcombine.high %v781_v19, %v785_v20  ;;  %v5543_v27 = vcombine.high %v782_v21, %v786_v22  ;;  %v323_v12 = vld [vmem:[%s6266_s13 + $0x70] sm:$0xff] }
 0x148   : > { %3571 = vmatpush1.bf16.msra.mxu0 %v5484_v31  ;;  %3735 = vmatpush1.bf16.msra.mxu1 %v5486_v32  ;;  %v5540_v31 = vcombine.low %v781_v19, %v785_v20  ;;  %v5542_v32 = vcombine.low %v782_v21, %v786_v22  ;;  %v327_v20 = vld [vmem:[%s6266_s13 + $0x90] sm:$0xff]  ;;  %v328_v22 = vld [vmem:[%s6266_s13 + $0x98] sm:$0xff] }
 0x149   : > { %3572 = vmatprep.subr.bf16.mxu0 %v5493_v33  ;;  %3736 = vmatprep.subr.bf16.mxu1 %v5495_v34  ;;  %v5549_v33 = vcombine.high %v789_v28, %v793_v60  ;;  %v5551_v34 = vcombine.high %v790_v29, %v794_v30  ;;  %v331_v21 = vld [vmem:[%s6266_s13 + $0xb0] sm:$0xff] }
 0x14c   : > { %3573 = vmatpush1.bf16.msra.mxu0 %v5492_v42  ;;  %3737 = vmatpush1.bf16.msra.mxu1 %v5494_v54  ;;  %v5548_v42 = vcombine.low %v789_v28, %v793_v60  ;;  %v5550_v54 = vcombine.low %v790_v29, %v794_v30  ;;  %v335_v60 = vld [vmem:[%s6266_s13 + $0xd0] sm:$0xff]  ;;  %v336_v30 = vld [vmem:[%s6266_s13 + $0xd8] sm:$0xff] }
 0x14d   : > { %3574 = vmatprep.subr.bf16.mxu0 %v5501_v43  ;;  %3738 = vmatprep.subr.bf16.mxu1 %v5503_v44  ;;  %v5557_v43 = vcombine.high %v797_v37, %v801_v38  ;;  %v5559_v44 = vcombine.high %v798_v39, %v802_v40  ;;  %v339_v29 = vld [vmem:[%s6266_s13 + $0xf0] sm:$0xff] }
 0x150   : > { %3575 = vmatpush1.bf16.msra.mxu0 %v5500_v50  ;;  %3739 = vmatpush1.bf16.msra.mxu1 %v5502_v51  ;;  %v5556_v50 = vcombine.low %v797_v37, %v801_v38  ;;  %v5558_v51 = vcombine.low %v798_v39, %v802_v40  ;;  %v343_v38 = vld [vmem:[%s6266_s13 + $0x110] sm:$0xff]  ;;  %v344_v40 = vld [vmem:[%s6266_s13 + $0x118] sm:$0xff] }
 0x151   : > { %3576 = vmatprep.subr.bf16.mxu0 %v5509_v52  ;;  %3740 = vmatprep.subr.bf16.mxu1 %v5511_v53  ;;  %v5565_v52 = vcombine.high %v805_v46, %v809_v47  ;;  %v5567_v53 = vcombine.high %v806_v48, %v810_v49  ;;  %v347_v39 = vld [vmem:[%s6266_s13 + $0x130] sm:$0xff] }
 0x154   : > { %3577 = vmatpush1.bf16.msra.mxu0 %v5508_v59  ;;  %3741 = vmatpush1.bf16.msra.mxu1 %v5510_v61  ;;  %v5564_v59 = vcombine.low %v805_v46, %v809_v47  ;;  %v5566_v61 = vcombine.low %v806_v48, %v810_v49  ;;  %v351_v46 = vld [vmem:[%s6266_s13 + $0x150] sm:$0xff]  ;;  %v352_v48 = vld [vmem:[%s6266_s13 + $0x158] sm:$0xff] }
 0x155   : > { %3578 = vmatprep.subr.bf16.mxu0 %v5517_v62  ;;  %3742 = vmatprep.subr.bf16.mxu1 %v5519_v63  ;;  %v5573_v62 = vcombine.high %v813_v55, %v817_v56  ;;  %v5575_v63 = vcombine.high %v814_v57, %v818_v58  ;;  %v355_v47 = vld [vmem:[%s6266_s13 + $0x170] sm:$0xff]  ;;  %v356_v49 = vld [vmem:[%s6266_s13 + $0x178] sm:$0xff] }
 0x158   : > { %3579 = vmatpush1.bf16.msra.mxu0 %v5516_v6  ;;  %3743 = vmatpush1.bf16.msra.mxu1 %v5518_v7  ;;  %v5572_v6 = vcombine.low %v813_v55, %v817_v56  ;;  %v5574_v7 = vcombine.low %v814_v57, %v818_v58  ;;  %v359_v55 = vld [vmem:[%s6266_s13 + $0x190] sm:$0xff]  ;;  %v360_v57 = vld [vmem:[%s6266_s13 + $0x198] sm:$0xff] }
 0x159   : > { %3580 = vmatprep.subr.bf16.mxu0 %v5525_v8  ;;  %3744 = vmatprep.subr.bf16.mxu1 %v5527_v9  ;;  %v5073_v8 = vcombine.high %v311_v1, %v315_v2  ;;  %v5075_v9 = vcombine.high %v312_v4, %v316_v5  ;;  %v363_v56 = vld [vmem:[%s6266_s13 + $0x1b0] sm:$0xff]  ;;  %v364_v58 = vld [vmem:[%s6266_s13 + $0x1b8] sm:$0xff] }
 0x15c   : > { %3581 = vmatpush1.bf16.msra.mxu0 %v5524_v15  ;;  %3745 = vmatpush1.bf16.msra.mxu1 %v5526_v16  ;;  %v324_v15 = vld [vmem:[%s6266_s13 + $0x78] sm:$0xff]  ;;  %v5072_v16 = vcombine.low %v311_v1, %v315_v2  ;;  %v367_v1 = vld [vmem:[%s6266_s13 + $0x1d0] sm:$0xff] }
 0x15d   : > { %3582 = vmatprep.subr.bf16.mxu0 %v5533_v17  ;;  %3746 = vmatprep.subr.bf16.mxu1 %v5535_v18  ;;  %v5074_v17 = vcombine.low %v312_v4, %v316_v5  ;;  %v5081_v18 = vcombine.high %v319_v11, %v323_v12  ;;  %v5083_v19 = vcombine.high %v320_v14, %v324_v15  ;;  %v371_v2 = vld [vmem:[%s6266_s13 + $0x1f0] sm:$0xff]  ;;  %v368_v4 = vld [vmem:[%s6266_s13 + $0x1d8] sm:$0xff] }
 0x15e   : > { %v372_v5 = vld [vmem:[%s6266_s13 + $0x1f8] sm:$0xff] }
 0x160   : > { %3583 = vmatpush1.bf16.msra.mxu0 %v5532_v23  ;;  %3747 = vmatpush1.bf16.msra.mxu1 %v5534_v24  ;;  %v332_v23 = vld [vmem:[%s6266_s13 + $0xb8] sm:$0xff]  ;;  %v5080_v24 = vcombine.low %v319_v11, %v323_v12  ;;  %v375_v11 = vld [vmem:[%s6266_s13 + $0x210] sm:$0xff] }
 0x161   : > { %3584 = vmatprep.subr.bf16.mxu0 %v5541_v25  ;;  %3748 = vmatprep.subr.bf16.mxu1 %v5543_v27  ;;  %v5082_v25 = vcombine.low %v320_v14, %v324_v15  ;;  %v5089_v27 = vcombine.high %v327_v20, %v331_v21  ;;  %v5091_v28 = vcombine.high %v328_v22, %v332_v23  ;;  %v379_v12 = vld [vmem:[%s6266_s13 + $0x230] sm:$0xff]  ;;  %v376_v14 = vld [vmem:[%s6266_s13 + $0x218] sm:$0xff] }
 0x162   : > { %v380_v15 = vld [vmem:[%s6266_s13 + $0x238] sm:$0xff] }
 0x164   : > { %3585 = vmatpush1.bf16.msra.mxu0 %v5540_v31  ;;  %3749 = vmatpush1.bf16.msra.mxu1 %v5542_v32  ;;  %v340_v31 = vld [vmem:[%s6266_s13 + $0xf8] sm:$0xff]  ;;  %v5088_v32 = vcombine.low %v327_v20, %v331_v21  ;;  %v383_v20 = vld [vmem:[%s6266_s13 + $0x250] sm:$0xff] }
 0x165   : > { %3586 = vmatprep.subr.bf16.mxu0 %v5549_v33  ;;  %3750 = vmatprep.subr.bf16.mxu1 %v5551_v34  ;;  %v5090_v33 = vcombine.low %v328_v22, %v332_v23  ;;  %v5097_v34 = vcombine.high %v335_v60, %v339_v29  ;;  %v5099_v37 = vcombine.high %v336_v30, %v340_v31  ;;  %v387_v21 = vld [vmem:[%s6266_s13 + $0x270] sm:$0xff]  ;;  %v384_v22 = vld [vmem:[%s6266_s13 + $0x258] sm:$0xff] }
 0x166   : > { %v388_v23 = vld [vmem:[%s6266_s13 + $0x278] sm:$0xff] }
 0x168   : > { %3587 = vmatpush1.bf16.msra.mxu0 %v5548_v42  ;;  %3751 = vmatpush1.bf16.msra.mxu1 %v5550_v54  ;;  %v348_v42 = vld [vmem:[%s6266_s13 + $0x138] sm:$0xff]  ;;  %v5096_v54 = vcombine.low %v335_v60, %v339_v29  ;;  %v391_v60 = vld [vmem:[%s6266_s13 + $0x290] sm:$0xff] }
 0x169   : > { %3588 = vmatprep.subr.bf16.mxu0 %v5557_v43  ;;  %3752 = vmatprep.subr.bf16.mxu1 %v5559_v44  ;;  %v5105_v43 = vcombine.high %v343_v38, %v347_v39  ;;  %v5107_v44 = vcombine.high %v344_v40, %v348_v42  ;;  %v395_v29 = vld [vmem:[%s6266_s13 + $0x2b0] sm:$0xff] }
 0x16c   : > { %3589 = vmatpush1.bf16.msra.mxu0 %v5556_v50  ;;  %3753 = vmatpush1.bf16.msra.mxu1 %v5558_v51  ;;  %v5104_v50 = vcombine.low %v343_v38, %v347_v39  ;;  %v5106_v51 = vcombine.low %v344_v40, %v348_v42  ;;  %v399_v38 = vld [vmem:[%s6266_s13 + $0x2d0] sm:$0xff]  ;;  %v400_v40 = vld [vmem:[%s6266_s13 + $0x2d8] sm:$0xff] }
 0x16d   : > { %3590 = vmatprep.subr.bf16.mxu0 %v5565_v52  ;;  %3754 = vmatprep.subr.bf16.mxu1 %v5567_v53  ;;  %v5113_v52 = vcombine.high %v351_v46, %v355_v47  ;;  %v5115_v53 = vcombine.high %v352_v48, %v356_v49  ;;  %v403_v39 = vld [vmem:[%s6266_s13 + $0x2f0] sm:$0xff]  ;;  %v404_v42 = vld [vmem:[%s6266_s13 + $0x2f8] sm:$0xff] }
 0x170   : > { %3591 = vmatpush1.bf16.msra.mxu0 %v5564_v59  ;;  %3755 = vmatpush1.bf16.msra.mxu1 %v5566_v61  ;;  %v5112_v59 = vcombine.low %v351_v46, %v355_v47  ;;  %v5114_v61 = vcombine.low %v352_v48, %v356_v49  ;;  %v407_v46 = vld [vmem:[%s6266_s13 + $0x310] sm:$0xff]  ;;  %v408_v48 = vld [vmem:[%s6266_s13 + $0x318] sm:$0xff] }
 0x171   : > { %3592 = vmatprep.subr.bf16.mxu0 %v5573_v62  ;;  %3756 = vmatprep.subr.bf16.mxu1 %v5575_v63  ;;  %v5121_v62 = vcombine.high %v359_v55, %v363_v56  ;;  %v5123_v63 = vcombine.high %v360_v57, %v364_v58  ;;  %v411_v47 = vld [vmem:[%s6266_s13 + $0x330] sm:$0xff]  ;;  %v412_v49 = vld [vmem:[%s6266_s13 + $0x338] sm:$0xff] }
 0x174   : > { %3593 = vmatpush1.bf16.msra.mxu0 %v5572_v6  ;;  %3757 = vmatpush1.bf16.msra.mxu1 %v5574_v7  ;;  %v5120_v6 = vcombine.low %v359_v55, %v363_v56  ;;  %v5122_v7 = vcombine.low %v360_v57, %v364_v58  ;;  %v415_v55 = vld [vmem:[%s6266_s13 + $0x350] sm:$0xff]  ;;  %v416_v57 = vld [vmem:[%s6266_s13 + $0x358] sm:$0xff] }
 0x175   : > { %3767 = vmatprep.subr.bf16.mxu0 %v5073_v8  ;;  %3931 = vmatprep.subr.bf16.mxu1 %v5075_v9  ;;  %v5129_v8 = vcombine.high %v367_v1, %v371_v2  ;;  %v5131_v9 = vcombine.high %v368_v4, %v372_v5  ;;  %v419_v56 = vld [vmem:[%s6266_s13 + $0x370] sm:$0xff]  ;;  %v420_v58 = vld [vmem:[%s6266_s13 + $0x378] sm:$0xff] }
 0x177   : > { %3595 = vmatmul.mubr.bf16.vlgmr.msra.gmra.mrb[0].mxu0 %v6608_v13  ;;  %3759 = vmatmul.mubr.bf16.vlgmr.msra.gmra.mrb[0].mxu1 %v6608_v13 }
 0x178   : > { %3768 = vmatpush1.bf16.msra.mxu0 %v5072_v16  ;;  %3932 = vmatpush1.bf16.msra.mxu1 %v5074_v17  ;;  %v5128_v16 = vcombine.low %v367_v1, %v371_v2  ;;  %v5130_v17 = vcombine.low %v368_v4, %v372_v5  ;;  %v423_v1 = vld [vmem:[%s6266_s13 + $0x390] sm:$0xff]  ;;  %v424_v4 = vld [vmem:[%s6266_s13 + $0x398] sm:$0xff] }
 0x179   : > { %3769 = vmatprep.subr.bf16.mxu0 %v5081_v18  ;;  %3933 = vmatprep.subr.bf16.mxu1 %v5083_v19  ;;  %v5137_v18 = vcombine.high %v375_v11, %v379_v12  ;;  %v5139_v19 = vcombine.high %v376_v14, %v380_v15  ;;  %v427_v2 = vld [vmem:[%s6266_s13 + $0x3b0] sm:$0xff]  ;;  %v428_v5 = vld [vmem:[%s6266_s13 + $0x3b8] sm:$0xff] }
 0x17a   : > { %3799 = vmatprep.mubr.bf16.mxu0 %v6337_v10  ;;  %3963 = vmatprep.mubr.bf16.mxu1 %v6337_v10  ;;  %v5098_v10 = vcombine.low %v336_v30, %v340_v31  ;;  %v392_v30 = vld [vmem:[%s6266_s13 + $0x298] sm:$0xff] }
 0x17b   : > { %v396_v31 = vld [vmem:[%s6266_s13 + $0x2b8] sm:$0xff] }
 0x17c   : > { %3770 = vmatpush1.bf16.msra.mxu0 %v5080_v24  ;;  %3934 = vmatpush1.bf16.msra.mxu1 %v5082_v25  ;;  %v5136_v24 = vcombine.low %v375_v11, %v379_v12  ;;  %v5138_v25 = vcombine.low %v376_v14, %v380_v15  ;;  %v431_v11 = vld [vmem:[%s6266_s13 + $0x3d0] sm:$0xff]  ;;  %v432_v14 = vld [vmem:[%s6266_s13 + $0x3d8] sm:$0xff] }
 0x17d   : > { %3771 = vmatprep.subr.bf16.mxu0 %v5089_v27  ;;  %3935 = vmatprep.subr.bf16.mxu1 %v5091_v28  ;;  %v5145_v27 = vcombine.high %v383_v20, %v387_v21  ;;  %v5147_v28 = vcombine.high %v384_v22, %v388_v23  ;;  %v435_v12 = vld [vmem:[%s6266_s13 + $0x3f0] sm:$0xff]  ;;  %v436_v15 = vld [vmem:[%s6266_s13 + $0x3f8] sm:$0xff] }
 0x180   : > { %3772 = vmatpush1.bf16.msra.mxu0 %v5088_v32  ;;  %3936 = vmatpush1.bf16.msra.mxu1 %v5090_v33  ;;  %v5144_v32 = vcombine.low %v383_v20, %v387_v21  ;;  %v5146_v33 = vcombine.low %v384_v22, %v388_v23  ;;  %v439_v20 = vld [vmem:[%s6266_s13 + $0x410] sm:$0xff]  ;;  %v440_v22 = vld [vmem:[%s6266_s13 + $0x418] sm:$0xff] }
 0x181   : > { %3773 = vmatprep.subr.bf16.mxu0 %v5097_v34  ;;  %3937 = vmatprep.subr.bf16.mxu1 %v5099_v37  ;;  %v5153_v34 = vcombine.high %v391_v60, %v395_v29  ;;  %v5155_v37 = vcombine.high %v392_v30, %v396_v31  ;;  %v443_v21 = vld [vmem:[%s6266_s13 + $0x430] sm:$0xff]  ;;  %v444_v23 = vld [vmem:[%s6266_s13 + $0x438] sm:$0xff] }
 0x184   : > { %3774 = vmatpush1.bf16.msra.mxu0 %v5096_v54  ;;  %3938 = vmatpush1.bf16.msra.mxu1 %v5098_v10  ;;  %v5152_v54 = vcombine.low %v391_v60, %v395_v29  ;;  %v5154_v10 = vcombine.low %v392_v30, %v396_v31  ;;  %v447_v60 = vld [vmem:[%s6266_s13 + $0x450] sm:$0xff]  ;;  %v448_v30 = vld [vmem:[%s6266_s13 + $0x458] sm:$0xff] }
 0x185   : > { %3775 = vmatprep.subr.bf16.mxu0 %v5105_v43  ;;  %3939 = vmatprep.subr.bf16.mxu1 %v5107_v44  ;;  %v5161_v43 = vcombine.high %v399_v38, %v403_v39  ;;  %v5163_v44 = vcombine.high %v400_v40, %v404_v42  ;;  %v451_v29 = vld [vmem:[%s6266_s13 + $0x470] sm:$0xff]  ;;  %v452_v31 = vld [vmem:[%s6266_s13 + $0x478] sm:$0xff] }
 0x188   : > { %3776 = vmatpush1.bf16.msra.mxu0 %v5104_v50  ;;  %3940 = vmatpush1.bf16.msra.mxu1 %v5106_v51  ;;  %v5160_v50 = vcombine.low %v399_v38, %v403_v39  ;;  %v5162_v51 = vcombine.low %v400_v40, %v404_v42  ;;  %v455_v38 = vld [vmem:[%s6266_s13 + $0x490] sm:$0xff]  ;;  %v456_v40 = vld [vmem:[%s6266_s13 + $0x498] sm:$0xff] }
 0x189   : > { %3777 = vmatprep.subr.bf16.mxu0 %v5113_v52  ;;  %3941 = vmatprep.subr.bf16.mxu1 %v5115_v53  ;;  %v5169_v52 = vcombine.high %v407_v46, %v411_v47  ;;  %v5171_v53 = vcombine.high %v408_v48, %v412_v49  ;;  %v459_v39 = vld [vmem:[%s6266_s13 + $0x4b0] sm:$0xff]  ;;  %v460_v42 = vld [vmem:[%s6266_s13 + $0x4b8] sm:$0xff] }
 0x18c   : > { %3778 = vmatpush1.bf16.msra.mxu0 %v5112_v59  ;;  %3942 = vmatpush1.bf16.msra.mxu1 %v5114_v61  ;;  %v5168_v59 = vcombine.low %v407_v46, %v411_v47  ;;  %v5170_v61 = vcombine.low %v408_v48, %v412_v49  ;;  %v463_v46 = vld [vmem:[%s6266_s13 + $0x4d0] sm:$0xff]  ;;  %v464_v48 = vld [vmem:[%s6266_s13 + $0x4d8] sm:$0xff] }
 0x18d   : > { %3779 = vmatprep.subr.bf16.mxu0 %v5121_v62  ;;  %3943 = vmatprep.subr.bf16.mxu1 %v5123_v63  ;;  %v5177_v62 = vcombine.high %v415_v55, %v419_v56  ;;  %v5179_v63 = vcombine.high %v416_v57, %v420_v58  ;;  %v467_v47 = vld [vmem:[%s6266_s13 + $0x4f0] sm:$0xff]  ;;  %v468_v49 = vld [vmem:[%s6266_s13 + $0x4f8] sm:$0xff] }
 0x190   : > { %3780 = vmatpush1.bf16.msra.mxu0 %v5120_v6  ;;  %3944 = vmatpush1.bf16.msra.mxu1 %v5122_v7  ;;  %v5176_v6 = vcombine.low %v415_v55, %v419_v56  ;;  %v5178_v7 = vcombine.low %v416_v57, %v420_v58  ;;  %v475_v55 = vld [vmem:[%s6266_s13 + $0x530] sm:$0xff]  ;;  %v472_v56 = vld [vmem:[%s6266_s13 + $0x518] sm:$0xff]  ;;  %v5224_v58 = vcombine.low %v463_v46, %v467_v47 }
 0x191   : > { %3781 = vmatprep.subr.bf16.mxu0 %v5129_v8  ;;  %3945 = vmatprep.subr.bf16.mxu1 %v5131_v9  ;;  %v5185_v8 = vcombine.high %v423_v1, %v427_v2  ;;  %v5187_v9 = vcombine.high %v424_v4, %v428_v5  ;;  %v476_v57 = vld [vmem:[%s6266_s13 + $0x538] sm:$0xff] }
 0x194   : > { %3782 = vmatpush1.bf16.msra.mxu0 %v5128_v16  ;;  %3946 = vmatpush1.bf16.msra.mxu1 %v5130_v17  ;;  %v5184_v16 = vcombine.low %v423_v1, %v427_v2  ;;  %v5186_v17 = vcombine.low %v424_v4, %v428_v5  ;;  %v480_v1 = vld [vmem:[%s6266_s13 + $0x558] sm:$0xff]  ;;  %v5234_v5 = vcombine.low %v472_v56, %v476_v57 }
 0x195   : > { %3783 = vmatprep.subr.bf16.mxu0 %v5137_v18  ;;  %3947 = vmatprep.subr.bf16.mxu1 %v5139_v19  ;;  %v5193_v18 = vcombine.high %v431_v11, %v435_v12  ;;  %v5195_v19 = vcombine.high %v432_v14, %v436_v15  ;;  %v484_v2 = vld [vmem:[%s6266_s13 + $0x578] sm:$0xff] }
 0x198   : > { %3784 = vmatpush1.bf16.msra.mxu0 %v5136_v24  ;;  %3948 = vmatpush1.bf16.msra.mxu1 %v5138_v25  ;;  %v5192_v24 = vcombine.low %v431_v11, %v435_v12  ;;  %v5194_v25 = vcombine.low %v432_v14, %v436_v15  ;;  %v488_v11 = vld [vmem:[%s6266_s13 + $0x598] sm:$0xff]  ;;  %v5242_v15 = vcombine.low %v480_v1, %v484_v2 }
 0x199   : > { %3785 = vmatprep.subr.bf16.mxu0 %v5145_v27  ;;  %3949 = vmatprep.subr.bf16.mxu1 %v5147_v28  ;;  %v5201_v27 = vcombine.high %v439_v20, %v443_v21  ;;  %v5203_v28 = vcombine.high %v440_v22, %v444_v23  ;;  %v492_v12 = vld [vmem:[%s6266_s13 + $0x5b8] sm:$0xff] }
 0x19c   : > { %3786 = vmatpush1.bf16.msra.mxu0 %v5144_v32  ;;  %3950 = vmatpush1.bf16.msra.mxu1 %v5146_v33  ;;  %v5200_v32 = vcombine.low %v439_v20, %v443_v21  ;;  %v5202_v33 = vcombine.low %v440_v22, %v444_v23  ;;  %v496_v20 = vld [vmem:[%s6266_s13 + $0x5d8] sm:$0xff]  ;;  %v5250_v23 = vcombine.low %v488_v11, %v492_v12 }
 0x19d   : > { %3787 = vmatprep.subr.bf16.mxu0 %v5153_v34  ;;  %3951 = vmatprep.subr.bf16.mxu1 %v5155_v37  ;;  %v5209_v34 = vcombine.high %v447_v60, %v451_v29  ;;  %v5211_v37 = vcombine.high %v448_v30, %v452_v31  ;;  %v500_v21 = vld [vmem:[%s6266_s13 + $0x5f8] sm:$0xff] }
 0x1a0   : > { %3788 = vmatpush1.bf16.msra.mxu0 %v5152_v54  ;;  %3952 = vmatpush1.bf16.msra.mxu1 %v5154_v10  ;;  %v5208_v54 = vcombine.low %v447_v60, %v451_v29  ;;  %v5210_v10 = vcombine.low %v448_v30, %v452_v31  ;;  %v504_v60 = vld [vmem:[%s6266_s13 + $0x618] sm:$0xff]  ;;  %v5258_v31 = vcombine.low %v496_v20, %v500_v21 }
 0x1a1   : > { %3789 = vmatprep.subr.bf16.mxu0 %v5161_v43  ;;  %3953 = vmatprep.subr.bf16.mxu1 %v5163_v44  ;;  %v5217_v43 = vcombine.high %v455_v38, %v459_v39  ;;  %v5219_v44 = vcombine.high %v456_v40, %v460_v42  ;;  %v508_v29 = vld [vmem:[%s6266_s13 + $0x638] sm:$0xff] }
 0x1a4   : > { %3790 = vmatpush1.bf16.msra.mxu0 %v5160_v50  ;;  %3954 = vmatpush1.bf16.msra.mxu1 %v5162_v51  ;;  %v5218_v50 = vcombine.low %v456_v40, %v460_v42  ;;  %v5225_v51 = vcombine.high %v463_v46, %v467_v47  ;;  %v5266_v42 = vcombine.low %v504_v60, %v508_v29  ;;  %v520_v46 = vld [vmem:[%s6266_s13 + $0x698] sm:$0xff] }
 0x1a5   : > { %3791 = vmatprep.subr.bf16.mxu0 %v5169_v52  ;;  %3955 = vmatprep.subr.bf16.mxu1 %v5171_v53  ;;  %v5227_v52 = vcombine.high %v464_v48, %v468_v49  ;;  %v471_v53 = vld [vmem:[%s6266_s13 + $0x510] sm:$0xff]  ;;  %v524_v47 = vld [vmem:[%s6266_s13 + $0x6b8] sm:$0xff] }
 0x1a6   : > { %v5232_v4 = vcombine.low %v471_v53, %v475_v55 }
 0x1a8   : > { %3792 = vmatpush1.bf16.msra.mxu0 %v5168_v59  ;;  %3956 = vmatpush1.bf16.msra.mxu1 %v5170_v61  ;;  %v5233_v59 = vcombine.high %v471_v53, %v475_v55  ;;  %v5235_v61 = vcombine.high %v472_v56, %v476_v57  ;;  %v528_v53 = vld [vmem:[%s6266_s13 + $0x6d8] sm:$0xff]  ;;  %v5282_v57 = vcombine.low %v520_v46, %v524_v47 }
 0x1a9   : > { %3793 = vmatprep.subr.bf16.mxu0 %v5177_v62  ;;  %3957 = vmatprep.subr.bf16.mxu1 %v5179_v63  ;;  %v479_v62 = vld [vmem:[%s6266_s13 + $0x550] sm:$0xff]  ;;  %v532_v55 = vld [vmem:[%s6266_s13 + $0x6f8] sm:$0xff] }
 0x1aa   : > { %v483_v63 = vld [vmem:[%s6266_s13 + $0x570] sm:$0xff] }
 0x1ab   : > { %v5240_v14 = vcombine.low %v479_v62, %v483_v63 }
 0x1ac   : > { %3794 = vmatpush1.bf16.msra.mxu0 %v5176_v6  ;;  %3958 = vmatpush1.bf16.msra.mxu1 %v5178_v7  ;;  %v5241_v6 = vcombine.high %v479_v62, %v483_v63  ;;  %v5243_v7 = vcombine.high %v480_v1, %v484_v2  ;;  %v536_v62 = vld [vmem:[%s6266_s13 + $0x718] sm:$0xff]  ;;  %v5290_v2 = vcombine.low %v528_v53, %v532_v55 }
 0x1ad   : > { %3795 = vmatprep.subr.bf16.mxu0 %v5185_v8  ;;  %3959 = vmatprep.subr.bf16.mxu1 %v5187_v9  ;;  %v487_v8 = vld [vmem:[%s6266_s13 + $0x590] sm:$0xff]  ;;  %v540_v63 = vld [vmem:[%s6266_s13 + $0x738] sm:$0xff] }
 0x1ae   : > { %v491_v9 = vld [vmem:[%s6266_s13 + $0x5b0] sm:$0xff] }
 0x1af   : > { %v5248_v22 = vcombine.low %v487_v8, %v491_v9 }
 0x1b0   : > { %3796 = vmatpush1.bf16.msra.mxu0 %v5184_v16  ;;  %3960 = vmatpush1.bf16.msra.mxu1 %v5186_v17  ;;  %v5249_v16 = vcombine.high %v487_v8, %v491_v9  ;;  %v5251_v17 = vcombine.high %v488_v11, %v492_v12  ;;  %v544_v8 = vld [vmem:[%s6266_s13 + $0x758] sm:$0xff]  ;;  %v5298_v12 = vcombine.low %v536_v62, %v540_v63 }
 0x1b1   : > { %3797 = vmatprep.subr.bf16.mxu0 %v5193_v18  ;;  %3961 = vmatprep.subr.bf16.mxu1 %v5195_v19  ;;  %v495_v18 = vld [vmem:[%s6266_s13 + $0x5d0] sm:$0xff]  ;;  %v548_v9 = vld [vmem:[%s6266_s13 + $0x778] sm:$0xff] }
 0x1b2   : > { %v499_v19 = vld [vmem:[%s6266_s13 + $0x5f0] sm:$0xff] }
 0x1b3   : > { %v5256_v30 = vcombine.low %v495_v18, %v499_v19 }
 0x1b4   : > { %3798 = vmatpush1.bf16.msra.mxu0 %v5192_v24  ;;  %3962 = vmatpush1.bf16.msra.mxu1 %v5194_v25  ;;  %v5257_v24 = vcombine.high %v495_v18, %v499_v19  ;;  %v5259_v25 = vcombine.high %v496_v20, %v500_v21  ;;  %v552_v18 = vld [vmem:[%s6266_s13 + $0x798] sm:$0xff]  ;;  %v5306_v21 = vcombine.low %v544_v8, %v548_v9 }
 0x1b5   : > { %3808 = vmatprep.subr.bf16.mxu0 %v5201_v27  ;;  %3972 = vmatprep.subr.bf16.mxu1 %v5203_v28  ;;  %v503_v27 = vld [vmem:[%s6266_s13 + $0x610] sm:$0xff]  ;;  %v556_v19 = vld [vmem:[%s6266_s13 + $0x7b8] sm:$0xff] }
 0x1b6   : > { %v507_v28 = vld [vmem:[%s6266_s13 + $0x630] sm:$0xff] }
 0x1b7   : > { %3800 = vmatmul.mubr.bf16.vlgmr.msra.gmra.mrb[4].mxu0 %v6382_v26  ;;  %3964 = vmatmul.mubr.bf16.vlgmr.msra.gmra.mrb[4].mxu1 %v6382_v26  ;;  %v5216_v26 = vcombine.low %v455_v38, %v459_v39  ;;  %v512_v38 = vld [vmem:[%s6266_s13 + $0x658] sm:$0xff]  ;;  %v5264_v40 = vcombine.low %v503_v27, %v507_v28 }
 0x1b8   : > { %3809 = vmatpush1.bf16.msra.mxu0 %v5200_v32  ;;  %3973 = vmatpush1.bf16.msra.mxu1 %v5202_v33  ;;  %v5265_v32 = vcombine.high %v503_v27, %v507_v28  ;;  %v5267_v33 = vcombine.high %v504_v60, %v508_v29  ;;  %v516_v39 = vld [vmem:[%s6266_s13 + $0x678] sm:$0xff]  ;;  %v5314_v29 = vcombine.low %v552_v18, %v556_v19 }
 0x1b9   : > { %3810 = vmatprep.subr.bf16.mxu0 %v5209_v34  ;;  %3974 = vmatprep.subr.bf16.mxu1 %v5211_v37  ;;  %v511_v34 = vld [vmem:[%s6266_s13 + $0x650] sm:$0xff]  ;;  %v560_v27 = vld [vmem:[%s6266_s13 + $0x7d8] sm:$0xff] }
 0x1ba   : > { %3840 = vmatprep.mubr.bf16.mxu0 %v6390_v0  ;;  %4004 = vmatprep.mubr.bf16.mxu1 %v6390_v0  ;;  %v5226_v0 = vcombine.low %v464_v48, %v468_v49  ;;  %v515_v37 = vld [vmem:[%s6266_s13 + $0x670] sm:$0xff]  ;;  %v5274_v49 = vcombine.low %v512_v38, %v516_v39  ;;  %v564_v28 = vld [vmem:[%s6266_s13 + $0x7f8] sm:$0xff] }
 0x1bb   : > { %v5272_v48 = vcombine.low %v511_v34, %v515_v37 }
 0x1bc   : > { %3811 = vmatpush1.bf16.msra.mxu0 %v5208_v54  ;;  %3975 = vmatpush1.bf16.msra.mxu1 %v5210_v10  ;;  %v5273_v54 = vcombine.high %v511_v34, %v515_v37  ;;  %v5275_v10 = vcombine.high %v512_v38, %v516_v39  ;;  %v568_v34 = vld [vmem:[%s6266_s13 + $0x818] sm:$0xff]  ;;  %v5322_v39 = vcombine.low %v560_v27, %v564_v28 }
 0x1bd   : > { %3812 = vmatprep.subr.bf16.mxu0 %v5217_v43  ;;  %3976 = vmatprep.subr.bf16.mxu1 %v5219_v44  ;;  %v519_v43 = vld [vmem:[%s6266_s13 + $0x690] sm:$0xff]  ;;  %v572_v37 = vld [vmem:[%s6266_s13 + $0x838] sm:$0xff] }
 0x1be   : > { %v523_v44 = vld [vmem:[%s6266_s13 + $0x6b0] sm:$0xff] }
 0x1bf   : > { %v5280_v56 = vcombine.low %v519_v43, %v523_v44 }
 0x1c0   : > { %3813 = vmatpush1.bf16.msra.mxu0 %v5216_v26  ;;  %3977 = vmatpush1.bf16.msra.mxu1 %v5218_v50  ;;  %v5281_v26 = vcombine.high %v519_v43, %v523_v44  ;;  %v5283_v50 = vcombine.high %v520_v46, %v524_v47  ;;  %v576_v43 = vld [vmem:[%s6266_s13 + $0x858] sm:$0xff]  ;;  %v5330_v47 = vcombine.low %v568_v34, %v572_v37 }
 0x1c1   : > { %3814 = vmatprep.subr.bf16.mxu0 %v5225_v51  ;;  %3978 = vmatprep.subr.bf16.mxu1 %v5227_v52  ;;  %v527_v51 = vld [vmem:[%s6266_s13 + $0x6d0] sm:$0xff]  ;;  %v580_v44 = vld [vmem:[%s6266_s13 + $0x878] sm:$0xff] }
 0x1c2   : > { %v531_v52 = vld [vmem:[%s6266_s13 + $0x6f0] sm:$0xff] }
 0x1c3   : > { %v5288_v1 = vcombine.low %v527_v51, %v531_v52 }
 0x1c4   : > { %3815 = vmatpush1.bf16.msra.mxu0 %v5224_v58  ;;  %3979 = vmatpush1.bf16.msra.mxu1 %v5226_v0  ;;  %v5289_v58 = vcombine.high %v527_v51, %v531_v52  ;;  %v5291_v0 = vcombine.high %v528_v53, %v532_v55  ;;  %v584_v51 = vld [vmem:[%s6266_s13 + $0x898] sm:$0xff]  ;;  %v5338_v55 = vcombine.low %v576_v43, %v580_v44 }
 0x1c5   : > { %3816 = vmatprep.subr.bf16.mxu0 %v5233_v59  ;;  %3980 = vmatprep.subr.bf16.mxu1 %v5235_v61  ;;  %v535_v59 = vld [vmem:[%s6266_s13 + $0x710] sm:$0xff]  ;;  %v588_v52 = vld [vmem:[%s6266_s13 + $0x8b8] sm:$0xff] }
 0x1c6   : > { %v539_v61 = vld [vmem:[%s6266_s13 + $0x730] sm:$0xff] }
 0x1c7   : > { %v5296_v11 = vcombine.low %v535_v59, %v539_v61 }
 0x1c8   : > { %3817 = vmatpush1.bf16.msra.mxu0 %v5232_v4  ;;  %3981 = vmatpush1.bf16.msra.mxu1 %v5234_v5  ;;  %v5297_v4 = vcombine.high %v535_v59, %v539_v61  ;;  %v5299_v5 = vcombine.high %v536_v62, %v540_v63  ;;  %v592_v59 = vld [vmem:[%s6266_s13 + $0x8d8] sm:$0xff]  ;;  %v5346_v62 = vcombine.low %v584_v51, %v588_v52 }
 0x1c9   : > { %3818 = vmatprep.subr.bf16.mxu0 %v5241_v6  ;;  %3982 = vmatprep.subr.bf16.mxu1 %v5243_v7  ;;  %v543_v6 = vld [vmem:[%s6266_s13 + $0x750] sm:$0xff]  ;;  %v596_v61 = vld [vmem:[%s6266_s13 + $0x8f8] sm:$0xff] }
 0x1ca   : > { %v547_v7 = vld [vmem:[%s6266_s13 + $0x770] sm:$0xff] }
 0x1cb   : > { %v5304_v20 = vcombine.low %v543_v6, %v547_v7 }
 0x1cc   : > { %3819 = vmatpush1.bf16.msra.mxu0 %v5240_v14  ;;  %3983 = vmatpush1.bf16.msra.mxu1 %v5242_v15  ;;  %v5305_v14 = vcombine.high %v543_v6, %v547_v7  ;;  %v5307_v15 = vcombine.high %v544_v8, %v548_v9  ;;  %v604_v6 = vld [vmem:[%s6266_s13 + $0x938] sm:$0xff] }
 0x1cd   : > { %3820 = vmatprep.subr.bf16.mxu0 %v5249_v16  ;;  %3984 = vmatprep.subr.bf16.mxu1 %v5251_v17  ;;  %v551_v16 = vld [vmem:[%s6266_s13 + $0x790] sm:$0xff] }
 0x1ce   : > { %v555_v17 = vld [vmem:[%s6266_s13 + $0x7b0] sm:$0xff] }
 0x1cf   : > { %v5312_v60 = vcombine.low %v551_v16, %v555_v17 }
 0x1d0   : > { %3821 = vmatpush1.bf16.msra.mxu0 %v5248_v22  ;;  %3985 = vmatpush1.bf16.msra.mxu1 %v5250_v23  ;;  %v5313_v22 = vcombine.high %v551_v16, %v555_v17  ;;  %v5315_v23 = vcombine.high %v552_v18, %v556_v19 }
 0x1d1   : > { %3822 = vmatprep.subr.bf16.mxu0 %v5257_v24  ;;  %3986 = vmatprep.subr.bf16.mxu1 %v5259_v25  ;;  %v559_v24 = vld [vmem:[%s6266_s13 + $0x7d0] sm:$0xff] }
 0x1d2   : > { %v563_v25 = vld [vmem:[%s6266_s13 + $0x7f0] sm:$0xff] }
 0x1d3   : > { %v5320_v38 = vcombine.low %v559_v24, %v563_v25 }
 0x1d4   : > { %3823 = vmatpush1.bf16.msra.mxu0 %v5256_v30  ;;  %3987 = vmatpush1.bf16.msra.mxu1 %v5258_v31  ;;  %v5321_v30 = vcombine.high %v559_v24, %v563_v25  ;;  %v5323_v31 = vcombine.high %v560_v27, %v564_v28 }
 0x1d5   : > { %3824 = vmatprep.subr.bf16.mxu0 %v5265_v32  ;;  %3988 = vmatprep.subr.bf16.mxu1 %v5267_v33  ;;  %v567_v32 = vld [vmem:[%s6266_s13 + $0x810] sm:$0xff] }
 0x1d6   : > { %v571_v33 = vld [vmem:[%s6266_s13 + $0x830] sm:$0xff] }
 0x1d7   : > { %v5328_v46 = vcombine.low %v567_v32, %v571_v33 }
 0x1d8   : > { %3825 = vmatpush1.bf16.msra.mxu0 %v5264_v40  ;;  %3989 = vmatpush1.bf16.msra.mxu1 %v5266_v42  ;;  %v5329_v40 = vcombine.high %v567_v32, %v571_v33  ;;  %v5331_v42 = vcombine.high %v568_v34, %v572_v37 }
 0x1d9   : > { %3826 = vmatprep.subr.bf16.mxu0 %v5273_v54  ;;  %3990 = vmatprep.subr.bf16.mxu1 %v5275_v10  ;;  %v575_v54 = vld [vmem:[%s6266_s13 + $0x850] sm:$0xff] }
 0x1da   : > { %v579_v10 = vld [vmem:[%s6266_s13 + $0x870] sm:$0xff] }
 0x1db   : > { %v5336_v53 = vcombine.low %v575_v54, %v579_v10 }
 0x1dc   : > { %3827 = vmatpush1.bf16.msra.mxu0 %v5272_v48  ;;  %3991 = vmatpush1.bf16.msra.mxu1 %v5274_v49  ;;  %v5337_v48 = vcombine.high %v575_v54, %v579_v10  ;;  %v5339_v49 = vcombine.high %v576_v43, %v580_v44 }
 0x1dd   : > { %3828 = vmatprep.subr.bf16.mxu0 %v5281_v26  ;;  %3992 = vmatprep.subr.bf16.mxu1 %v5283_v50  ;;  %v583_v26 = vld [vmem:[%s6266_s13 + $0x890] sm:$0xff] }
 0x1de   : > { %v587_v50 = vld [vmem:[%s6266_s13 + $0x8b0] sm:$0xff] }
 0x1e0   : > { %3829 = vmatpush1.bf16.msra.mxu0 %v5280_v56  ;;  %3993 = vmatpush1.bf16.msra.mxu1 %v5282_v57  ;;  %v5345_v56 = vcombine.high %v583_v26, %v587_v50  ;;  %v5347_v57 = vcombine.high %v584_v51, %v588_v52 }
 0x1e1   : > { %3830 = vmatprep.subr.bf16.mxu0 %v5289_v58  ;;  %3994 = vmatprep.subr.bf16.mxu1 %v5291_v0  ;;  %v591_v58 = vld [vmem:[%s6266_s13 + $0x8d0] sm:$0xff] }
 0x1e2   : > { %v595_v0 = vld [vmem:[%s6266_s13 + $0x8f0] sm:$0xff] }
 0x1e3   : > { %v5353_v63 = vcombine.high %v591_v58, %v595_v0  ;;  %v5352_v7 = vcombine.low %v591_v58, %v595_v0 }
 0x1e4   : > { %3831 = vmatpush1.bf16.msra.mxu0 %v5288_v1  ;;  %3995 = vmatpush1.bf16.msra.mxu1 %v5290_v2  ;;  %v5355_v1 = vcombine.high %v592_v59, %v596_v61  ;;  %v599_v2 = vld [vmem:[%s6266_s13 + $0x910] sm:$0xff] }
 0x1e5   : > { %3832 = vmatprep.subr.bf16.mxu0 %v5297_v4  ;;  %3996 = vmatprep.subr.bf16.mxu1 %v5299_v5  ;;  %v603_v4 = vld [vmem:[%s6266_s13 + $0x930] sm:$0xff]  ;;  %v600_v5 = vld [vmem:[%s6266_s13 + $0x918] sm:$0xff] }
 0x1e6   : > { %v5361_v8 = vcombine.high %v599_v2, %v603_v4  ;;  %v5363_v9 = vcombine.high %v600_v5, %v604_v6  ;;  %v5360_v16 = vcombine.low %v599_v2, %v603_v4  ;;  %v5362_v17 = vcombine.low %v600_v5, %v604_v6 }
 0x1e8   : > { %3833 = vmatpush1.bf16.msra.mxu0 %v5296_v11  ;;  %3997 = vmatpush1.bf16.msra.mxu1 %v5298_v12  ;;  %v607_v11 = vld [vmem:[%s6266_s13 + $0x950] sm:$0xff] }
 0x1e9   : > { %3834 = vmatprep.subr.bf16.mxu0 %v5305_v14  ;;  %3998 = vmatprep.subr.bf16.mxu1 %v5307_v15  ;;  %v611_v12 = vld [vmem:[%s6266_s13 + $0x970] sm:$0xff]  ;;  %v608_v14 = vld [vmem:[%s6266_s13 + $0x958] sm:$0xff] }
 0x1ea   : > { %v612_v15 = vld [vmem:[%s6266_s13 + $0x978] sm:$0xff]  ;;  %v5369_v18 = vcombine.high %v607_v11, %v611_v12  ;;  %v5368_v24 = vcombine.low %v607_v11, %v611_v12 }
 0x1eb   : > { %v5371_v19 = vcombine.high %v608_v14, %v612_v15  ;;  %v5370_v25 = vcombine.low %v608_v14, %v612_v15 }
 0x1ec   : > { %3835 = vmatpush1.bf16.msra.mxu0 %v5304_v20  ;;  %3999 = vmatpush1.bf16.msra.mxu1 %v5306_v21  ;;  %v615_v20 = vld [vmem:[%s6266_s13 + $0x990] sm:$0xff] }
 0x1ed   : > { %3836 = vmatprep.subr.bf16.mxu0 %v5313_v22  ;;  %4000 = vmatprep.subr.bf16.mxu1 %v5315_v23  ;;  %v619_v21 = vld [vmem:[%s6266_s13 + $0x9b0] sm:$0xff]  ;;  %v616_v22 = vld [vmem:[%s6266_s13 + $0x998] sm:$0xff] }
 0x1ee   : > { %v620_v23 = vld [vmem:[%s6266_s13 + $0x9b8] sm:$0xff]  ;;  %v5377_v27 = vcombine.high %v615_v20, %v619_v21  ;;  %v5376_v32 = vcombine.low %v615_v20, %v619_v21 }
 0x1ef   : > { %v5379_v28 = vcombine.high %v616_v22, %v620_v23  ;;  %v5378_v33 = vcombine.low %v616_v22, %v620_v23 }
 0x1f0   : > { %3837 = vmatpush1.bf16.msra.mxu0 %v5312_v60  ;;  %4001 = vmatpush1.bf16.msra.mxu1 %v5314_v29  ;;  %v623_v60 = vld [vmem:[%s6266_s13 + $0x9d0] sm:$0xff] }
 0x1f1   : > { %3838 = vmatprep.subr.bf16.mxu0 %v5321_v30  ;;  %4002 = vmatprep.subr.bf16.mxu1 %v5323_v31  ;;  %v627_v29 = vld [vmem:[%s6266_s13 + $0x9f0] sm:$0xff]  ;;  %v624_v30 = vld [vmem:[%s6266_s13 + $0x9d8] sm:$0xff] }
 0x1f2   : > { %v628_v31 = vld [vmem:[%s6266_s13 + $0x9f8] sm:$0xff]  ;;  %v5385_v34 = vcombine.high %v623_v60, %v627_v29  ;;  %v5384_v54 = vcombine.low %v623_v60, %v627_v29 }
 0x1f3   : > { %v5387_v37 = vcombine.high %v624_v30, %v628_v31  ;;  %v5386_v10 = vcombine.low %v624_v30, %v628_v31 }
 0x1f4   : > { %3839 = vmatpush1.bf16.msra.mxu0 %v5320_v38  ;;  %4003 = vmatpush1.bf16.msra.mxu1 %v5322_v39  ;;  %v631_v38 = vld [vmem:[%s6266_s13 + $0xa10] sm:$0xff] }
 0x1f5   : > { %3849 = vmatprep.subr.bf16.mxu0 %v5329_v40  ;;  %4013 = vmatprep.subr.bf16.mxu1 %v5331_v42  ;;  %v635_v39 = vld [vmem:[%s6266_s13 + $0xa30] sm:$0xff]  ;;  %v632_v40 = vld [vmem:[%s6266_s13 + $0xa18] sm:$0xff] }
 0x1f6   : > { %v636_v42 = vld [vmem:[%s6266_s13 + $0xa38] sm:$0xff]  ;;  %v5393_v43 = vcombine.high %v631_v38, %v635_v39 }
 0x1f7   : > { %3841 = vmatmul.mubr.bf16.vlgmr.msra.gmra.mrb[4].mxu0 %v6464_v41  ;;  %4005 = vmatmul.mubr.bf16.vlgmr.msra.gmra.mrb[4].mxu1 %v6464_v41  ;;  %v5344_v41 = vcombine.low %v583_v26, %v587_v50  ;;  %v5395_v44 = vcombine.high %v632_v40, %v636_v42  ;;  %v5392_v26 = vcombine.low %v631_v38, %v635_v39 }
 0x1f8   : > { %3850 = vmatpush1.bf16.msra.mxu0 %v5328_v46  ;;  %4014 = vmatpush1.bf16.msra.mxu1 %v5330_v47  ;;  %v639_v46 = vld [vmem:[%s6266_s13 + $0xa50] sm:$0xff]  ;;  %v5394_v50 = vcombine.low %v632_v40, %v636_v42 }
 0x1f9   : > { %3851 = vmatprep.subr.bf16.mxu0 %v5337_v48  ;;  %4015 = vmatprep.subr.bf16.mxu1 %v5339_v49  ;;  %v643_v47 = vld [vmem:[%s6266_s13 + $0xa70] sm:$0xff]  ;;  %v640_v48 = vld [vmem:[%s6266_s13 + $0xa58] sm:$0xff] }
 0x1fa   : > { %3881 = vmatprep.mubr.bf16.mxu0 %v6393_v35  ;;  %4045 = vmatprep.mubr.bf16.mxu1 %v6393_v35  ;;  %v5354_v35 = vcombine.low %v592_v59, %v596_v61  ;;  %v644_v49 = vld [vmem:[%s6266_s13 + $0xa78] sm:$0xff]  ;;  %v5401_v51 = vcombine.high %v639_v46, %v643_v47  ;;  %v5400_v58 = vcombine.low %v639_v46, %v643_v47 }
 0x1fb   : > { %v5403_v52 = vcombine.high %v640_v48, %v644_v49  ;;  %v5402_v0 = vcombine.low %v640_v48, %v644_v49 }
 0x1fc   : > { %3852 = vmatpush1.bf16.msra.mxu0 %v5336_v53  ;;  %4016 = vmatpush1.bf16.msra.mxu1 %v5338_v55  ;;  %v647_v53 = vld [vmem:[%s6266_s13 + $0xa90] sm:$0xff] }
 0x1fd   : > { %3853 = vmatprep.subr.bf16.mxu0 %v5345_v56  ;;  %4017 = vmatprep.subr.bf16.mxu1 %v5347_v57  ;;  %v651_v55 = vld [vmem:[%s6266_s13 + $0xab0] sm:$0xff]  ;;  %v648_v56 = vld [vmem:[%s6266_s13 + $0xa98] sm:$0xff] }
 0x1fe   : > { %v652_v57 = vld [vmem:[%s6266_s13 + $0xab8] sm:$0xff]  ;;  %v5409_v59 = vcombine.high %v647_v53, %v651_v55  ;;  %v5408_v2 = vcombine.low %v647_v53, %v651_v55 }
 0x1ff   : > { %v5411_v61 = vcombine.high %v648_v56, %v652_v57  ;;  %v5410_v4 = vcombine.low %v648_v56, %v652_v57 }
 0x200   : > { %3854 = vmatpush1.bf16.msra.mxu0 %v5344_v41  ;;  %4018 = vmatpush1.bf16.msra.mxu1 %v5346_v62  ;;  %v655_v41 = vld [vmem:[%s6266_s13 + $0xad0] sm:$0xff] }
 0x201   : > { %3855 = vmatprep.subr.bf16.mxu0 %v5353_v63  ;;  %4019 = vmatprep.subr.bf16.mxu1 %v5355_v1  ;;  %v659_v62 = vld [vmem:[%s6266_s13 + $0xaf0] sm:$0xff]  ;;  %v656_v63 = vld [vmem:[%s6266_s13 + $0xad8] sm:$0xff] }
 0x202   : > { %v660_v1 = vld [vmem:[%s6266_s13 + $0xaf8] sm:$0xff]  ;;  %v5417_v5 = vcombine.high %v655_v41, %v659_v62  ;;  %v5416_v11 = vcombine.low %v655_v41, %v659_v62 }
 0x203   : > { %v5419_v6 = vcombine.high %v656_v63, %v660_v1  ;;  %v5418_v12 = vcombine.low %v656_v63, %v660_v1 }
 0x204   : > { %3856 = vmatpush1.bf16.msra.mxu0 %v5352_v7  ;;  %4020 = vmatpush1.bf16.msra.mxu1 %v5354_v35  ;;  %v663_v7 = vld [vmem:[%s6266_s13 + $0xb10] sm:$0xff] }
 0x205   : > { %3857 = vmatprep.subr.bf16.mxu0 %v5361_v8  ;;  %4021 = vmatprep.subr.bf16.mxu1 %v5363_v9  ;;  %v667_v35 = vld [vmem:[%s6266_s13 + $0xb30] sm:$0xff]  ;;  %v664_v8 = vld [vmem:[%s6266_s13 + $0xb18] sm:$0xff] }
 0x206   : > { %v668_v9 = vld [vmem:[%s6266_s13 + $0xb38] sm:$0xff]  ;;  %v5425_v14 = vcombine.high %v663_v7, %v667_v35  ;;  %v5424_v20 = vcombine.low %v663_v7, %v667_v35 }
 0x207   : > { %v5427_v15 = vcombine.high %v664_v8, %v668_v9  ;;  %v5426_v21 = vcombine.low %v664_v8, %v668_v9  ;;  %v727_v9 = vld [vmem:[%s6266_s13 + $0xd10] sm:$0xff] }
 0x208   : > { %3858 = vmatpush1.bf16.msra.mxu0 %v5360_v16  ;;  %4022 = vmatpush1.bf16.msra.mxu1 %v5362_v17  ;;  %v671_v16 = vld [vmem:[%s6266_s13 + $0xb50] sm:$0xff] }
 0x209   : > { %3859 = vmatprep.subr.bf16.mxu0 %v5369_v18  ;;  %4023 = vmatprep.subr.bf16.mxu1 %v5371_v19  ;;  %v675_v17 = vld [vmem:[%s6266_s13 + $0xb70] sm:$0xff]  ;;  %v672_v18 = vld [vmem:[%s6266_s13 + $0xb58] sm:$0xff] }
 0x20a   : > { %v676_v19 = vld [vmem:[%s6266_s13 + $0xb78] sm:$0xff]  ;;  %v5433_v22 = vcombine.high %v671_v16, %v675_v17  ;;  %v5432_v60 = vcombine.low %v671_v16, %v675_v17 }
 0x20b   : > { %v5435_v23 = vcombine.high %v672_v18, %v676_v19  ;;  %v5434_v29 = vcombine.low %v672_v18, %v676_v19  ;;  %v6085_v18 = vmov 1983009808  }
 0x20c   : > { %3860 = vmatpush1.bf16.msra.mxu0 %v5368_v24  ;;  %4024 = vmatpush1.bf16.msra.mxu1 %v5370_v25  ;;  %v679_v24 = vld [vmem:[%s6266_s13 + $0xb90] sm:$0xff]  ;;  %v4106_v19 = vunpack.c.l.s4 %v6085_v18  ;;  %v780_v18 = vld [vmem:[%s6266_s13 + $0xeb8] sm:$0xff] }
 0x20d   : > { %3861 = vmatprep.subr.bf16.mxu0 %v5377_v27  ;;  %4025 = vmatprep.subr.bf16.mxu1 %v5379_v28  ;;  %v683_v25 = vld [vmem:[%s6266_s13 + $0xbb0] sm:$0xff]  ;;  %v680_v27 = vld [vmem:[%s6266_s13 + $0xb98] sm:$0xff] }
 0x20e   : > { %v684_v28 = vld [vmem:[%s6266_s13 + $0xbb8] sm:$0xff]  ;;  %v5441_v30 = vcombine.high %v679_v24, %v683_v25  ;;  %v5440_v38 = vcombine.low %v679_v24, %v683_v25 }
 0x20f   : > { %v5443_v31 = vcombine.high %v680_v27, %v684_v28  ;;  %v5442_v39 = vcombine.low %v680_v27, %v684_v28  ;;  %v4107_v28 = vunpack.c.0.s8 %v4106_v19 }
 0x210   : > { %3862 = vmatpush1.bf16.msra.mxu0 %v5376_v32  ;;  %4026 = vmatpush1.bf16.msra.mxu1 %v5378_v33  ;;  %v687_v32 = vld [vmem:[%s6266_s13 + $0xbd0] sm:$0xff] }
 0x211   : > { %3863 = vmatprep.subr.bf16.mxu0 %v5385_v34  ;;  %4027 = vmatprep.subr.bf16.mxu1 %v5387_v37  ;;  %v691_v33 = vld [vmem:[%s6266_s13 + $0xbf0] sm:$0xff]  ;;  %v688_v34 = vld [vmem:[%s6266_s13 + $0xbd8] sm:$0xff] }
 0x212   : > { %v692_v37 = vld [vmem:[%s6266_s13 + $0xbf8] sm:$0xff]  ;;  %v5449_v40 = vcombine.high %v687_v32, %v691_v33  ;;  %v5448_v46 = vcombine.low %v687_v32, %v691_v33 }
 0x213   : > { %v5451_v42 = vcombine.high %v688_v34, %v692_v37  ;;  %v5450_v47 = vcombine.low %v688_v34, %v692_v37  ;;  %v748_v32 = vld [vmem:[%s6266_s13 + $0xdb8] sm:$0xff] }
 0x214   : > { %3864 = vmatpush1.bf16.msra.mxu0 %v5384_v54  ;;  %4028 = vmatpush1.bf16.msra.mxu1 %v5386_v10  ;;  %v695_v54 = vld [vmem:[%s6266_s13 + $0xc10] sm:$0xff] }
 0x215   : > { %3865 = vmatprep.subr.bf16.mxu0 %v5393_v43  ;;  %4029 = vmatprep.subr.bf16.mxu1 %v5395_v44  ;;  %v699_v10 = vld [vmem:[%s6266_s13 + $0xc30] sm:$0xff]  ;;  %v696_v43 = vld [vmem:[%s6266_s13 + $0xc18] sm:$0xff] }
 0x216   : > { %v700_v44 = vld [vmem:[%s6266_s13 + $0xc38] sm:$0xff]  ;;  %v5457_v48 = vcombine.high %v695_v54, %v699_v10  ;;  %v5456_v53 = vcombine.low %v695_v54, %v699_v10  ;;  %v755_v54 = vld [vmem:[%s6266_s13 + $0xdf0] sm:$0xff] }
 0x217   : > { %v5459_v49 = vcombine.high %v696_v43, %v700_v44  ;;  %v5458_v55 = vcombine.low %v696_v43, %v700_v44  ;;  %v752_v44 = vld [vmem:[%s6266_s13 + $0xdd8] sm:$0xff] }
 0x218   : > { %3866 = vmatpush1.bf16.msra.mxu0 %v5392_v26  ;;  %4030 = vmatpush1.bf16.msra.mxu1 %v5394_v50  ;;  %v703_v26 = vld [vmem:[%s6266_s13 + $0xc50] sm:$0xff] }
 0x219   : > { %3867 = vmatprep.subr.bf16.mxu0 %v5401_v51  ;;  %4031 = vmatprep.subr.bf16.mxu1 %v5403_v52  ;;  %v707_v50 = vld [vmem:[%s6266_s13 + $0xc70] sm:$0xff]  ;;  %v704_v51 = vld [vmem:[%s6266_s13 + $0xc58] sm:$0xff] }
 0x21a   : > { %v708_v52 = vld [vmem:[%s6266_s13 + $0xc78] sm:$0xff]  ;;  %v5465_v56 = vcombine.high %v703_v26, %v707_v50  ;;  %v5464_v41 = vcombine.low %v703_v26, %v707_v50 }
 0x21b   : > { %v5467_v57 = vcombine.high %v704_v51, %v708_v52  ;;  %v5466_v62 = vcombine.low %v704_v51, %v708_v52 }
 0x21c   : > { %3868 = vmatpush1.bf16.msra.mxu0 %v5400_v58  ;;  %4032 = vmatpush1.bf16.msra.mxu1 %v5402_v0  ;;  %v711_v58 = vld [vmem:[%s6266_s13 + $0xc90] sm:$0xff] }
 0x21d   : > { %3869 = vmatprep.subr.bf16.mxu0 %v5409_v59  ;;  %4033 = vmatprep.subr.bf16.mxu1 %v5411_v61  ;;  %v715_v0 = vld [vmem:[%s6266_s13 + $0xcb0] sm:$0xff]  ;;  %v712_v59 = vld [vmem:[%s6266_s13 + $0xc98] sm:$0xff] }
 0x21e   : > { %v716_v61 = vld [vmem:[%s6266_s13 + $0xcb8] sm:$0xff]  ;;  %v5473_v63 = vcombine.high %v711_v58, %v715_v0 }
 0x21f   : > { %v5475_v1 = vcombine.high %v712_v59, %v716_v61  ;;  %v5474_v7 = vcombine.low %v712_v59, %v716_v61  ;;  %v763_v59 = vld [vmem:[%s6266_s13 + $0xe30] sm:$0xff] }
 0x220   : > { %3870 = vmatpush1.bf16.msra.mxu0 %v5408_v2  ;;  %4034 = vmatpush1.bf16.msra.mxu1 %v5410_v4  ;;  %v719_v2 = vld [vmem:[%s6266_s13 + $0xcd0] sm:$0xff] }
 0x221   : > { %3871 = vmatprep.subr.bf16.mxu0 %v5417_v5  ;;  %4035 = vmatprep.subr.bf16.mxu1 %v5419_v6  ;;  %v723_v4 = vld [vmem:[%s6266_s13 + $0xcf0] sm:$0xff]  ;;  %v720_v5 = vld [vmem:[%s6266_s13 + $0xcd8] sm:$0xff] }
 0x222   : > { %v724_v6 = vld [vmem:[%s6266_s13 + $0xcf8] sm:$0xff]  ;;  %v5481_v35 = vcombine.high %v719_v2, %v723_v4 }
 0x223   : > { %v5483_v8 = vcombine.high %v720_v5, %v724_v6 }
 0x224   : > { %3872 = vmatpush1.bf16.msra.mxu0 %v5416_v11  ;;  %4036 = vmatpush1.bf16.msra.mxu1 %v5418_v12  ;;  %v731_v11 = vld [vmem:[%s6266_s13 + $0xd30] sm:$0xff]  ;;  %v728_v12 = vld [vmem:[%s6266_s13 + $0xd18] sm:$0xff] }
 0x225   : > { %3873 = vmatprep.subr.bf16.mxu0 %v5425_v14  ;;  %4037 = vmatprep.subr.bf16.mxu1 %v5427_v15  ;;  %v732_v14 = vld [vmem:[%s6266_s13 + $0xd38] sm:$0xff]  ;;  %v5480_v15 = vcombine.low %v719_v2, %v723_v4  ;;  %v5489_v16 = vcombine.high %v727_v9, %v731_v11  ;;  %v5488_v24 = vcombine.low %v727_v9, %v731_v11 }
 0x226   : > { %v5491_v17 = vcombine.high %v728_v12, %v732_v14  ;;  %v5490_v25 = vcombine.low %v728_v12, %v732_v14  ;;  %v772_v9 = vld [vmem:[%s6266_s13 + $0xe78] sm:$0xff] }
 0x228   : > { %3874 = vmatpush1.bf16.msra.mxu0 %v5424_v20  ;;  %4038 = vmatpush1.bf16.msra.mxu1 %v5426_v21  ;;  %v735_v20 = vld [vmem:[%s6266_s13 + $0xd50] sm:$0xff] }
 0x229   : > { %3875 = vmatprep.subr.bf16.mxu0 %v5433_v22  ;;  %4039 = vmatprep.subr.bf16.mxu1 %v5435_v23  ;;  %v739_v21 = vld [vmem:[%s6266_s13 + $0xd70] sm:$0xff]  ;;  %v736_v22 = vld [vmem:[%s6266_s13 + $0xd58] sm:$0xff] }
 0x22a   : > { %v740_v23 = vld [vmem:[%s6266_s13 + $0xd78] sm:$0xff]  ;;  %v5497_v27 = vcombine.high %v735_v20, %v739_v21  ;;  %v5496_v33 = vcombine.low %v735_v20, %v739_v21 }
 0x22b   : > { %v5498_v34 = vcombine.low %v736_v22, %v740_v23 }
 0x22c   : > { %3876 = vmatpush1.bf16.msra.mxu0 %v5432_v60  ;;  %4040 = vmatpush1.bf16.msra.mxu1 %v5434_v29  ;;  %v5499_v60 = vcombine.high %v736_v22, %v740_v23  ;;  %v743_v29 = vld [vmem:[%s6266_s13 + $0xd90] sm:$0xff] }
 0x22d   : > { %3877 = vmatprep.subr.bf16.mxu0 %v5441_v30  ;;  %4041 = vmatprep.subr.bf16.mxu1 %v5443_v31  ;;  %v747_v30 = vld [vmem:[%s6266_s13 + $0xdb0] sm:$0xff]  ;;  %v744_v31 = vld [vmem:[%s6266_s13 + $0xd98] sm:$0xff] }
 0x22e   : > { %v5505_v37 = vcombine.high %v743_v29, %v747_v30  ;;  %v5504_v26 = vcombine.low %v743_v29, %v747_v30  ;;  %v783_v23 = vld [vmem:[%s6266_s13 + $0xed0] sm:$0xff] }
 0x230   : > { %3878 = vmatpush1.bf16.msra.mxu0 %v5440_v38  ;;  %4042 = vmatpush1.bf16.msra.mxu1 %v5442_v39  ;;  %v6841_v39 = vsub.s32 %v4107_v28, %v6306_v45 }
 0x231   : > { %3879 = vmatprep.subr.bf16.mxu0 %v5449_v40  ;;  %4043 = vmatprep.subr.bf16.mxu1 %v5451_v42  ;;  %v5507_v40 = vcombine.high %v744_v31, %v748_v32  ;;  %v751_v42 = vld [vmem:[%s6266_s13 + $0xdd0] sm:$0xff] }
 0x234   : > { %3880 = vmatpush1.bf16.msra.mxu0 %v5448_v46  ;;  %4044 = vmatpush1.bf16.msra.mxu1 %v5450_v47  ;;  %v756_v46 = vld [vmem:[%s6266_s13 + $0xdf8] sm:$0xff] }
 0x235   : > { %3890 = vmatprep.subr.bf16.mxu0 %v5457_v48  ;;  %4054 = vmatprep.subr.bf16.mxu1 %v5459_v49  ;;  %v5514_v4 = vcombine.low %v752_v44, %v756_v46 }
 0x237   : > { %3882 = vmatmul.mubr.bf16.vlgmr.msra.gmra.mrb[4].mxu0 %v6396_v36  ;;  %4046 = vmatmul.mubr.bf16.vlgmr.msra.gmra.mrb[4].mxu1 %v6396_v36  ;;  %v5472_v36 = vcombine.low %v711_v58, %v715_v0  ;;  %v5515_v58 = vcombine.high %v752_v44, %v756_v46  ;;  %v759_v0 = vld [vmem:[%s6266_s13 + $0xe10] sm:$0xff]  ;;  %v804_v44 = vld [vmem:[%s6266_s13 + $0xf78] sm:$0xff] }
 0x238   : > { %3891 = vmatpush1.bf16.msra.mxu0 %v5456_v53  ;;  %4055 = vmatpush1.bf16.msra.mxu1 %v5458_v55  ;;  %v5506_v53 = vcombine.low %v744_v31, %v748_v32  ;;  %v5513_v55 = vcombine.high %v751_v42, %v755_v54  ;;  %v5520_v11 = vcombine.low %v759_v0, %v763_v59  ;;  %v791_v31 = vld [vmem:[%s6266_s13 + $0xf10] sm:$0xff] }
 0x239   : > { %3892 = vmatprep.subr.bf16.mxu0 %v5465_v56  ;;  %4056 = vmatprep.subr.bf16.mxu1 %v5467_v57  ;;  %v795_v32 = vld [vmem:[%s6266_s13 + $0xf30] sm:$0xff] }
 0x23a   : > { %3922 = vmatprep.mubr.bf16.mxu0 %v6540_v3  ;;  %4086 = vmatprep.mubr.bf16.mxu1 %v6540_v3  ;;  %v5482_v3 = vcombine.low %v720_v5, %v724_v6  ;;  %v5521_v5 = vcombine.high %v759_v0, %v763_v59  ;;  %v5552_v46 = vcombine.low %v791_v31, %v795_v32  ;;  %v819_v0 = vld [vmem:[%s6266_s13 + $0xff0] sm:$0xff]  ;;  %v816_v59 = vld [vmem:[%s6266_s13 + $0xfd8] sm:$0xff] }
 0x23c   : > { %3893 = vmatpush1.bf16.msra.mxu0 %v5464_v41  ;;  %4057 = vmatpush1.bf16.msra.mxu1 %v5466_v62  ;;  %v760_v41 = vld [vmem:[%s6266_s13 + $0xe18] sm:$0xff] }
 0x23d   : > { %3894 = vmatprep.subr.bf16.mxu0 %v5473_v63  ;;  %4058 = vmatprep.subr.bf16.mxu1 %v5475_v1  ;;  %v764_v62 = vld [vmem:[%s6266_s13 + $0xe38] sm:$0xff]  ;;  %v306_v63 = vld [vmem:[#allocation2] sm:$0xff]  ;;  %v5512_v1 = vcombine.low %v751_v42, %v755_v54 }
 0x23e   : > { %v5523_v6 = vcombine.high %v760_v41, %v764_v62  ;;  %v5522_v12 = vcombine.low %v760_v41, %v764_v62  ;;  %v799_v54 = vld [vmem:[%s6266_s13 + $0xf50] sm:$0xff] }
 0x240   : > { %3895 = vmatpush1.bf16.msra.mxu0 %v5472_v36  ;;  %4059 = vmatpush1.bf16.msra.mxu1 %v5474_v7  ;;  %v767_v36 = vld [vmem:[%s6266_s13 + $0xe50] sm:$0xff] }
 0x241   : > { %3896 = vmatprep.subr.bf16.mxu0 %v5481_v35  ;;  %4060 = vmatprep.subr.bf16.mxu1 %v5483_v8  ;;  %v771_v7 = vld [vmem:[%s6266_s13 + $0xe70] sm:$0xff]  ;;  %v768_v8 = vld [vmem:[%s6266_s13 + $0xe58] sm:$0xff] }
 0x242   : > { %v5529_v14 = vcombine.high %v767_v36, %v771_v7  ;;  %v5528_v19 = vcombine.low %v767_v36, %v771_v7  ;;  %v5530_v20 = vcombine.low %v768_v8, %v772_v9 }
 0x244   : > { %3897 = vmatpush1.bf16.msra.mxu0 %v5480_v15  ;;  %4061 = vmatpush1.bf16.msra.mxu1 %v5482_v3  ;;  %v5531_v15 = vcombine.high %v768_v8, %v772_v9  ;;  %v775_v3 = vld [vmem:[%s6266_s13 + $0xe90] sm:$0xff] }
 0x245   : > { %3898 = vmatprep.subr.bf16.mxu0 %v5489_v16  ;;  %4062 = vmatprep.subr.bf16.mxu1 %v5491_v17  ;;  %v779_v16 = vld [vmem:[%s6266_s13 + $0xeb0] sm:$0xff]  ;;  %v776_v17 = vld [vmem:[%s6266_s13 + $0xe98] sm:$0xff] }
 0x246   : > { %v5537_v21 = vcombine.high %v775_v3, %v779_v16  ;;  %v5539_v22 = vcombine.high %v776_v17, %v780_v18  ;;  %v5536_v28 = vcombine.low %v775_v3, %v779_v16  ;;  %v307_v16 = vld [vmem:[#allocation2 + $0x8] sm:$0xff] }
 0x248   : > { %3899 = vmatpush1.bf16.msra.mxu0 %v5488_v24  ;;  %4063 = vmatpush1.bf16.msra.mxu1 %v5490_v25  ;;  %v787_v24 = vld [vmem:[%s6266_s13 + $0xef0] sm:$0xff]  ;;  %v784_v25 = vld [vmem:[%s6266_s13 + $0xed8] sm:$0xff] }
 0x249   : > { %3900 = vmatprep.subr.bf16.mxu0 %v5497_v27  ;;  %4064 = vmatprep.subr.bf16.mxu1 %v5499_v60  ;;  %v788_v27 = vld [vmem:[%s6266_s13 + $0xef8] sm:$0xff]  ;;  %v5538_v60 = vcombine.low %v776_v17, %v780_v18  ;;  %v5545_v29 = vcombine.high %v783_v23, %v787_v24 }
 0x24a   : > { %v3596_v38 = vpop.f32.mrb[0].mxu0  ;;  %v3760_v10 = vpop.f32.mrb[0].mxu1  ;;  %v5547_v30 = vcombine.high %v784_v25, %v788_v27 }
 0x24b   : > { %v3598_v43 = vpop.f32.mrb[1].mxu0  ;;  %v3762_v48 = vpop.f32.mrb[1].mxu1 }
 0x24c   : > { %v4103_v47 = vcombine.low %v3596_v38, %v3598_v43  ;;  %v3600_v49 = vpop.f32.mrb[2].mxu0  ;;  %3901 = vmatpush1.bf16.msra.mxu0 %v5496_v33  ;;  %v4104_v50 = vcombine.low %v3760_v10, %v3762_v48  ;;  %v3764_v51 = vpop.f32.mrb[2].mxu1  ;;  %4065 = vmatpush1.bf16.msra.mxu1 %v5498_v34  ;;  %v792_v33 = vld [vmem:[%s6266_s13 + $0xf18] sm:$0xff]  ;;  %v5546_v38 = vcombine.low %v784_v25, %v788_v27  ;;  %v803_v10 = vld [vmem:[%s6266_s13 + $0xf70] sm:$0xff] }
 0x24d   : > { %v3601_v52 = vpop.f32.mrb[3].mxu0  ;;  %3902 = vmatprep.subr.bf16.mxu0 %v5505_v37  ;;  %v3765_v57 = vpop.f32.mrb[3].mxu1  ;;  %4066 = vmatprep.subr.bf16.mxu1 %v5507_v40  ;;  %v796_v34 = vld [vmem:[%s6266_s13 + $0xf38] sm:$0xff]  ;;  %v5544_v37 = vcombine.low %v783_v23, %v787_v24  ;;  %v5553_v40 = vcombine.high %v791_v31, %v795_v32  ;;  %v5561_v48 = vcombine.high %v799_v54, %v803_v10  ;;  %v5875_v23 = vld [vmem:[#allocation7 + $0xc8] sm:$0xff] (!%p5580_p7)   ;;  %v5883_v31 = vld [vmem:[#allocation7 + $0xd8] sm:$0xff] (!%p5580_p7)  }
 0x24e   : > { %v4111_v56 = vrot.slane %v4103_v47, %v6841_v39  ;;  %v4118_v61 = vrot.slane %v4104_v50, %v6841_v39  ;;  %v5555_v42 = vcombine.high %v792_v33, %v796_v34  ;;  %v800_v43 = vld [vmem:[%s6266_s13 + $0xf58] sm:$0xff]  ;;  %v5554_v47 = vcombine.low %v792_v33, %v796_v34  ;;  %v811_v50 = vld [vmem:[%s6266_s13 + $0xfb0] sm:$0xff]  ;;  %v5884_v32 = vld [vmem:[#allocation7 + $0x18] sm:$0xff] (!%p5580_p7)  }
 0x24f   : > { %v5563_v49 = vcombine.high %v800_v43, %v804_v44  ;;  %v808_v51 = vld [vmem:[%s6266_s13 + $0xf98] sm:$0xff]  ;;  %v5876_v24 = vld [vmem:[#allocation7 + $0x8] sm:$0xff] (!%p5580_p7)   ;;  %v5885_v33 = vld [vmem:[#allocation7 + $0x98] sm:$0xff] (!%p5580_p7)  }
 0x250   : > { %3903 = vmatpush1.bf16.msra.mxu0 %v5504_v26  ;;  %v4119_v2 = vcombine.low %v4111_v56, %v4118_v61  ;;  %4067 = vmatpush1.bf16.msra.mxu1 %v5506_v53  ;;  %v807_v26 = vld [vmem:[%s6266_s13 + $0xf90] sm:$0xff]  ;;  %v812_v52 = vld [vmem:[%s6266_s13 + $0xfb8] sm:$0xff]  ;;  %v5560_v53 = vcombine.low %v799_v54, %v803_v10  ;;  %v5886_v34 = vld [vmem:[#allocation7 + $0x60] sm:$0xff] (!%p5580_p7)  }
 0x251   : > { %3904 = vmatprep.subr.bf16.mxu0 %v5513_v55  ;;  %4068 = vmatprep.subr.bf16.mxu1 %v5515_v58  ;;  %v5562_v55 = vcombine.low %v800_v43, %v804_v44  ;;  %v5569_v56 = vcombine.high %v807_v26, %v811_v50  ;;  %v5571_v57 = vcombine.high %v808_v51, %v812_v52  ;;  %v815_v58 = vld [vmem:[%s6266_s13 + $0xfd0] sm:$0xff]  ;;  %v820_v61 = vld [vmem:[%s6266_s13 + $0xff8] sm:$0xff] }
 0x252   : > { %v4139_v35 = vadd.f32 %v4119_v2, %v306_v63  ;;  %v5568_v41 = vcombine.low %v807_v26, %v811_v50  ;;  %v5570_v62 = vcombine.low %v808_v51, %v812_v52  ;;  %v5577_v63 = vcombine.high %v815_v58, %v819_v0  ;;  %v5877_v25 = vld [vmem:[#allocation7 + $0x88] sm:$0xff] (!%p5580_p7)   ;;  %v5878_v27 = vld [vmem:[#allocation7 + $0x50] sm:$0xff] (!%p5580_p7)   ;;  %v5898_v50 = vld [vmem:[#allocation7 + $0x78] sm:$0xff] (!%p5580_p7)  }
 0x253   : > { %v5576_v2 = vcombine.low %v815_v58, %v819_v0  ;;  %v5891_v54 = vld [vmem:[#allocation7 + $0xe8] sm:$0xff] (!%p5580_p7)   ;;  %v5894_v44 = vld [vmem:[#allocation7 + $0x70] sm:$0xff] (!%p5580_p7)   ;;  %v4157_v26 = vsub.s32 (!%p5580_p7), 1, %v6306_v45  ;;  %v4161_v51 = vsub.s32 (!%p5580_p7), 2, %v6306_v45  ;;  %v5899_v52 = vld [vmem:[#allocation7 + $0xf8] sm:$0xff] (!%p5580_p7)  }
 0x254   : > { %3905 = vmatpush1.bf16.msra.mxu0 %v5512_v1  ;;  %4141 = vst [vmem:[#allocation2] sm:$0xff] %v4139_v35  ;;  %4069 = vmatpush1.bf16.msra.mxu1 %v5514_v4  ;;  %v5579_v1 = vcombine.high %v816_v59, %v820_v61  ;;  %v5578_v4 = vcombine.low %v816_v59, %v820_v61  ;;  %v5892_v10 = vld [vmem:[#allocation7 + $0x28] sm:$0xff] (!%p5580_p7)  }
 0x255   : > { %3906 = vmatprep.subr.bf16.mxu0 %v5521_v5  ;;  %4070 = vmatprep.subr.bf16.mxu1 %v5523_v6  ;;  %v5893_v43 = vld [vmem:[#allocation7 + $0xa8] sm:$0xff] (!%p5580_p7)  }
 0x258   : > { %3907 = vmatpush1.bf16.msra.mxu0 %v5520_v11  ;;  %4071 = vmatpush1.bf16.msra.mxu1 %v5522_v12 }
 0x259   : > { %3908 = vmatprep.subr.bf16.mxu0 %v5529_v14  ;;  %4072 = vmatprep.subr.bf16.mxu1 %v5531_v15 }
 0x25c   : > { %3909 = vmatpush1.bf16.msra.mxu0 %v5528_v19  ;;  %4073 = vmatpush1.bf16.msra.mxu1 %v5530_v20  ;;  %v5871_v19 = vld [vmem:[#allocation7 + $0xc0] sm:$0xff] (!%p5580_p7)  }
 0x25d   : > { %3910 = vmatprep.subr.bf16.mxu0 %v5537_v21  ;;  %4074 = vmatprep.subr.bf16.mxu1 %v5539_v22  ;;  %v5872_v20 = vld [vmem:[#allocation7] sm:$0xff] (!%p5580_p7)   ;;  %v5874_v22 = vld [vmem:[#allocation7 + $0x48] sm:$0xff] (!%p5580_p7)  }
 0x25e   : > { %v5873_v21 = vld [vmem:[#allocation7 + $0x80] sm:$0xff] (!%p5580_p7)  }
 0x260   : > { %3911 = vmatpush1.bf16.msra.mxu0 %v5536_v28  ;;  %4075 = vmatpush1.bf16.msra.mxu1 %v5538_v60  ;;  %v5879_v28 = vld [vmem:[#allocation7 + $0xd0] sm:$0xff] (!%p5580_p7)  }
 0x261   : > { %3912 = vmatprep.subr.bf16.mxu0 %v5545_v29  ;;  %4076 = vmatprep.subr.bf16.mxu1 %v5547_v30  ;;  %v5880_v60 = vld [vmem:[#allocation7 + $0x10] sm:$0xff] (!%p5580_p7)   ;;  %v5882_v30 = vld [vmem:[#allocation7 + $0x58] sm:$0xff] (!%p5580_p7)  }
 0x262   : > { %v5881_v29 = vld [vmem:[#allocation7 + $0x90] sm:$0xff] (!%p5580_p7)  }
 0x264   : > { %3913 = vmatpush1.bf16.msra.mxu0 %v5544_v37  ;;  %4077 = vmatpush1.bf16.msra.mxu1 %v5546_v38  ;;  %v5887_v37 = vld [vmem:[#allocation7 + $0xe0] sm:$0xff] (!%p5580_p7)  }
 0x265   : > { %3914 = vmatprep.subr.bf16.mxu0 %v5553_v40  ;;  %4078 = vmatprep.subr.bf16.mxu1 %v5555_v42  ;;  %v5888_v38 = vld [vmem:[#allocation7 + $0x20] sm:$0xff] (!%p5580_p7)   ;;  %v5890_v42 = vld [vmem:[#allocation7 + $0x68] sm:$0xff] (!%p5580_p7)  }
 0x266   : > { %v5889_v40 = vld [vmem:[#allocation7 + $0xa0] sm:$0xff] (!%p5580_p7)  }
 0x268   : > { %3915 = vmatpush1.bf16.msra.mxu0 %v5552_v46  ;;  %4079 = vmatpush1.bf16.msra.mxu1 %v5554_v47  ;;  %v5895_v46 = vld [vmem:[#allocation7 + $0xf0] sm:$0xff] (!%p5580_p7)  }
 0x269   : > { %3916 = vmatprep.subr.bf16.mxu0 %v5561_v48  ;;  %4080 = vmatprep.subr.bf16.mxu1 %v5563_v49  ;;  %v5896_v47 = vld [vmem:[#allocation7 + $0x30] sm:$0xff] (!%p5580_p7)   ;;  %v4153_v48 = vsub.s32 (!%p5580_p7), 0, %v6306_v45 }
 0x26a   : > { %v5897_v49 = vld [vmem:[#allocation7 + $0xb0] sm:$0xff] (!%p5580_p7)  }
 0x26c   : > { %3917 = vmatpush1.bf16.msra.mxu0 %v5560_v53  ;;  %4081 = vmatpush1.bf16.msra.mxu1 %v5562_v55  ;;  %v4165_v53 = vsub.s32 (!%p5580_p7), 3, %v6306_v45  ;;  %v5900_v55 = vld [vmem:[#allocation7 + $0x38] sm:$0xff] (!%p5580_p7)  }
 0x26d   : > { %3918 = vmatprep.subr.bf16.mxu0 %v5569_v56  ;;  %4082 = vmatprep.subr.bf16.mxu1 %v5571_v57  ;;  %v5901_v56 = vld [vmem:[#allocation7 + $0xb8] sm:$0xff] (!%p5580_p7)  }
 0x26e   : > { %v4149_v57 = vld [vmem:[#allocation5] sm:$0xff] (!%p5580_p7) }
 0x26f   : > { %v4154_v58 = vrot.slane (!%p5580_p7), %v4149_v57, %v4153_v48  ;;  %v4158_v0 = vrot.slane (!%p5580_p7), %v4149_v57, %v4157_v26  ;;  %v4162_v59 = vrot.slane (!%p5580_p7), %v4149_v57, %v4161_v51  ;;  %v4166_v61 = vrot.slane (!%p5580_p7), %v4149_v57, %v4165_v53  ;;  %v5920_v48 = vld [vmem:[#allocation7 + $0x120] sm:$0xff] (!%p5580_p7)   ;;  %v5922_v26 = vld [vmem:[#allocation7 + $0x168] sm:$0xff] (!%p5580_p7)  }
 0x270   : > { %3919 = vmatpush1.bf16.msra.mxu0 %v5568_v41  ;;  %4083 = vmatpush1.bf16.msra.mxu1 %v5570_v62  ;;  %v5902_v41 = vld [vmem:[#allocation7 + $0x140] sm:$0xff] (!%p5580_p7)   ;;  %v5924_v53 = vld [vmem:[#allocation7 + $0x128] sm:$0xff] (!%p5580_p7)  }
 0x271   : > { %3920 = vmatprep.subr.bf16.mxu0 %v5577_v63  ;;  %4084 = vmatprep.subr.bf16.mxu1 %v5579_v1  ;;  %v5903_v62 = vld [vmem:[#allocation7 + $0x1c0] sm:$0xff] (!%p5580_p7)   ;;  %v4183_v63 = vcombine.low (!%p5580_p7), %v4154_v58, %v4158_v0  ;;  %v4184_v1 = vcombine.low (!%p5580_p7), %v4162_v59, %v4166_v61  ;;  %v5925_v58 = vld [vmem:[#allocation7 + $0x1a8] sm:$0xff] (!%p5580_p7)   ;;  %v5927_v61 = vld [vmem:[#allocation7 + $0x1f0] sm:$0xff] (!%p5580_p7)  }
 0x274   : > { %3921 = vmatpush1.bf16.msra.mxu0 %v5576_v2  ;;  %4085 = vmatpush1.bf16.msra.mxu1 %v5578_v4  ;;  %v4191_v2 = vrot.slane (!%p5580_p7), %v4183_v63, %v6841_v39  ;;  %v4198_v4 = vrot.slane (!%p5580_p7), %v4184_v1, %v6841_v39  ;;  %v5930_v1 = vld [vmem:[#allocation7 + $0x178] sm:$0xff] (!%p5580_p7)  }
 0x275   : > { %5672 = vmatprep.subr.bf16.mxu1 (!%p5580_p7), %v5871_v19 }
 0x277   : > { %3923 = vmatmul.mubr.bf16.vlgmr.msra.gmra.mrb[4].mxu0 %v6608_v13  ;;  %4087 = vmatmul.mubr.bf16.vlgmr.msra.gmra.mrb[4].mxu1 %v6608_v13  ;;  %v5870_v13 = vld [vmem:[#allocation7 + $0x40] sm:$0xff] (!%p5580_p7)  }
 0x278   : > { %5650 = vmatprep.subr.bf16.mxu0 (!%p5580_p7), %v5870_v13  ;;  %5673 = vmatpush3.bf16.msra.mxu1 (!%p5580_p7), %v5873_v21 }
 0x279   : > { %5651 = vmatpush3.bf16.msra.mxu0 (!%p5580_p7), %v5872_v20  ;;  %5674 = vmatprep.subr.bf16.mxu1 (!%p5580_p7), %v5875_v23  ;;  %v5904_v20 = vld [vmem:[#allocation7 + $0x100] sm:$0xff] (!%p5580_p7)  }
 0x27a   : > { %5652 = vmatprep.subr.bf16.mxu0 (!%p5580_p7), %v5874_v22 }
 0x27c   : > { %5675 = vmatpush3.bf16.msra.mxu1 (!%p5580_p7), %v5877_v25 }
 0x27d   : > { %5653 = vmatpush3.bf16.msra.mxu0 (!%p5580_p7), %v5876_v24  ;;  %5676 = vmatprep.subr.bf16.mxu1 (!%p5580_p7), %v5879_v28  ;;  %v5906_v24 = vld [vmem:[#allocation7 + $0x148] sm:$0xff] (!%p5580_p7)  }
 0x27e   : > { %5654 = vmatprep.subr.bf16.mxu0 (!%p5580_p7), %v5878_v27  ;;  %v5905_v27 = vld [vmem:[#allocation7 + $0x180] sm:$0xff] (!%p5580_p7)   ;;  %v5907_v28 = vld [vmem:[#allocation7 + $0x1c8] sm:$0xff] (!%p5580_p7)  }
 0x280   : > { %5677 = vmatpush3.bf16.msra.mxu1 (!%p5580_p7), %v5881_v29 }
 0x281   : > { %5655 = vmatpush3.bf16.msra.mxu0 (!%p5580_p7), %v5880_v60  ;;  %5678 = vmatprep.subr.bf16.mxu1 (!%p5580_p7), %v5883_v31  ;;  %v5909_v31 = vld [vmem:[#allocation7 + $0x188] sm:$0xff] (!%p5580_p7)  }
 0x282   : > { %5656 = vmatprep.subr.bf16.mxu0 (!%p5580_p7), %v5882_v30  ;;  %v5910_v30 = vld [vmem:[#allocation7 + $0x150] sm:$0xff] (!%p5580_p7)  }
 0x284   : > { %5679 = vmatpush3.bf16.msra.mxu1 (!%p5580_p7), %v5885_v33  ;;  %v5912_v33 = vld [vmem:[#allocation7 + $0x110] sm:$0xff] (!%p5580_p7)  }
 0x285   : > { %5657 = vmatpush3.bf16.msra.mxu0 (!%p5580_p7), %v5884_v32  ;;  %5680 = vmatprep.subr.bf16.mxu1 (!%p5580_p7), %v5887_v37  ;;  %v5911_v32 = vld [vmem:[#allocation7 + $0x1d0] sm:$0xff] (!%p5580_p7)  }
 0x286   : > { %5658 = vmatprep.subr.bf16.mxu0 (!%p5580_p7), %v5886_v34 }
 0x288   : > { %5681 = vmatpush3.bf16.msra.mxu1 (!%p5580_p7), %v5889_v40  ;;  %v5913_v40 = vld [vmem:[#allocation7 + $0x190] sm:$0xff] (!%p5580_p7)  }
 0x289   : > { %5659 = vmatpush3.bf16.msra.mxu0 (!%p5580_p7), %v5888_v38  ;;  %5682 = vmatprep.subr.bf16.mxu1 (!%p5580_p7), %v5891_v54  ;;  %v5914_v38 = vld [vmem:[#allocation7 + $0x158] sm:$0xff] (!%p5580_p7)  }
 0x28a   : > { %5660 = vmatprep.subr.bf16.mxu0 (!%p5580_p7), %v5890_v42  ;;  %v5915_v42 = vld [vmem:[#allocation7 + $0x1d8] sm:$0xff] (!%p5580_p7)  }
 0x28b   : > { %v5916_v54 = vld [vmem:[#allocation7 + $0x118] sm:$0xff] (!%p5580_p7)  }
 0x28c   : > { %5683 = vmatpush3.bf16.msra.mxu1 (!%p5580_p7), %v5893_v43  ;;  %v5918_v43 = vld [vmem:[#allocation7 + $0x160] sm:$0xff] (!%p5580_p7)  }
 0x28d   : > { %5661 = vmatpush3.bf16.msra.mxu0 (!%p5580_p7), %v5892_v10  ;;  %5684 = vmatprep.subr.bf16.mxu1 (!%p5580_p7), %v5895_v46  ;;  %v5919_v46 = vld [vmem:[#allocation7 + $0x1e0] sm:$0xff] (!%p5580_p7)  }
 0x28e   : > { %5662 = vmatprep.subr.bf16.mxu0 (!%p5580_p7), %v5894_v44  ;;  %v5917_v44 = vld [vmem:[#allocation7 + $0x198] sm:$0xff] (!%p5580_p7)  }
 0x290   : > { %5685 = vmatpush3.bf16.msra.mxu1 (!%p5580_p7), %v5897_v49 }
 0x291   : > { %5663 = vmatpush3.bf16.msra.mxu0 (!%p5580_p7), %v5896_v47  ;;  %5686 = vmatprep.subr.bf16.mxu1 (!%p5580_p7), %v5899_v52  ;;  %v5923_v52 = vld [vmem:[#allocation7 + $0x1e8] sm:$0xff] (!%p5580_p7)  }
 0x292   : > { %5664 = vmatprep.subr.bf16.mxu0 (!%p5580_p7), %v5898_v50  ;;  %v5921_v50 = vld [vmem:[#allocation7 + $0x1a0] sm:$0xff] (!%p5580_p7)  }
 0x294   : > { %5687 = vmatpush3.bf16.msra.mxu1 (!%p5580_p7), %v5901_v56 }
 0x295   : > { %5665 = vmatpush3.bf16.msra.mxu0 (!%p5580_p7), %v5900_v55  ;;  %5716 = vmatprep.subr.bf16.mxu1 (!%p5580_p7), %v5903_v62 }
 0x296   : > { %5694 = vmatprep.subr.bf16.mxu0 (!%p5580_p7), %v5902_v41  ;;  %v5928_v41 = vld [vmem:[#allocation7 + $0x130] sm:$0xff] (!%p5580_p7)  }
 0x34a   : > { %v3924_v5 = vpop.f32.mrb[4].mxu0  ;;  %v4088_v6 = vpop.f32.mrb[4].mxu1 }
 0x34b   : > { %v3926_v36 = vpop.f32.mrb[5].mxu0  ;;  %v4090_v35 = vpop.f32.mrb[5].mxu1 }
 0x34c   : > { %v4120_v7 = vcombine.low %v3924_v5, %v3926_v36  ;;  %v3928_v8 = vpop.f32.mrb[6].mxu0  ;;  %v4121_v9 = vcombine.low %v4088_v6, %v4090_v35  ;;  %v4092_v11 = vpop.f32.mrb[6].mxu1  ;;  %v4147_v5 = vld [vmem:[#allocation2] sm:$0xff] (!%p5580_p7)  ;;  %v4199_v6 = vcombine.low (!%p5580_p7), %v4191_v2, %v4198_v4  ;;  %v4169_v35 = vsub.s32 (!%p5580_p7), 4, %v6306_v45  ;;  %v5929_v2 = vld [vmem:[#allocation7 + $0x1b0] sm:$0xff] (!%p5580_p7)  }
 0x34d   : > { %v3929_v12 = vpop.f32.mrb[7].mxu0  ;;  %v4093_v15 = vpop.f32.mrb[7].mxu1  ;;  %v4173_v8 = vsub.s32 (!%p5580_p7), 5, %v6306_v45 }
 0x34e   : > { %v4128_v14 = vrot.slane %v4120_v7, %v6841_v39  ;;  %v4135_v3 = vrot.slane %v4121_v9, %v6841_v39  ;;  %4146 = sbr.rel (%p5580_p7) target bundleno = 1109 (0x455), region = 56  ;;  %v4219_v36 = vadd.f32 (!%p5580_p7), %v4199_v6, %v4147_v5  ;;  %v4177_v12 = vsub.s32 (!%p5580_p7), 6, %v6306_v45  ;;  %v5931_v5 = vld [vmem:[#allocation7 + $0x1f8] sm:$0xff] (!%p5580_p7)  }
 0x34f   : > { %v5932_v6 = vld [vmem:[#allocation7 + $0x138] sm:$0xff] (!%p5580_p7)  }
 0x350   : > { %v4136_v17 = vcombine.low %v4128_v14, %v4135_v3  ;;  %v4221_v7 = vmax.f32 (!%p5580_p7), %v4219_v36, 0.0  ;;  %v4181_v14 = vsub.s32 (!%p5580_p7), 7, %v6306_v45  ;;  %v4178_v21 = vrot.slane (!%p5580_p7), %v4149_v57, %v4177_v12  ;;  %v5908_v45 = vld [vmem:[#allocation7 + $0x108] sm:$0xff] (!%p5580_p7)  }
 0x352   : > { %v4140_v18 = vadd.f32 %v4136_v17, %v307_v16  ;;  %v4232_v9 = vrot.slane (!%p5580_p7), %v4221_v7, %v6841_v39  ;;  %v4225_v11 = vcombine.high (!%p5580_p7), %v4221_v7, %v4221_v7  ;;  %v4170_v17 = vrot.slane (!%p5580_p7), %v4149_v57, %v4169_v35 }
 0x353   : > { %v4182_v22 = vrot.slane (!%p5580_p7), %v4149_v57, %v4181_v14 }
 0x354   : > { %4142 = vst [vmem:[#allocation2 + $0x8] sm:$0xff] %v4140_v18  ;;  %v4240_v15 = vcombine.high (!%p5580_p7), %v4232_v9, %v4232_v9  ;;  %v4239_v3 = vrot.slane (!%p5580_p7), %v4225_v11, %v6841_v39  ;;  %v4267_v16 = vpack.c.bf16 (!%p5580_p7), %v4232_v9, %v4232_v9  ;;  %v4174_v18 = vrot.slane (!%p5580_p7), %v4149_v57, %v4173_v8  ;;  %v5926_v57 = vld [vmem:[#allocation7 + $0x170] sm:$0xff] (!%p5580_p7)  }
 0x355   : > { %v4201_v29 = vcombine.low %v4178_v21, %v4182_v22 }
 0x356   : > { %v4268_v13 = vpack.c.bf16 %v4240_v15, %v4240_v15  ;;  %v4241_v19 = vcombine.high %v4239_v3, %v4239_v3  ;;  %v4269_v23 = vpack.c.bf16 %v4239_v3, %v4239_v3  ;;  %v4200_v60 = vcombine.low %v4170_v17, %v4174_v18 }
 0x357   : > { %v4215_v37 = vrot.slane %v4201_v29, %v6841_v39 }
 0x358   : > { %4819 = vmatprep.mubr.bf16.mxu0 %v4268_v13  ;;  %v4270_v25 = vpack.c.bf16 %v4241_v19, %v4241_v19  ;;  %v4208_v34 = vrot.slane %v4200_v60, %v6841_v39 }
 0x359   : > { %4820 = vmatmul.mubr.bf16.vlgmr.msra.gmra.mrb[0].mxu0 %v4267_v16 }
 0x35a   : > { %4859 = vmatprep.mubr.bf16.mxu1 %v4270_v25  ;;  %5695 = vmatpush3.bf16.msra.mxu0 %v5904_v20  ;;  %v4216_v10 = vcombine.low %v4208_v34, %v4215_v37 }
 0x35b   : > { %4860 = vmatmul.mubr.bf16.vlgmr.msra.gmra.mrb[0].mxu1 %v4269_v23  ;;  %5696 = vmatprep.subr.bf16.mxu0 %v5906_v24  ;;  %v4148_v47 = vld [vmem:[#allocation2 + $0x8] sm:$0xff] }
 0x35c   : > { %5717 = vmatpush3.bf16.msra.mxu1 %v5905_v27  ;;  %v4220_v49 = vadd.f32 %v4216_v10, %v4148_v47 }
 0x35d   : > { %5718 = vmatprep.subr.bf16.mxu1 %v5907_v28 }
 0x35e   : > { %5697 = vmatpush3.bf16.msra.mxu0 %v5908_v45  ;;  %v4222_v51 = vmax.f32 %v4220_v49, 0.0 }
 0x35f   : > { %5698 = vmatprep.subr.bf16.mxu0 %v5910_v30 }
 0x360   : > { %5719 = vmatpush3.bf16.msra.mxu1 %v5909_v31  ;;  %v4249_v55 = vrot.slane %v4222_v51, %v6841_v39  ;;  %v4242_v56 = vcombine.high %v4222_v51, %v4222_v51 }
 0x361   : > { %5720 = vmatprep.subr.bf16.mxu1 %v5911_v32 }
 0x362   : > { %5699 = vmatpush3.bf16.msra.mxu0 %v5912_v33  ;;  %v4257_v0 = vcombine.high %v4249_v55, %v4249_v55  ;;  %v4256_v59 = vrot.slane %v4242_v56, %v6841_v39  ;;  %v5933_v39 = vld [vmem:[#allocation7 + $0x1b8] sm:$0xff]   ;;  %v4271_v36 = vpack.c.bf16 %v4249_v55, %v4249_v55 }
 0x363   : > { %5700 = vmatprep.subr.bf16.mxu0 %v5914_v38 }
 0x364   : > { %5721 = vmatpush3.bf16.msra.mxu1 %v5913_v40  ;;  %v4272_v62 = vpack.c.bf16 %v4257_v0, %v4257_v0  ;;  %v4258_v63 = vcombine.high %v4256_v59, %v4256_v59  ;;  %v4273_v7 = vpack.c.bf16 %v4256_v59, %v4256_v59 }
 0x365   : > { %5722 = vmatprep.subr.bf16.mxu1 %v5915_v42 }
 0x366   : > { %5701 = vmatpush3.bf16.msra.mxu0 %v5916_v54  ;;  %4899 = vmatprep.mubr.bf16.mxu0 %v4272_v62  ;;  %v4274_v4 = vpack.c.bf16 %v4258_v63, %v4258_v63 }
 0x367   : > { %5702 = vmatprep.subr.bf16.mxu0 %v5918_v43 }
 0x368   : > { %5723 = vmatpush3.bf16.msra.mxu1 %v5917_v44  ;;  %4939 = vmatprep.mubr.bf16.mxu1 %v4274_v4 }
 0x369   : > { %5724 = vmatprep.subr.bf16.mxu1 %v5919_v46 }
 0x36a   : > { %5703 = vmatpush3.bf16.msra.mxu0 %v5920_v48 }
 0x36b   : > { %5704 = vmatprep.subr.bf16.mxu0 %v5922_v26 }
 0x36c   : > { %5725 = vmatpush3.bf16.msra.mxu1 %v5921_v50 }
 0x36d   : > { %5726 = vmatprep.subr.bf16.mxu1 %v5923_v52 }
 0x36e   : > { %5705 = vmatpush3.bf16.msra.mxu0 %v5924_v53 }
 0x36f   : > { %5706 = vmatprep.subr.bf16.mxu0 %v5926_v57 }
 0x370   : > { %5727 = vmatpush3.bf16.msra.mxu1 %v5925_v58 }
 0x371   : > { %5728 = vmatprep.subr.bf16.mxu1 %v5927_v61 }
 0x372   : > { %5707 = vmatpush3.bf16.msra.mxu0 %v5928_v41 }
 0x373   : > { %5708 = vmatprep.subr.bf16.mxu0 %v5930_v1 }
 0x374   : > { %5729 = vmatpush3.bf16.msra.mxu1 %v5929_v2 }
 0x375   : > { %5730 = vmatprep.subr.bf16.mxu1 %v5931_v5 }
 0x376   : > { %5709 = vmatpush3.bf16.msra.mxu0 %v5932_v6 }
 0x378   : > { %5731 = vmatpush3.bf16.msra.mxu1 %v5933_v39 }
 0x379   : > { %4900 = vmatmul.mubr.bf16.vlgmr.msra.gmra.mrb[4].mxu0 %v4271_v36 }
 0x37b   : > { %4940 = vmatmul.mubr.bf16.vlgmr.msra.gmra.mrb[4].mxu1 %v4273_v7 }
 0x42c   : > { %v5666_v35 = vpop.f32.mrb[0].mxu0 }
 0x42d   : > { %v5667_v8 = vpop.f32.mrb[1].mxu0 }
 0x42e   : > { %v5688_v9 = vpop.f32.mrb[0].mxu1  ;;  %v5668_v11 = vadd.f32 %v5667_v8, %v5666_v35  ;;  %v5669_v12 = vpop.f32.mrb[2].mxu0 }
 0x42f   : > { %v5689_v14 = vpop.f32.mrb[1].mxu1  ;;  %v5670_v15 = vpop.f32.mrb[3].mxu0 }
 0x430   : > { %v5690_v3 = vadd.f32 %v5689_v14, %v5688_v9  ;;  %v5691_v16 = vpop.f32.mrb[2].mxu1 }
 0x431   : > { %v5692_v17 = vpop.f32.mrb[3].mxu1 }
 0x432   : > { %v4862_v18 = vadd.f32 %v5690_v3, %v5668_v11 }
 0x44c   : > { %v5710_v13 = vpop.f32.mrb[4].mxu0 }
 0x44d   : > { %v5711_v19 = vpop.f32.mrb[5].mxu0 }
 0x44e   : > { %v5732_v20 = vpop.f32.mrb[4].mxu1  ;;  %v5712_v21 = vadd.f32 %v5711_v19, %v5710_v13  ;;  %v5713_v22 = vpop.f32.mrb[6].mxu0 }
 0x44f   : > { %v5733_v23 = vpop.f32.mrb[5].mxu1  ;;  %v5714_v24 = vpop.f32.mrb[7].mxu0 }
 0x450   : > { %v4902_v25 = vadd.f32 %v5712_v21, %v4862_v18  ;;  %v5734_v27 = vadd.f32 %v5733_v23, %v5732_v20  ;;  %v5735_v28 = vpop.f32.mrb[6].mxu1 }
 0x451   : > { %v5736_v45 = vpop.f32.mrb[7].mxu1 }
 0x452   : > { %v4942_v60 = vadd.f32 %v5734_v27, %v4902_v25 }
 0x454   : > { %4947 = vst [vmem:[%s6927_s4] sm:$0x3] %v4942_v60 }
 0x455 PF: > { %s18_s20 = sadd.s32 1, %s6074_s20   ;;  %s6942_s21 = smov %s6949_s15 }
 0x456   : > { %p15_p9 = scmp.ge.s32.totalorder %s18_s20, 4   ;;  %s6943_s15 = smov %s6058_s16 }
 0x457   : > { %s6944_s16 = smov %s6062_s17  ;;  %s6945_s17 = smov %s6233_s9 }
 0x458   : > { %s6946_s18 = smov %s6070_s19  ;;  %s6947_s19 = smov %s6942_s21 }
 0x459   :  { %17 = sbr.rel (!%p15_p9) target bundleno = 5 (0x5), region = 97 }
 0x460   :  { %4967 = vsyncpa [#allocation4], 1 }
 0x461   :  { %4969 = vsyncpa [#allocation4 + $0x1], 1 }
 0x462   :  { %4970 = vsyncpa [#allocation6], 1 }

</bundles_post_ra>
